<compile_context>
chip_gen: v7x
topology: tpu7x:2x2x1
jax: 0.10.0
libtpu: 0.0.40
codegen_flags: <defaults>
</compile_context>

<pallas_src>
import functools

import numpy as np
import jax
import jax.numpy as jnp
from jax.experimental import pallas as pl
from jax.experimental.pallas import tpu as pltpu


_RMS_EPS = 1e-6
_NEG_INF = -1e30      # large finite mask value (avoids -inf propagation)
_LANES = 128          # lane width of the packed f32 constants slab


def _up8(n):
    return ((n + 7) // 8) * 8


# ----------------------------------------------------------------------------
# shared math helpers (lower to VPU/EUP/MXU ops inside the kernel)
# ----------------------------------------------------------------------------
def _rmsnorm(x, w):
    var = jnp.mean(x * x, axis=-1, keepdims=True)
    return x * jax.lax.rsqrt(var + _RMS_EPS) * w


def _mm(a, b):
    """MXU matmul: bf16 operands, f32 accumulate."""
    return jnp.dot(a.astype(jnp.bfloat16), b.astype(jnp.bfloat16),
                   preferred_element_type=jnp.float32)


def _mm_t(a, b):
    """a @ b.T (contract last dims), bf16 operands, f32 accumulate."""
    return jax.lax.dot_general(a.astype(jnp.bfloat16), b.astype(jnp.bfloat16),
                               (((1,), (1,)), ((), ())),
                               preferred_element_type=jnp.float32)


# ----------------------------------------------------------------------------
# constants-slab layout (shared by the host packer and the kernel)
# ----------------------------------------------------------------------------
def consts_layout(B, T, A, n_heads, head_dim, state_dim, bins, n_layers):
    H = n_heads * head_dim
    BT = B * T
    S = n_heads * BT
    sections = (("cos", BT), ("sin", BT), ("rot", H), ("hm", S),
                ("rep", S), ("rept", BT), ("selidx", B * A + 2),
                ("sew", state_dim), ("ow", H), ("ob", 1),
                ("norm", 2 * n_layers + 1))
    off, r = {}, 0
    for name, n_rows in sections:
        off[name] = r
        r += _up8(n_rows)
    return off, r


# ----------------------------------------------------------------------------
# the single fused kernel
# ----------------------------------------------------------------------------
def fused_dt_kernel(tok_ref, consts_ref, w32_ref, wd_ref, o_ref, *,
                    n_layers, n_heads, head_dim, B, T, A, state_dim, bins,
                    inter_dim):
    H = n_heads * head_dim
    BT = B * T
    S = n_heads * BT
    I = inter_dim
    off, _ = consts_layout(B, T, A, n_heads, head_dim, state_dim, bins,
                           n_layers)
    scale = 1.0 / float(head_dim) ** 0.5

    # ---- constants (hoisted; loaded once, reused across layers) -------------
    cos = consts_ref[off["cos"]:off["cos"] + BT, 0:H]
    sin = consts_ref[off["sin"]:off["sin"] + BT, 0:H]
    rot = consts_ref[off["rot"]:off["rot"] + H, 0:H]           # rotate-half
    hm = consts_ref[off["hm"]:off["hm"] + S, 0:H]              # head lane masks
    row_b = consts_ref[off["hm"]:off["hm"] + S, H:H + 1]       # batch idx / row
    row_t = consts_ref[off["hm"]:off["hm"] + S, H + 1:H + 2]   # token idx / row
    rep = consts_ref[off["rep"]:off["rep"] + S, 0:BT]          # head replicate
    rept = consts_ref[off["rept"]:off["rept"] + BT, 0:S]       # head reduce
    sel = consts_ref[off["selidx"]:off["selidx"] + B * A, 0:BT]
    col_b = consts_ref[off["selidx"] + B * A:off["selidx"] + B * A + 1, 0:BT]
    col_t = consts_ref[off["selidx"] + B * A + 1:
                       off["selidx"] + B * A + 2, 0:BT]
    sew = consts_ref[off["sew"]:off["sew"] + state_dim, 0:H]   # state-emb W
    out_w = consts_ref[off["ow"]:off["ow"] + H, 0:bins]
    out_b = consts_ref[off["ob"]:off["ob"] + 1, 0:bins]

    # additive causal + batch-block-diagonal mask, rebuilt in-kernel from O(BT)
    # index vectors (same mask for every stacked head block).
    allowed = jnp.logical_and(row_b == col_b, col_t <= row_t)  # (S, BT)
    addmask = jnp.where(allowed, 0.0, _NEG_INF)

    # ---- token assembly ------------------------------------------------------
    # state rows:  state_emb(states) + time_emb + bias  (time+bias pre-added on
    #   the host into `base`; state features of action rows are zero-padded)
    # action rows: action_emb (already in `base`)
    x = tok_ref[:, 0:H] + _mm(tok_ref[:, H:H + state_dim], sew)      # (BT, H)

    for l in range(n_layers):
        ln1 = consts_ref[off["norm"] + 2 * l:off["norm"] + 2 * l + 1, 0:H]
        ln2 = consts_ref[off["norm"] + 2 * l + 1:off["norm"] + 2 * l + 2, 0:H]

        # ---- attention: fused QKV, head-batched softmax on sublane axis -----
        h = _rmsnorm(x, ln1)
        qkv = _mm(h, w32_ref[l, :, 0:3 * H])                         # (BT, 3H)
        q = qkv[:, 0:H]
        k = qkv[:, H:2 * H]
        v = qkv[:, 2 * H:3 * H]
        q = q * cos + _mm(q, rot) * sin                              # RoPE
        k = k * cos + _mm(k, rot) * sin
        q_stack = _mm(rep, q) * hm                                   # (S, H)
        s = _mm_t(q_stack, k) * scale + addmask                      # (S, BT)
        s = s - jnp.max(s, axis=-1, keepdims=True)
        p = jnp.exp(s)
        p = p / jnp.sum(p, axis=-1, keepdims=True)                   # exact
        ctx = _mm(rept, _mm(p, v) * hm)                              # (BT, H)
        x = x + _mm(ctx, w32_ref[l, :, 3 * H:4 * H])                 # out proj

        # ---- SwiGLU MLP: fused gate|up matmul --------------------------------
        h2 = _rmsnorm(x, ln2)
        gu = _mm(h2, w32_ref[l, :, 4 * H:4 * H + 2 * I])             # (BT, 2I)
        g = gu[:, 0:I]
        g = g * jax.nn.sigmoid(g)                                    # SiLU
        x = x + _mm(g * gu[:, I:2 * I], wd_ref[l])

    # ---- final RMSNorm + head on the last `action_dim` tokens ---------------
    fnorm = consts_ref[off["norm"] + 2 * n_layers:
                       off["norm"] + 2 * n_layers + 1, 0:H]
    xa = _mm(sel, x)                                                 # (B*A, H)
    hf = _rmsnorm(xa, fnorm)
    o_ref[...] = (_mm(hf, out_w) + out_b).astype(o_ref.dtype)


# ----------------------------------------------------------------------------
# RoPE tables (numpy, built once)
# ----------------------------------------------------------------------------
def rope_tables(T, n_heads, head_dim):
    half = head_dim // 2
    pos = np.arange(T, dtype=np.float32)
    inv_freq = 1.0 / (10000.0 ** (np.arange(0, head_dim, 2, dtype=np.float32)
                                  / head_dim))
    freqs = pos[:, None] * inv_freq[None, :]                          # (T, half)
    emb = np.concatenate([freqs, freqs], axis=-1)                     # (T, hd)
    cosf = np.tile(np.cos(emb), (1, n_heads)).astype(np.float32)      # (T, H)
    sinf = np.tile(np.sin(emb), (1, n_heads)).astype(np.float32)
    # rotate_half as a matmul: (q @ R)[:, j] = -q[:, j+half] (j<half) else q[:, j-half]
    R = np.zeros((head_dim, head_dim), np.float32)
    R[half:, :half] = -np.eye(half, dtype=np.float32)
    R[:half, half:] = np.eye(half, dtype=np.float32)
    H = n_heads * head_dim
    Rf = np.zeros((H, H), np.float32)
    for h in range(n_heads):
        Rf[h * head_dim:(h + 1) * head_dim,
           h * head_dim:(h + 1) * head_dim] = R
    return cosf, sinf, Rf


# ----------------------------------------------------------------------------
# host-side packing of the four input slabs
# ----------------------------------------------------------------------------
def build_consts_slab(params, cfg, B, T):
    H = cfg["hidden_dim"]
    nh = cfg["n_heads"]
    hd = H // nh
    A = cfg["action_dim"]
    L = cfg["n_layers"]
    bins = cfg["action_bins"]
    sd = cfg["state_dim"]
    BT = B * T
    S = nh * BT
    off, rows = consts_layout(B, T, A, nh, hd, sd, bins, L)

    cosf, sinf, rot = rope_tables(T, nh, hd)
    slab = np.zeros((rows, _LANES), np.float32)
    slab[off["cos"]:off["cos"] + BT, :H] = np.tile(cosf, (B, 1))
    slab[off["sin"]:off["sin"] + BT, :H] = np.tile(sinf, (B, 1))
    slab[off["rot"]:off["rot"] + H, :H] = rot
    # per-head lane masks for the sublane-stacked attention
    for h in range(nh):
        slab[off["hm"] + h * BT:off["hm"] + (h + 1) * BT,
             h * hd:(h + 1) * hd] = 1.0
    # row / col batch & token indices (the mask is rebuilt in-kernel from these)
    i_idx = np.tile(np.arange(BT), nh)
    slab[off["hm"]:off["hm"] + S, H] = (i_idx // T).astype(np.float32)
    slab[off["hm"]:off["hm"] + S, H + 1] = (i_idx % T).astype(np.float32)
    slab[off["selidx"] + B * A, :BT] = (np.arange(BT) // T).astype(np.float32)
    slab[off["selidx"] + B * A + 1, :BT] = (np.arange(BT) % T).astype(np.float32)
    # head replication / reduction matrices
    slab[off["rep"]:off["rep"] + S, :BT] = np.tile(
        np.eye(BT, dtype=np.float32), (nh, 1))
    slab[off["rept"]:off["rept"] + BT, :S] = np.tile(
        np.eye(BT, dtype=np.float32), (1, nh))
    # selector of the last `action_dim` tokens of each batch element
    for b in range(B):
        for a in range(A):
            slab[off["selidx"] + b * A + a, b * T + (T - A + a)] = 1.0

    slab = jnp.asarray(slab)
    # parameter-dependent sections
    slab = slab.at[off["sew"]:off["sew"] + sd, :H].set(params["state_emb_w"])
    slab = slab.at[off["ow"]:off["ow"] + H, :bins].set(params["out_w"])
    slab = slab.at[off["ob"], :bins].set(params["out_b"][0])
    for l, lyr in enumerate(params["layers"]):
        slab = slab.at[off["norm"] + 2 * l, :H].set(lyr["ln1"][0])
        slab = slab.at[off["norm"] + 2 * l + 1, :H].set(lyr["ln2"][0])
    slab = slab.at[off["norm"] + 2 * L, :H].set(params["final_norm"][0])
    return slab


def pack_layer_weights(params):
    """Per-layer weight slabs, pre-cast to bf16 for the MXU.
    w32: (L, H, 6 slabs) lane layout = wq|wk|wv|wo|wg|wu ;  wd: (L, I, H)."""
    w32 = jnp.stack([
        jnp.concatenate([lyr["wq"], lyr["wk"], lyr["wv"], lyr["wo"],
                         lyr["wg"], lyr["wu"]], axis=1)
        for lyr in params["layers"]], axis=0).astype(jnp.bfloat16)
    wd = jnp.stack([lyr["wd"] for lyr in params["layers"]],
                   axis=0).astype(jnp.bfloat16)
    return w32, wd


# ----------------------------------------------------------------------------
# parameters (deterministic synthetic init matching the PyTorch _init_weights:
# normal(0, 0.02) for Linear / Embedding weights, zero biases, ones for norms)
# ----------------------------------------------------------------------------
def init_params(key, cfg):
    H = cfg["hidden_dim"]
    I = cfg["intermediate_dim"]
    keys = iter(jax.random.split(key, 64))

    def n(shape):
        return jax.random.normal(next(keys), shape, jnp.float32) * 0.02

    params = dict(
        state_emb_w=n((cfg["state_dim"], H)),
        state_emb_b=jnp.zeros((1, H), jnp.float32),
        out_w=n((H, cfg["action_bins"])),
        out_b=jnp.zeros((1, cfg["action_bins"]), jnp.float32),
        action_emb=n((cfg["action_bins"], H)),
        return_emb=n((1, H)),    # unused in forward (matches PyTorch module)
        reward_emb=n((1, H)),    # unused in forward
        time_emb=n((cfg["max_ep_len"], H)),
        final_norm=jnp.ones((1, H), jnp.float32),
        layers=[],
    )
    for _ in range(cfg["n_layers"]):
        params["layers"].append(dict(
            ln1=jnp.ones((1, H), jnp.float32),
            wq=n((H, H)), wk=n((H, H)), wv=n((H, H)), wo=n((H, H)),
            ln2=jnp.ones((1, H), jnp.float32),
            wg=n((H, I)), wu=n((H, I)), wd=n((I, H)),
        ))
    return params


# ----------------------------------------------------------------------------
# forward pass: embedding gathers as glue, everything else in ONE pallas_call
# ----------------------------------------------------------------------------
def decision_transformer_forward(params, states, actions, rewards, returns,
                                 timesteps, cfg):
    del rewards, returns  # unused by the PyTorch forward as well
    B, Sq, state_dim = states.shape
    H = cfg["hidden_dim"]
    A = cfg["action_dim"]
    nh = cfg["n_heads"]
    hd = H // nh
    L = cfg["n_layers"]
    bins = cfg["action_bins"]
    I = cfg["intermediate_dim"]
    T = Sq + (A - 1 if A > 1 else 0)
    BT = B * T

    # embedding lookups (data-dependent gathers) stay outside the kernel
    time = jnp.take(params["time_emb"], timesteps, axis=0)           # (B, Sq, H)
    base_state = time + params["state_emb_b"]                        # bias folded in
    if A > 1:
        a_tok = jnp.take(params["action_emb"], actions[:, :-1], axis=0)
        base = jnp.concatenate([base_state, a_tok], axis=1)          # (B, T, H)
        states_pad = jnp.concatenate(
            [states, jnp.zeros((B, A - 1, state_dim), states.dtype)], axis=1)
    else:
        base = base_state
        states_pad = states
    tok = jnp.concatenate(
        [base.reshape(BT, H), states_pad.reshape(BT, state_dim)],
        axis=1).astype(jnp.float32)                                  # (BT, H+sd)

    consts = build_consts_slab(params, cfg, B, T)
    w32, wd = pack_layer_weights(params)

    vmem = pl.BlockSpec(memory_space=pltpu.MemorySpace.VMEM)
    q_flat = pl.pallas_call(
        functools.partial(fused_dt_kernel, n_layers=L, n_heads=nh, head_dim=hd,
                          B=B, T=T, A=A, state_dim=state_dim, bins=bins,
                          inter_dim=I),
        out_shape=jax.ShapeDtypeStruct((B * A, bins), jnp.float32),
        in_specs=[vmem] * 4,
        out_specs=vmem,
        # explicit scoped-VMEM budget (defaults are 16/32 MiB on v5e/v6e);
        # current usage is < 1 MiB, this only future-proofs a scale-up.
        compiler_params=pltpu.CompilerParams(vmem_limit_bytes=32 * 1024 * 1024),
    )(tok, consts, w32, wd)

    return q_flat.reshape(B, A, bins)


# ----------------------------------------------------------------------------
# pure-JAX f32 reference (same math, no Pallas) for a correctness check
# ----------------------------------------------------------------------------
def reference_forward(params, states, actions, timesteps, cfg):
    B, Sq, _ = states.shape
    H = cfg["hidden_dim"]
    A = cfg["action_dim"]
    nh = cfg["n_heads"]
    hd = H // nh

    time = params["time_emb"][timesteps]
    state_tok = states @ params["state_emb_w"] + params["state_emb_b"] + time
    if A > 1:
        a_tok = params["action_emb"][actions[:, :-1]]
        token = jnp.concatenate([state_tok, a_tok], axis=1)
    else:
        token = state_tok
    T = token.shape[1]
    tri = jnp.tril(jnp.ones((T, T), jnp.float32))
    mask = (1.0 - tri) * _NEG_INF
    cosf, sinf, rot = (jnp.asarray(a) for a in rope_tables(T, nh, hd))

    x = token
    for lyr in params["layers"]:
        h = _rmsnorm(x, lyr["ln1"])
        q = h @ lyr["wq"]
        k = h @ lyr["wk"]
        v = h @ lyr["wv"]
        q = q * cosf + (q @ rot) * sinf
        k = k * cosf + (k @ rot) * sinf
        qh = q.reshape(B, T, nh, hd).transpose(0, 2, 1, 3)
        kh = k.reshape(B, T, nh, hd).transpose(0, 2, 1, 3)
        vh = v.reshape(B, T, nh, hd).transpose(0, 2, 1, 3)
        s = jnp.einsum("bhqd,bhkd->bhqk", qh, kh) / jnp.sqrt(float(hd)) + mask
        p = jax.nn.softmax(s, axis=-1)
        ctx = jnp.einsum("bhqk,bhkd->bhqd", p, vh).transpose(0, 2, 1, 3)
        ctx = ctx.reshape(B, T, H)
        x = x + ctx @ lyr["wo"]
        h2 = _rmsnorm(x, lyr["ln2"])
        g = jax.nn.silu(h2 @ lyr["wg"])
        x = x + (g * (h2 @ lyr["wu"])) @ lyr["wd"]
    x = _rmsnorm(x, params["final_norm"])
    return x[:, -A:] @ params["out_w"] + params["out_b"]


# ----------------------------------------------------------------------------
if __name__ == "__main__":
    cfg = dict(state_dim=6, action_dim=3, hidden_dim=32, action_bins=16,
               seq_len=8, n_layers=3, n_heads=4, max_ep_len=1000,
               intermediate_dim=128)

    key = jax.random.PRNGKey(0)
    pkey, skey, akey, tkey = jax.random.split(key, 4)
    params = init_params(pkey, cfg)

    B = 2
    states = jax.random.normal(skey, (B, cfg["seq_len"], cfg["state_dim"]),
                               jnp.float32)
    actions = jax.random.randint(akey, (B, cfg["action_dim"]),
                                 0, cfg["action_bins"], dtype=jnp.int32)
    timesteps = jax.random.randint(tkey, (B, cfg["seq_len"]),
                                   0, cfg["max_ep_len"], dtype=jnp.int32)
    rewards = jnp.zeros((B, cfg["seq_len"]), jnp.float32)   # unused
    returns = jnp.zeros((B, cfg["seq_len"]), jnp.float32)   # unused

    fwd = jax.jit(functools.partial(decision_transformer_forward, cfg=cfg))
    q = fwd(params, states, actions, rewards, returns, timesteps)
    q = jax.block_until_ready(q)

    q_ref = reference_forward(params, states, actions, timesteps, cfg)
    assert q.shape == (B, cfg["action_dim"], cfg["action_bins"]), q.shape
    assert bool(jnp.all(jnp.isfinite(q)))
    assert bool(jnp.allclose(q, q_ref, rtol=2e-2, atol=2e-2)), \
        float(jnp.max(jnp.abs(q - q_ref)))
    print("KERNEL_OK")
</pallas_src>

<mosaic_0001>
module attributes {stable_mosaic.version = 11 : i64} {
  func.func @fused_dt_kernel(%arg0: memref<20x38xf32, #tpu.memory_space<vmem>>, %arg1: memref<328x128xf32, #tpu.memory_space<vmem>>, %arg2: memref<3x32x384xbf16, #tpu.memory_space<vmem>>, %arg3: memref<3x128x32xbf16, #tpu.memory_space<vmem>>, %arg4: memref<6x16xf32, #tpu.memory_space<vmem>>) attributes {dimension_semantics = [], scalar_prefetch = 0 : i64, scratch_operands = 0 : i64, tpu.core_type = #tpu.core_type<tc>} {
    %c0 = arith.constant 0 : index
    %c0_0 = arith.constant 0 : index
    %0 = vector.load %arg1[%c0, %c0_0] : memref<328x128xf32, #tpu.memory_space<vmem>>, vector<20x32xf32>
    %c24 = arith.constant 24 : index
    %c0_1 = arith.constant 0 : index
    %1 = vector.load %arg1[%c24, %c0_1] : memref<328x128xf32, #tpu.memory_space<vmem>>, vector<20x32xf32>
    %c48 = arith.constant 48 : index
    %c0_2 = arith.constant 0 : index
    %2 = vector.load %arg1[%c48, %c0_2] : memref<328x128xf32, #tpu.memory_space<vmem>>, vector<32x32xf32>
    %c80 = arith.constant 80 : index
    %c0_3 = arith.constant 0 : index
    %3 = vector.load %arg1[%c80, %c0_3] : memref<328x128xf32, #tpu.memory_space<vmem>>, vector<80x32xf32>
    %c80_4 = arith.constant 80 : index
    %c32 = arith.constant 32 : index
    %4 = vector.load %arg1[%c80_4, %c32] : memref<328x128xf32, #tpu.memory_space<vmem>>, vector<80x1xf32>
    %c80_5 = arith.constant 80 : index
    %c33 = arith.constant 33 : index
    %5 = vector.load %arg1[%c80_5, %c33] : memref<328x128xf32, #tpu.memory_space<vmem>>, vector<80x1xf32>
    %c160 = arith.constant 160 : index
    %c0_6 = arith.constant 0 : index
    %6 = vector.load %arg1[%c160, %c0_6] : memref<328x128xf32, #tpu.memory_space<vmem>>, vector<80x20xf32>
    %c240 = arith.constant 240 : index
    %c0_7 = arith.constant 0 : index
    %7 = vector.load %arg1[%c240, %c0_7] : memref<328x128xf32, #tpu.memory_space<vmem>>, vector<20x80xf32>
    %c264 = arith.constant 264 : index
    %c0_8 = arith.constant 0 : index
    %8 = vector.load %arg1[%c264, %c0_8] : memref<328x128xf32, #tpu.memory_space<vmem>>, vector<6x20xf32>
    %c270 = arith.constant 270 : index
    %c0_9 = arith.constant 0 : index
    %9 = vector.load %arg1[%c270, %c0_9] : memref<328x128xf32, #tpu.memory_space<vmem>>, vector<1x20xf32>
    %c271 = arith.constant 271 : index
    %c0_10 = arith.constant 0 : index
    %10 = vector.load %arg1[%c271, %c0_10] : memref<328x128xf32, #tpu.memory_space<vmem>>, vector<1x20xf32>
    %c272 = arith.constant 272 : index
    %c0_11 = arith.constant 0 : index
    %11 = vector.load %arg1[%c272, %c0_11] : memref<328x128xf32, #tpu.memory_space<vmem>>, vector<6x32xf32>
    %c280 = arith.constant 280 : index
    %c0_12 = arith.constant 0 : index
    %12 = vector.load %arg1[%c280, %c0_12] : memref<328x128xf32, #tpu.memory_space<vmem>>, vector<32x16xf32>
    %c312 = arith.constant 312 : index
    %c0_13 = arith.constant 0 : index
    %13 = vector.load %arg1[%c312, %c0_13] : memref<328x128xf32, #tpu.memory_space<vmem>>, vector<1x16xf32>
    %14 = vector.broadcast %4 : vector<80x1xf32> to vector<80x20xf32>
    %15 = vector.broadcast %9 : vector<1x20xf32> to vector<80x20xf32>
    %16 = arith.cmpf oeq, %14, %15 : vector<80x20xf32>
    %17 = vector.broadcast %10 : vector<1x20xf32> to vector<80x20xf32>
    %18 = vector.broadcast %5 : vector<80x1xf32> to vector<80x20xf32>
    %19 = arith.cmpf ole, %17, %18 : vector<80x20xf32>
    %20 = arith.andi %16, %19 : vector<80x20xi1>
    %cst = arith.constant 0.000000e+00 : f32
    %cst_14 = arith.constant -1.000000e+30 : f32
    %21 = vector.broadcast %cst : f32 to vector<80x20xf32>
    %22 = vector.broadcast %cst_14 : f32 to vector<80x20xf32>
    %23 = arith.select %20, %21, %22 : vector<80x20xi1>, vector<80x20xf32>
    %c0_15 = arith.constant 0 : index
    %c0_16 = arith.constant 0 : index
    %24 = vector.load %arg0[%c0_15, %c0_16] : memref<20x38xf32, #tpu.memory_space<vmem>>, vector<20x32xf32>
    %c0_17 = arith.constant 0 : index
    %c32_18 = arith.constant 32 : index
    %25 = vector.load %arg0[%c0_17, %c32_18] : memref<20x38xf32, #tpu.memory_space<vmem>>, vector<20x6xf32>
    %26 = arith.truncf %25 : vector<20x6xf32> to vector<20x6xbf16>
    %27 = arith.truncf %11 : vector<6x32xf32> to vector<6x32xbf16>
    %cst_19 = arith.constant dense<0.000000e+00> : vector<20x32xf32>
    %28 = tpu.matmul %26, %27, %cst_19 {dimension_numbers = #tpu.dot_dimension_numbers<[1], [0], [0], [1], [0, 0, 1, 1], [], []>} : vector<20x6xbf16>, vector<6x32xbf16>, vector<20x32xf32> -> vector<20x32xf32>
    %29 = arith.addf %24, %28 : vector<20x32xf32>
    %c320 = arith.constant 320 : index
    %c0_20 = arith.constant 0 : index
    %30 = vector.load %arg1[%c320, %c0_20] : memref<328x128xf32, #tpu.memory_space<vmem>>, vector<1x32xf32>
    %c321 = arith.constant 321 : index
    %c0_21 = arith.constant 0 : index
    %31 = vector.load %arg1[%c321, %c0_21] : memref<328x128xf32, #tpu.memory_space<vmem>>, vector<1x32xf32>
    %32 = arith.mulf %29, %29 : vector<20x32xf32>
    %cst_22 = arith.constant dense<0.000000e+00> : vector<20xf32>
    %33 = vector.multi_reduction <add>, %32, %cst_22 [1] : vector<20x32xf32> to vector<20xf32>
    %34 = vector.shape_cast %33 : vector<20xf32> to vector<20x1xf32>
    %cst_23 = arith.constant 3.200000e+01 : f32
    %35 = vector.broadcast %cst_23 : f32 to vector<20x1xf32>
    %36 = arith.divf %34, %35 : vector<20x1xf32>
    %cst_24 = arith.constant 9.99999997E-7 : f32
    %37 = vector.broadcast %cst_24 : f32 to vector<20x1xf32>
    %38 = arith.addf %36, %37 : vector<20x1xf32>
    %39 = math.rsqrt %38 : vector<20x1xf32>
    %40 = vector.broadcast %39 : vector<20x1xf32> to vector<20x32xf32>
    %41 = arith.mulf %29, %40 : vector<20x32xf32>
    %42 = vector.broadcast %30 : vector<1x32xf32> to vector<20x32xf32>
    %43 = arith.mulf %41, %42 : vector<20x32xf32>
    %c0_25 = arith.constant 0 : index
    %c0_26 = arith.constant 0 : index
    %c0_27 = arith.constant 0 : index
    %44 = vector.load %arg2[%c0_25, %c0_26, %c0_27] : memref<3x32x384xbf16, #tpu.memory_space<vmem>>, vector<1x32x96xbf16>
    %45 = vector.shape_cast %44 : vector<1x32x96xbf16> to vector<32x96xbf16>
    %46 = arith.truncf %43 : vector<20x32xf32> to vector<20x32xbf16>
    %cst_28 = arith.constant dense<0.000000e+00> : vector<20x96xf32>
    %47 = tpu.matmul %46, %45, %cst_28 {dimension_numbers = #tpu.dot_dimension_numbers<[1], [0], [0], [1], [0, 0, 1, 1], [], []>} : vector<20x32xbf16>, vector<32x96xbf16>, vector<20x96xf32> -> vector<20x96xf32>
    %48 = vector.extract_strided_slice %47 {offsets = [0, 0], sizes = [20, 32], strides = [1, 1]} : vector<20x96xf32> to vector<20x32xf32>
    %49 = vector.extract_strided_slice %47 {offsets = [0, 32], sizes = [20, 32], strides = [1, 1]} : vector<20x96xf32> to vector<20x32xf32>
    %50 = vector.extract_strided_slice %47 {offsets = [0, 64], sizes = [20, 32], strides = [1, 1]} : vector<20x96xf32> to vector<20x32xf32>
    %51 = arith.mulf %48, %0 : vector<20x32xf32>
    %52 = arith.truncf %48 : vector<20x32xf32> to vector<20x32xbf16>
    %53 = arith.truncf %2 : vector<32x32xf32> to vector<32x32xbf16>
    %cst_29 = arith.constant dense<0.000000e+00> : vector<20x32xf32>
    %54 = tpu.matmul %52, %53, %cst_29 {dimension_numbers = #tpu.dot_dimension_numbers<[1], [0], [0], [1], [0, 0, 1, 1], [], []>} : vector<20x32xbf16>, vector<32x32xbf16>, vector<20x32xf32> -> vector<20x32xf32>
    %55 = arith.mulf %54, %1 : vector<20x32xf32>
    %56 = arith.addf %51, %55 : vector<20x32xf32>
    %57 = arith.mulf %49, %0 : vector<20x32xf32>
    %58 = arith.truncf %49 : vector<20x32xf32> to vector<20x32xbf16>
    %59 = arith.truncf %2 : vector<32x32xf32> to vector<32x32xbf16>
    %cst_30 = arith.constant dense<0.000000e+00> : vector<20x32xf32>
    %60 = tpu.matmul %58, %59, %cst_30 {dimension_numbers = #tpu.dot_dimension_numbers<[1], [0], [0], [1], [0, 0, 1, 1], [], []>} : vector<20x32xbf16>, vector<32x32xbf16>, vector<20x32xf32> -> vector<20x32xf32>
    %61 = arith.mulf %60, %1 : vector<20x32xf32>
    %62 = arith.addf %57, %61 : vector<20x32xf32>
    %63 = arith.truncf %6 : vector<80x20xf32> to vector<80x20xbf16>
    %64 = arith.truncf %56 : vector<20x32xf32> to vector<20x32xbf16>
    %cst_31 = arith.constant dense<0.000000e+00> : vector<80x32xf32>
    %65 = tpu.matmul %63, %64, %cst_31 {dimension_numbers = #tpu.dot_dimension_numbers<[1], [0], [0], [1], [0, 0, 1, 1], [], []>} : vector<80x20xbf16>, vector<20x32xbf16>, vector<80x32xf32> -> vector<80x32xf32>
    %66 = arith.mulf %65, %3 : vector<80x32xf32>
    %67 = arith.truncf %66 : vector<80x32xf32> to vector<80x32xbf16>
    %68 = arith.truncf %62 : vector<20x32xf32> to vector<20x32xbf16>
    %cst_32 = arith.constant dense<0.000000e+00> : vector<80x20xf32>
    %69 = tpu.matmul %67, %68, %cst_32 {dimension_numbers = #tpu.dot_dimension_numbers<[1], [1], [0], [0], [0, 0, 1, 0], [], []>} : vector<80x32xbf16>, vector<20x32xbf16>, vector<80x20xf32> -> vector<80x20xf32>
    %cst_33 = arith.constant 0.353553385 : f32
    %70 = vector.broadcast %cst_33 : f32 to vector<80x20xf32>
    %71 = arith.mulf %69, %70 : vector<80x20xf32>
    %72 = arith.addf %71, %23 : vector<80x20xf32>
    %cst_34 = arith.constant dense<0xFF800000> : vector<80xf32>
    %73 = vector.multi_reduction <maximumf>, %72, %cst_34 [1] : vector<80x20xf32> to vector<80xf32>
    %74 = vector.shape_cast %73 : vector<80xf32> to vector<80x1xf32>
    %75 = vector.broadcast %74 : vector<80x1xf32> to vector<80x20xf32>
    %76 = arith.subf %72, %75 : vector<80x20xf32>
    %77 = math.exp %76 : vector<80x20xf32>
    %cst_35 = arith.constant dense<0.000000e+00> : vector<80xf32>
    %78 = vector.multi_reduction <add>, %77, %cst_35 [1] : vector<80x20xf32> to vector<80xf32>
    %79 = vector.shape_cast %78 : vector<80xf32> to vector<80x1xf32>
    %80 = vector.broadcast %79 : vector<80x1xf32> to vector<80x20xf32>
    %81 = arith.divf %77, %80 : vector<80x20xf32>
    %82 = arith.truncf %81 : vector<80x20xf32> to vector<80x20xbf16>
    %83 = arith.truncf %50 : vector<20x32xf32> to vector<20x32xbf16>
    %cst_36 = arith.constant dense<0.000000e+00> : vector<80x32xf32>
    %84 = tpu.matmul %82, %83, %cst_36 {dimension_numbers = #tpu.dot_dimension_numbers<[1], [0], [0], [1], [0, 0, 1, 1], [], []>} : vector<80x20xbf16>, vector<20x32xbf16>, vector<80x32xf32> -> vector<80x32xf32>
    %85 = arith.mulf %84, %3 : vector<80x32xf32>
    %86 = arith.truncf %7 : vector<20x80xf32> to vector<20x80xbf16>
    %87 = arith.truncf %85 : vector<80x32xf32> to vector<80x32xbf16>
    %cst_37 = arith.constant dense<0.000000e+00> : vector<20x32xf32>
    %88 = tpu.matmul %86, %87, %cst_37 {dimension_numbers = #tpu.dot_dimension_numbers<[1], [0], [0], [1], [0, 0, 1, 1], [], []>} : vector<20x80xbf16>, vector<80x32xbf16>, vector<20x32xf32> -> vector<20x32xf32>
    %c0_38 = arith.constant 0 : index
    %c0_39 = arith.constant 0 : index
    %c96 = arith.constant 96 : index
    %89 = vector.load %arg2[%c0_38, %c0_39, %c96] : memref<3x32x384xbf16, #tpu.memory_space<vmem>>, vector<1x32x32xbf16>
    %90 = vector.shape_cast %89 : vector<1x32x32xbf16> to vector<32x32xbf16>
    %91 = arith.truncf %88 : vector<20x32xf32> to vector<20x32xbf16>
    %cst_40 = arith.constant dense<0.000000e+00> : vector<20x32xf32>
    %92 = tpu.matmul %91, %90, %cst_40 {dimension_numbers = #tpu.dot_dimension_numbers<[1], [0], [0], [1], [0, 0, 1, 1], [], []>} : vector<20x32xbf16>, vector<32x32xbf16>, vector<20x32xf32> -> vector<20x32xf32>
    %93 = arith.addf %29, %92 : vector<20x32xf32>
    %94 = arith.mulf %93, %93 : vector<20x32xf32>
    %cst_41 = arith.constant dense<0.000000e+00> : vector<20xf32>
    %95 = vector.multi_reduction <add>, %94, %cst_41 [1] : vector<20x32xf32> to vector<20xf32>
    %96 = vector.shape_cast %95 : vector<20xf32> to vector<20x1xf32>
    %cst_42 = arith.constant 3.200000e+01 : f32
    %97 = vector.broadcast %cst_42 : f32 to vector<20x1xf32>
    %98 = arith.divf %96, %97 : vector<20x1xf32>
    %cst_43 = arith.constant 9.99999997E-7 : f32
    %99 = vector.broadcast %cst_43 : f32 to vector<20x1xf32>
    %100 = arith.addf %98, %99 : vector<20x1xf32>
    %101 = math.rsqrt %100 : vector<20x1xf32>
    %102 = vector.broadcast %101 : vector<20x1xf32> to vector<20x32xf32>
    %103 = arith.mulf %93, %102 : vector<20x32xf32>
    %104 = vector.broadcast %31 : vector<1x32xf32> to vector<20x32xf32>
    %105 = arith.mulf %103, %104 : vector<20x32xf32>
    %c0_44 = arith.constant 0 : index
    %c0_45 = arith.constant 0 : index
    %c128 = arith.constant 128 : index
    %106 = vector.load %arg2[%c0_44, %c0_45, %c128] : memref<3x32x384xbf16, #tpu.memory_space<vmem>>, vector<1x32x256xbf16>
    %107 = vector.shape_cast %106 : vector<1x32x256xbf16> to vector<32x256xbf16>
    %108 = arith.truncf %105 : vector<20x32xf32> to vector<20x32xbf16>
    %cst_46 = arith.constant dense<0.000000e+00> : vector<20x256xf32>
    %109 = tpu.matmul %108, %107, %cst_46 {dimension_numbers = #tpu.dot_dimension_numbers<[1], [0], [0], [1], [0, 0, 1, 1], [], []>} : vector<20x32xbf16>, vector<32x256xbf16>, vector<20x256xf32> -> vector<20x256xf32>
    %110 = vector.extract_strided_slice %109 {offsets = [0, 0], sizes = [20, 128], strides = [1, 1]} : vector<20x256xf32> to vector<20x128xf32>
    %111 = arith.negf %110 : vector<20x128xf32>
    %112 = math.exp %111 : vector<20x128xf32>
    %cst_47 = arith.constant 1.000000e+00 : f32
    %113 = vector.broadcast %cst_47 : f32 to vector<20x128xf32>
    %114 = arith.addf %113, %112 : vector<20x128xf32>
    %115 = arith.divf %113, %114 : vector<20x128xf32>
    %116 = arith.mulf %110, %115 : vector<20x128xf32>
    %117 = vector.extract_strided_slice %109 {offsets = [0, 128], sizes = [20, 128], strides = [1, 1]} : vector<20x256xf32> to vector<20x128xf32>
    %118 = arith.mulf %116, %117 : vector<20x128xf32>
    %c0_48 = arith.constant 0 : index
    %c0_49 = arith.constant 0 : index
    %c0_50 = arith.constant 0 : index
    %119 = vector.load %arg3[%c0_48, %c0_49, %c0_50] : memref<3x128x32xbf16, #tpu.memory_space<vmem>>, vector<1x128x32xbf16>
    %120 = vector.shape_cast %119 : vector<1x128x32xbf16> to vector<128x32xbf16>
    %121 = arith.truncf %118 : vector<20x128xf32> to vector<20x128xbf16>
    %cst_51 = arith.constant dense<0.000000e+00> : vector<20x32xf32>
    %122 = tpu.matmul %121, %120, %cst_51 {dimension_numbers = #tpu.dot_dimension_numbers<[1], [0], [0], [1], [0, 0, 1, 1], [], []>} : vector<20x128xbf16>, vector<128x32xbf16>, vector<20x32xf32> -> vector<20x32xf32>
    %123 = arith.addf %93, %122 : vector<20x32xf32>
    %c322 = arith.constant 322 : index
    %c0_52 = arith.constant 0 : index
    %124 = vector.load %arg1[%c322, %c0_52] : memref<328x128xf32, #tpu.memory_space<vmem>>, vector<1x32xf32>
    %c323 = arith.constant 323 : index
    %c0_53 = arith.constant 0 : index
    %125 = vector.load %arg1[%c323, %c0_53] : memref<328x128xf32, #tpu.memory_space<vmem>>, vector<1x32xf32>
    %126 = arith.mulf %123, %123 : vector<20x32xf32>
    %cst_54 = arith.constant dense<0.000000e+00> : vector<20xf32>
    %127 = vector.multi_reduction <add>, %126, %cst_54 [1] : vector<20x32xf32> to vector<20xf32>
    %128 = vector.shape_cast %127 : vector<20xf32> to vector<20x1xf32>
    %cst_55 = arith.constant 3.200000e+01 : f32
    %129 = vector.broadcast %cst_55 : f32 to vector<20x1xf32>
    %130 = arith.divf %128, %129 : vector<20x1xf32>
    %cst_56 = arith.constant 9.99999997E-7 : f32
    %131 = vector.broadcast %cst_56 : f32 to vector<20x1xf32>
    %132 = arith.addf %130, %131 : vector<20x1xf32>
    %133 = math.rsqrt %132 : vector<20x1xf32>
    %134 = vector.broadcast %133 : vector<20x1xf32> to vector<20x32xf32>
    %135 = arith.mulf %123, %134 : vector<20x32xf32>
    %136 = vector.broadcast %124 : vector<1x32xf32> to vector<20x32xf32>
    %137 = arith.mulf %135, %136 : vector<20x32xf32>
    %c1 = arith.constant 1 : index
    %c0_57 = arith.constant 0 : index
    %c0_58 = arith.constant 0 : index
    %138 = vector.load %arg2[%c1, %c0_57, %c0_58] : memref<3x32x384xbf16, #tpu.memory_space<vmem>>, vector<1x32x96xbf16>
    %139 = vector.shape_cast %138 : vector<1x32x96xbf16> to vector<32x96xbf16>
    %140 = arith.truncf %137 : vector<20x32xf32> to vector<20x32xbf16>
    %cst_59 = arith.constant dense<0.000000e+00> : vector<20x96xf32>
    %141 = tpu.matmul %140, %139, %cst_59 {dimension_numbers = #tpu.dot_dimension_numbers<[1], [0], [0], [1], [0, 0, 1, 1], [], []>} : vector<20x32xbf16>, vector<32x96xbf16>, vector<20x96xf32> -> vector<20x96xf32>
    %142 = vector.extract_strided_slice %141 {offsets = [0, 0], sizes = [20, 32], strides = [1, 1]} : vector<20x96xf32> to vector<20x32xf32>
    %143 = vector.extract_strided_slice %141 {offsets = [0, 32], sizes = [20, 32], strides = [1, 1]} : vector<20x96xf32> to vector<20x32xf32>
    %144 = vector.extract_strided_slice %141 {offsets = [0, 64], sizes = [20, 32], strides = [1, 1]} : vector<20x96xf32> to vector<20x32xf32>
    %145 = arith.mulf %142, %0 : vector<20x32xf32>
    %146 = arith.truncf %142 : vector<20x32xf32> to vector<20x32xbf16>
    %147 = arith.truncf %2 : vector<32x32xf32> to vector<32x32xbf16>
    %cst_60 = arith.constant dense<0.000000e+00> : vector<20x32xf32>
    %148 = tpu.matmul %146, %147, %cst_60 {dimension_numbers = #tpu.dot_dimension_numbers<[1], [0], [0], [1], [0, 0, 1, 1], [], []>} : vector<20x32xbf16>, vector<32x32xbf16>, vector<20x32xf32> -> vector<20x32xf32>
    %149 = arith.mulf %148, %1 : vector<20x32xf32>
    %150 = arith.addf %145, %149 : vector<20x32xf32>
    %151 = arith.mulf %143, %0 : vector<20x32xf32>
    %152 = arith.truncf %143 : vector<20x32xf32> to vector<20x32xbf16>
    %153 = arith.truncf %2 : vector<32x32xf32> to vector<32x32xbf16>
    %cst_61 = arith.constant dense<0.000000e+00> : vector<20x32xf32>
    %154 = tpu.matmul %152, %153, %cst_61 {dimension_numbers = #tpu.dot_dimension_numbers<[1], [0], [0], [1], [0, 0, 1, 1], [], []>} : vector<20x32xbf16>, vector<32x32xbf16>, vector<20x32xf32> -> vector<20x32xf32>
    %155 = arith.mulf %154, %1 : vector<20x32xf32>
    %156 = arith.addf %151, %155 : vector<20x32xf32>
    %157 = arith.truncf %6 : vector<80x20xf32> to vector<80x20xbf16>
    %158 = arith.truncf %150 : vector<20x32xf32> to vector<20x32xbf16>
    %cst_62 = arith.constant dense<0.000000e+00> : vector<80x32xf32>
    %159 = tpu.matmul %157, %158, %cst_62 {dimension_numbers = #tpu.dot_dimension_numbers<[1], [0], [0], [1], [0, 0, 1, 1], [], []>} : vector<80x20xbf16>, vector<20x32xbf16>, vector<80x32xf32> -> vector<80x32xf32>
    %160 = arith.mulf %159, %3 : vector<80x32xf32>
    %161 = arith.truncf %160 : vector<80x32xf32> to vector<80x32xbf16>
    %162 = arith.truncf %156 : vector<20x32xf32> to vector<20x32xbf16>
    %cst_63 = arith.constant dense<0.000000e+00> : vector<80x20xf32>
    %163 = tpu.matmul %161, %162, %cst_63 {dimension_numbers = #tpu.dot_dimension_numbers<[1], [1], [0], [0], [0, 0, 1, 0], [], []>} : vector<80x32xbf16>, vector<20x32xbf16>, vector<80x20xf32> -> vector<80x20xf32>
    %cst_64 = arith.constant 0.353553385 : f32
    %164 = vector.broadcast %cst_64 : f32 to vector<80x20xf32>
    %165 = arith.mulf %163, %164 : vector<80x20xf32>
    %166 = arith.addf %165, %23 : vector<80x20xf32>
    %cst_65 = arith.constant dense<0xFF800000> : vector<80xf32>
    %167 = vector.multi_reduction <maximumf>, %166, %cst_65 [1] : vector<80x20xf32> to vector<80xf32>
    %168 = vector.shape_cast %167 : vector<80xf32> to vector<80x1xf32>
    %169 = vector.broadcast %168 : vector<80x1xf32> to vector<80x20xf32>
    %170 = arith.subf %166, %169 : vector<80x20xf32>
    %171 = math.exp %170 : vector<80x20xf32>
    %cst_66 = arith.constant dense<0.000000e+00> : vector<80xf32>
    %172 = vector.multi_reduction <add>, %171, %cst_66 [1] : vector<80x20xf32> to vector<80xf32>
    %173 = vector.shape_cast %172 : vector<80xf32> to vector<80x1xf32>
    %174 = vector.broadcast %173 : vector<80x1xf32> to vector<80x20xf32>
    %175 = arith.divf %171, %174 : vector<80x20xf32>
    %176 = arith.truncf %175 : vector<80x20xf32> to vector<80x20xbf16>
    %177 = arith.truncf %144 : vector<20x32xf32> to vector<20x32xbf16>
    %cst_67 = arith.constant dense<0.000000e+00> : vector<80x32xf32>
    %178 = tpu.matmul %176, %177, %cst_67 {dimension_numbers = #tpu.dot_dimension_numbers<[1], [0], [0], [1], [0, 0, 1, 1], [], []>} : vector<80x20xbf16>, vector<20x32xbf16>, vector<80x32xf32> -> vector<80x32xf32>
    %179 = arith.mulf %178, %3 : vector<80x32xf32>
    %180 = arith.truncf %7 : vector<20x80xf32> to vector<20x80xbf16>
    %181 = arith.truncf %179 : vector<80x32xf32> to vector<80x32xbf16>
    %cst_68 = arith.constant dense<0.000000e+00> : vector<20x32xf32>
    %182 = tpu.matmul %180, %181, %cst_68 {dimension_numbers = #tpu.dot_dimension_numbers<[1], [0], [0], [1], [0, 0, 1, 1], [], []>} : vector<20x80xbf16>, vector<80x32xbf16>, vector<20x32xf32> -> vector<20x32xf32>
    %c1_69 = arith.constant 1 : index
    %c0_70 = arith.constant 0 : index
    %c96_71 = arith.constant 96 : index
    %183 = vector.load %arg2[%c1_69, %c0_70, %c96_71] : memref<3x32x384xbf16, #tpu.memory_space<vmem>>, vector<1x32x32xbf16>
    %184 = vector.shape_cast %183 : vector<1x32x32xbf16> to vector<32x32xbf16>
    %185 = arith.truncf %182 : vector<20x32xf32> to vector<20x32xbf16>
    %cst_72 = arith.constant dense<0.000000e+00> : vector<20x32xf32>
    %186 = tpu.matmul %185, %184, %cst_72 {dimension_numbers = #tpu.dot_dimension_numbers<[1], [0], [0], [1], [0, 0, 1, 1], [], []>} : vector<20x32xbf16>, vector<32x32xbf16>, vector<20x32xf32> -> vector<20x32xf32>
    %187 = arith.addf %123, %186 : vector<20x32xf32>
    %188 = arith.mulf %187, %187 : vector<20x32xf32>
    %cst_73 = arith.constant dense<0.000000e+00> : vector<20xf32>
    %189 = vector.multi_reduction <add>, %188, %cst_73 [1] : vector<20x32xf32> to vector<20xf32>
    %190 = vector.shape_cast %189 : vector<20xf32> to vector<20x1xf32>
    %cst_74 = arith.constant 3.200000e+01 : f32
    %191 = vector.broadcast %cst_74 : f32 to vector<20x1xf32>
    %192 = arith.divf %190, %191 : vector<20x1xf32>
    %cst_75 = arith.constant 9.99999997E-7 : f32
    %193 = vector.broadcast %cst_75 : f32 to vector<20x1xf32>
    %194 = arith.addf %192, %193 : vector<20x1xf32>
    %195 = math.rsqrt %194 : vector<20x1xf32>
    %196 = vector.broadcast %195 : vector<20x1xf32> to vector<20x32xf32>
    %197 = arith.mulf %187, %196 : vector<20x32xf32>
    %198 = vector.broadcast %125 : vector<1x32xf32> to vector<20x32xf32>
    %199 = arith.mulf %197, %198 : vector<20x32xf32>
    %c1_76 = arith.constant 1 : index
    %c0_77 = arith.constant 0 : index
    %c128_78 = arith.constant 128 : index
    %200 = vector.load %arg2[%c1_76, %c0_77, %c128_78] : memref<3x32x384xbf16, #tpu.memory_space<vmem>>, vector<1x32x256xbf16>
    %201 = vector.shape_cast %200 : vector<1x32x256xbf16> to vector<32x256xbf16>
    %202 = arith.truncf %199 : vector<20x32xf32> to vector<20x32xbf16>
    %cst_79 = arith.constant dense<0.000000e+00> : vector<20x256xf32>
    %203 = tpu.matmul %202, %201, %cst_79 {dimension_numbers = #tpu.dot_dimension_numbers<[1], [0], [0], [1], [0, 0, 1, 1], [], []>} : vector<20x32xbf16>, vector<32x256xbf16>, vector<20x256xf32> -> vector<20x256xf32>
    %204 = vector.extract_strided_slice %203 {offsets = [0, 0], sizes = [20, 128], strides = [1, 1]} : vector<20x256xf32> to vector<20x128xf32>
    %205 = arith.negf %204 : vector<20x128xf32>
    %206 = math.exp %205 : vector<20x128xf32>
    %cst_80 = arith.constant 1.000000e+00 : f32
    %207 = vector.broadcast %cst_80 : f32 to vector<20x128xf32>
    %208 = arith.addf %207, %206 : vector<20x128xf32>
    %209 = arith.divf %207, %208 : vector<20x128xf32>
    %210 = arith.mulf %204, %209 : vector<20x128xf32>
    %211 = vector.extract_strided_slice %203 {offsets = [0, 128], sizes = [20, 128], strides = [1, 1]} : vector<20x256xf32> to vector<20x128xf32>
    %212 = arith.mulf %210, %211 : vector<20x128xf32>
    %c1_81 = arith.constant 1 : index
    %c0_82 = arith.constant 0 : index
    %c0_83 = arith.constant 0 : index
    %213 = vector.load %arg3[%c1_81, %c0_82, %c0_83] : memref<3x128x32xbf16, #tpu.memory_space<vmem>>, vector<1x128x32xbf16>
    %214 = vector.shape_cast %213 : vector<1x128x32xbf16> to vector<128x32xbf16>
    %215 = arith.truncf %212 : vector<20x128xf32> to vector<20x128xbf16>
    %cst_84 = arith.constant dense<0.000000e+00> : vector<20x32xf32>
    %216 = tpu.matmul %215, %214, %cst_84 {dimension_numbers = #tpu.dot_dimension_numbers<[1], [0], [0], [1], [0, 0, 1, 1], [], []>} : vector<20x128xbf16>, vector<128x32xbf16>, vector<20x32xf32> -> vector<20x32xf32>
    %217 = arith.addf %187, %216 : vector<20x32xf32>
    %c324 = arith.constant 324 : index
    %c0_85 = arith.constant 0 : index
    %218 = vector.load %arg1[%c324, %c0_85] : memref<328x128xf32, #tpu.memory_space<vmem>>, vector<1x32xf32>
    %c325 = arith.constant 325 : index
    %c0_86 = arith.constant 0 : index
    %219 = vector.load %arg1[%c325, %c0_86] : memref<328x128xf32, #tpu.memory_space<vmem>>, vector<1x32xf32>
    %220 = arith.mulf %217, %217 : vector<20x32xf32>
    %cst_87 = arith.constant dense<0.000000e+00> : vector<20xf32>
    %221 = vector.multi_reduction <add>, %220, %cst_87 [1] : vector<20x32xf32> to vector<20xf32>
    %222 = vector.shape_cast %221 : vector<20xf32> to vector<20x1xf32>
    %cst_88 = arith.constant 3.200000e+01 : f32
    %223 = vector.broadcast %cst_88 : f32 to vector<20x1xf32>
    %224 = arith.divf %222, %223 : vector<20x1xf32>
    %cst_89 = arith.constant 9.99999997E-7 : f32
    %225 = vector.broadcast %cst_89 : f32 to vector<20x1xf32>
    %226 = arith.addf %224, %225 : vector<20x1xf32>
    %227 = math.rsqrt %226 : vector<20x1xf32>
    %228 = vector.broadcast %227 : vector<20x1xf32> to vector<20x32xf32>
    %229 = arith.mulf %217, %228 : vector<20x32xf32>
    %230 = vector.broadcast %218 : vector<1x32xf32> to vector<20x32xf32>
    %231 = arith.mulf %229, %230 : vector<20x32xf32>
    %c2 = arith.constant 2 : index
    %c0_90 = arith.constant 0 : index
    %c0_91 = arith.constant 0 : index
    %232 = vector.load %arg2[%c2, %c0_90, %c0_91] : memref<3x32x384xbf16, #tpu.memory_space<vmem>>, vector<1x32x96xbf16>
    %233 = vector.shape_cast %232 : vector<1x32x96xbf16> to vector<32x96xbf16>
    %234 = arith.truncf %231 : vector<20x32xf32> to vector<20x32xbf16>
    %cst_92 = arith.constant dense<0.000000e+00> : vector<20x96xf32>
    %235 = tpu.matmul %234, %233, %cst_92 {dimension_numbers = #tpu.dot_dimension_numbers<[1], [0], [0], [1], [0, 0, 1, 1], [], []>} : vector<20x32xbf16>, vector<32x96xbf16>, vector<20x96xf32> -> vector<20x96xf32>
    %236 = vector.extract_strided_slice %235 {offsets = [0, 0], sizes = [20, 32], strides = [1, 1]} : vector<20x96xf32> to vector<20x32xf32>
    %237 = vector.extract_strided_slice %235 {offsets = [0, 32], sizes = [20, 32], strides = [1, 1]} : vector<20x96xf32> to vector<20x32xf32>
    %238 = vector.extract_strided_slice %235 {offsets = [0, 64], sizes = [20, 32], strides = [1, 1]} : vector<20x96xf32> to vector<20x32xf32>
    %239 = arith.mulf %236, %0 : vector<20x32xf32>
    %240 = arith.truncf %236 : vector<20x32xf32> to vector<20x32xbf16>
    %241 = arith.truncf %2 : vector<32x32xf32> to vector<32x32xbf16>
    %cst_93 = arith.constant dense<0.000000e+00> : vector<20x32xf32>
    %242 = tpu.matmul %240, %241, %cst_93 {dimension_numbers = #tpu.dot_dimension_numbers<[1], [0], [0], [1], [0, 0, 1, 1], [], []>} : vector<20x32xbf16>, vector<32x32xbf16>, vector<20x32xf32> -> vector<20x32xf32>
    %243 = arith.mulf %242, %1 : vector<20x32xf32>
    %244 = arith.addf %239, %243 : vector<20x32xf32>
    %245 = arith.mulf %237, %0 : vector<20x32xf32>
    %246 = arith.truncf %237 : vector<20x32xf32> to vector<20x32xbf16>
    %247 = arith.truncf %2 : vector<32x32xf32> to vector<32x32xbf16>
    %cst_94 = arith.constant dense<0.000000e+00> : vector<20x32xf32>
    %248 = tpu.matmul %246, %247, %cst_94 {dimension_numbers = #tpu.dot_dimension_numbers<[1], [0], [0], [1], [0, 0, 1, 1], [], []>} : vector<20x32xbf16>, vector<32x32xbf16>, vector<20x32xf32> -> vector<20x32xf32>
    %249 = arith.mulf %248, %1 : vector<20x32xf32>
    %250 = arith.addf %245, %249 : vector<20x32xf32>
    %251 = arith.truncf %6 : vector<80x20xf32> to vector<80x20xbf16>
    %252 = arith.truncf %244 : vector<20x32xf32> to vector<20x32xbf16>
    %cst_95 = arith.constant dense<0.000000e+00> : vector<80x32xf32>
    %253 = tpu.matmul %251, %252, %cst_95 {dimension_numbers = #tpu.dot_dimension_numbers<[1], [0], [0], [1], [0, 0, 1, 1], [], []>} : vector<80x20xbf16>, vector<20x32xbf16>, vector<80x32xf32> -> vector<80x32xf32>
    %254 = arith.mulf %253, %3 : vector<80x32xf32>
    %255 = arith.truncf %254 : vector<80x32xf32> to vector<80x32xbf16>
    %256 = arith.truncf %250 : vector<20x32xf32> to vector<20x32xbf16>
    %cst_96 = arith.constant dense<0.000000e+00> : vector<80x20xf32>
    %257 = tpu.matmul %255, %256, %cst_96 {dimension_numbers = #tpu.dot_dimension_numbers<[1], [1], [0], [0], [0, 0, 1, 0], [], []>} : vector<80x32xbf16>, vector<20x32xbf16>, vector<80x20xf32> -> vector<80x20xf32>
    %cst_97 = arith.constant 0.353553385 : f32
    %258 = vector.broadcast %cst_97 : f32 to vector<80x20xf32>
    %259 = arith.mulf %257, %258 : vector<80x20xf32>
    %260 = arith.addf %259, %23 : vector<80x20xf32>
    %cst_98 = arith.constant dense<0xFF800000> : vector<80xf32>
    %261 = vector.multi_reduction <maximumf>, %260, %cst_98 [1] : vector<80x20xf32> to vector<80xf32>
    %262 = vector.shape_cast %261 : vector<80xf32> to vector<80x1xf32>
    %263 = vector.broadcast %262 : vector<80x1xf32> to vector<80x20xf32>
    %264 = arith.subf %260, %263 : vector<80x20xf32>
    %265 = math.exp %264 : vector<80x20xf32>
    %cst_99 = arith.constant dense<0.000000e+00> : vector<80xf32>
    %266 = vector.multi_reduction <add>, %265, %cst_99 [1] : vector<80x20xf32> to vector<80xf32>
    %267 = vector.shape_cast %266 : vector<80xf32> to vector<80x1xf32>
    %268 = vector.broadcast %267 : vector<80x1xf32> to vector<80x20xf32>
    %269 = arith.divf %265, %268 : vector<80x20xf32>
    %270 = arith.truncf %269 : vector<80x20xf32> to vector<80x20xbf16>
    %271 = arith.truncf %238 : vector<20x32xf32> to vector<20x32xbf16>
    %cst_100 = arith.constant dense<0.000000e+00> : vector<80x32xf32>
    %272 = tpu.matmul %270, %271, %cst_100 {dimension_numbers = #tpu.dot_dimension_numbers<[1], [0], [0], [1], [0, 0, 1, 1], [], []>} : vector<80x20xbf16>, vector<20x32xbf16>, vector<80x32xf32> -> vector<80x32xf32>
    %273 = arith.mulf %272, %3 : vector<80x32xf32>
    %274 = arith.truncf %7 : vector<20x80xf32> to vector<20x80xbf16>
    %275 = arith.truncf %273 : vector<80x32xf32> to vector<80x32xbf16>
    %cst_101 = arith.constant dense<0.000000e+00> : vector<20x32xf32>
    %276 = tpu.matmul %274, %275, %cst_101 {dimension_numbers = #tpu.dot_dimension_numbers<[1], [0], [0], [1], [0, 0, 1, 1], [], []>} : vector<20x80xbf16>, vector<80x32xbf16>, vector<20x32xf32> -> vector<20x32xf32>
    %c2_102 = arith.constant 2 : index
    %c0_103 = arith.constant 0 : index
    %c96_104 = arith.constant 96 : index
    %277 = vector.load %arg2[%c2_102, %c0_103, %c96_104] : memref<3x32x384xbf16, #tpu.memory_space<vmem>>, vector<1x32x32xbf16>
    %278 = vector.shape_cast %277 : vector<1x32x32xbf16> to vector<32x32xbf16>
    %279 = arith.truncf %276 : vector<20x32xf32> to vector<20x32xbf16>
    %cst_105 = arith.constant dense<0.000000e+00> : vector<20x32xf32>
    %280 = tpu.matmul %279, %278, %cst_105 {dimension_numbers = #tpu.dot_dimension_numbers<[1], [0], [0], [1], [0, 0, 1, 1], [], []>} : vector<20x32xbf16>, vector<32x32xbf16>, vector<20x32xf32> -> vector<20x32xf32>
    %281 = arith.addf %217, %280 : vector<20x32xf32>
    %282 = arith.mulf %281, %281 : vector<20x32xf32>
    %cst_106 = arith.constant dense<0.000000e+00> : vector<20xf32>
    %283 = vector.multi_reduction <add>, %282, %cst_106 [1] : vector<20x32xf32> to vector<20xf32>
    %284 = vector.shape_cast %283 : vector<20xf32> to vector<20x1xf32>
    %cst_107 = arith.constant 3.200000e+01 : f32
    %285 = vector.broadcast %cst_107 : f32 to vector<20x1xf32>
    %286 = arith.divf %284, %285 : vector<20x1xf32>
    %cst_108 = arith.constant 9.99999997E-7 : f32
    %287 = vector.broadcast %cst_108 : f32 to vector<20x1xf32>
    %288 = arith.addf %286, %287 : vector<20x1xf32>
    %289 = math.rsqrt %288 : vector<20x1xf32>
    %290 = vector.broadcast %289 : vector<20x1xf32> to vector<20x32xf32>
    %291 = arith.mulf %281, %290 : vector<20x32xf32>
    %292 = vector.broadcast %219 : vector<1x32xf32> to vector<20x32xf32>
    %293 = arith.mulf %291, %292 : vector<20x32xf32>
    %c2_109 = arith.constant 2 : index
    %c0_110 = arith.constant 0 : index
    %c128_111 = arith.constant 128 : index
    %294 = vector.load %arg2[%c2_109, %c0_110, %c128_111] : memref<3x32x384xbf16, #tpu.memory_space<vmem>>, vector<1x32x256xbf16>
    %295 = vector.shape_cast %294 : vector<1x32x256xbf16> to vector<32x256xbf16>
    %296 = arith.truncf %293 : vector<20x32xf32> to vector<20x32xbf16>
    %cst_112 = arith.constant dense<0.000000e+00> : vector<20x256xf32>
    %297 = tpu.matmul %296, %295, %cst_112 {dimension_numbers = #tpu.dot_dimension_numbers<[1], [0], [0], [1], [0, 0, 1, 1], [], []>} : vector<20x32xbf16>, vector<32x256xbf16>, vector<20x256xf32> -> vector<20x256xf32>
    %298 = vector.extract_strided_slice %297 {offsets = [0, 0], sizes = [20, 128], strides = [1, 1]} : vector<20x256xf32> to vector<20x128xf32>
    %299 = arith.negf %298 : vector<20x128xf32>
    %300 = math.exp %299 : vector<20x128xf32>
    %cst_113 = arith.constant 1.000000e+00 : f32
    %301 = vector.broadcast %cst_113 : f32 to vector<20x128xf32>
    %302 = arith.addf %301, %300 : vector<20x128xf32>
    %303 = arith.divf %301, %302 : vector<20x128xf32>
    %304 = arith.mulf %298, %303 : vector<20x128xf32>
    %305 = vector.extract_strided_slice %297 {offsets = [0, 128], sizes = [20, 128], strides = [1, 1]} : vector<20x256xf32> to vector<20x128xf32>
    %306 = arith.mulf %304, %305 : vector<20x128xf32>
    %c2_114 = arith.constant 2 : index
    %c0_115 = arith.constant 0 : index
    %c0_116 = arith.constant 0 : index
    %307 = vector.load %arg3[%c2_114, %c0_115, %c0_116] : memref<3x128x32xbf16, #tpu.memory_space<vmem>>, vector<1x128x32xbf16>
    %308 = vector.shape_cast %307 : vector<1x128x32xbf16> to vector<128x32xbf16>
    %309 = arith.truncf %306 : vector<20x128xf32> to vector<20x128xbf16>
    %cst_117 = arith.constant dense<0.000000e+00> : vector<20x32xf32>
    %310 = tpu.matmul %309, %308, %cst_117 {dimension_numbers = #tpu.dot_dimension_numbers<[1], [0], [0], [1], [0, 0, 1, 1], [], []>} : vector<20x128xbf16>, vector<128x32xbf16>, vector<20x32xf32> -> vector<20x32xf32>
    %311 = arith.addf %281, %310 : vector<20x32xf32>
    %c326 = arith.constant 326 : index
    %c0_118 = arith.constant 0 : index
    %312 = vector.load %arg1[%c326, %c0_118] : memref<328x128xf32, #tpu.memory_space<vmem>>, vector<1x32xf32>
    %313 = arith.truncf %8 : vector<6x20xf32> to vector<6x20xbf16>
    %314 = arith.truncf %311 : vector<20x32xf32> to vector<20x32xbf16>
    %cst_119 = arith.constant dense<0.000000e+00> : vector<6x32xf32>
    %315 = tpu.matmul %313, %314, %cst_119 {dimension_numbers = #tpu.dot_dimension_numbers<[1], [0], [0], [1], [0, 0, 1, 1], [], []>} : vector<6x20xbf16>, vector<20x32xbf16>, vector<6x32xf32> -> vector<6x32xf32>
    %316 = arith.mulf %315, %315 : vector<6x32xf32>
    %cst_120 = arith.constant dense<0.000000e+00> : vector<6xf32>
    %317 = vector.multi_reduction <add>, %316, %cst_120 [1] : vector<6x32xf32> to vector<6xf32>
    %318 = vector.shape_cast %317 : vector<6xf32> to vector<6x1xf32>
    %cst_121 = arith.constant 3.200000e+01 : f32
    %319 = vector.broadcast %cst_121 : f32 to vector<6x1xf32>
    %320 = arith.divf %318, %319 : vector<6x1xf32>
    %cst_122 = arith.constant 9.99999997E-7 : f32
    %321 = vector.broadcast %cst_122 : f32 to vector<6x1xf32>
    %322 = arith.addf %320, %321 : vector<6x1xf32>
    %323 = math.rsqrt %322 : vector<6x1xf32>
    %324 = vector.broadcast %323 : vector<6x1xf32> to vector<6x32xf32>
    %325 = arith.mulf %315, %324 : vector<6x32xf32>
    %326 = vector.broadcast %312 : vector<1x32xf32> to vector<6x32xf32>
    %327 = arith.mulf %325, %326 : vector<6x32xf32>
    %328 = arith.truncf %327 : vector<6x32xf32> to vector<6x32xbf16>
    %329 = arith.truncf %12 : vector<32x16xf32> to vector<32x16xbf16>
    %cst_123 = arith.constant dense<0.000000e+00> : vector<6x16xf32>
    %330 = tpu.matmul %328, %329, %cst_123 {dimension_numbers = #tpu.dot_dimension_numbers<[1], [0], [0], [1], [0, 0, 1, 1], [], []>} : vector<6x32xbf16>, vector<32x16xbf16>, vector<6x16xf32> -> vector<6x16xf32>
    %331 = vector.broadcast %13 : vector<1x16xf32> to vector<6x16xf32>
    %332 = arith.addf %330, %331 : vector<6x16xf32>
    %c0_124 = arith.constant 0 : index
    %c0_125 = arith.constant 0 : index
    %333 = vector.load %arg4[%c0_124, %c0_125] : memref<6x16xf32, #tpu.memory_space<vmem>>, vector<6x16xf32>
    tpu.vector_store %arg4[%c0_124, %c0_125], %332 {strides = array<i32>} : memref<6x16xf32, #tpu.memory_space<vmem>>, vector<6x16xf32>,
    return
  }
}

</mosaic_0001>

<bundles_post_ra>
// kernel: decision_transformer_forward.1
= control target key start
LH: loop header
LB: loop body
LE: loop exit
PB: predicated region body
PF: predicated region fallthrough
CT: control target
= control target key end

     0   :  { %vm217_vm0 = vcmask 1042432   ;;  %s4724_s23 = smov 96   ;;  %vm210_vm1 = vcmask 48128   ;;  %vm284_vm2 = vcmask 257024   ;;  %vm277_vm3 = vcmask 261120   ;;  %s4725_s13 = smov 32   ;;  %s6186_s0 = inlined_call_operand.vmem [shape: f32[20,38], index: 0, kind: input, shape index: {}]   ;;  %s6187_s1 = inlined_call_operand.vmem [shape: f32[328,128], index: 1, kind: input, shape index: {}]   ;;  %s6188_s2 = inlined_call_operand.vmem [shape: bf16[3,32,384], index: 2, kind: input, shape index: {}]   ;;  %s6189_s3 = inlined_call_operand.vmem [shape: bf16[3,128,32], index: 3, kind: input, shape index: {}]   ;;  %s6190_s4 = inlined_call_operand.vmem [shape: f32[6,16], index: 4, kind: output, shape index: {}]  }
   0x1   :  { %v198_v0 = vld [vmem:[%s6186_s0] sm:$0xff]  ;;  %v199_v1 = vld [vmem:[%s6186_s0 + $0x8] sm:$0xff]  ;;  %v200_v2 = vld [vmem:[%s6186_s0 + $0x10] sm:$0xf]  ;;  %v6193_v60 = vmov 0.0   ;;  %vm4727_vm4 = vmmov 0  }
   0x2   :  { %v201_v3 = vpack.c.bf16 %v199_v1, %v198_v0  ;;  %v54_v4 = vld [vmem:[%s6187_s1 + $0x110] sm:$0x3f]  ;;  %v202_v6 = vpack.c.bf16 %v200_v2, %v200_v2  ;;  %v4790_v23 = vld [vmem:[%s6188_s2] ss:$12 sps:$4 sm:$0xff]   ;;  %v4795_v24 = vld [vmem:[%s6188_s2 + $0x18] ss:$12 sps:$4 sm:$0xff]  }
   0x3   :  { %v203_v5 = vpack.c.bf16 %v54_v4, %v54_v4  ;;  %3995 = vmatprep.subr.bf16.mxu1 %v4790_v23  ;;  %v24_v25 = vld [vmem:[%s6187_s1 + $0x30] sm:$0xff]  ;;  %v25_v26 = vld [vmem:[%s6187_s1 + $0x38] sm:$0xff]  ;;  %v3628_v40 = vld [vmem:[%s6187_s1 + $0x140] ss:$0 sm:$0xff]  ;;  %vm563_vm5 = vcmask 1041408   ;;  %vm547_vm6 = vcmask 162816  }
   0x4   :  { %206 = vrot.lane.b32.xlu0 %v201_v3, %s4724_s23  ;;  %3996 = vmatpush3.bf16.msra.mxu1 %v4790_v23  ;;  %v4807_v27 = vpack.c.bf16 %v25_v26, %v24_v25  ;;  %v26_v49 = vld [vmem:[%s6187_s1 + $0x40] sm:$0xff]  ;;  %v27_v50 = vld [vmem:[%s6187_s1 + $0x48] sm:$0xff]  ;;  %v20_v63 = vld [vmem:[%s6187_s1 + $0x10] sm:$0xf]  ;;  %s4731_s18 = smov 64  }
   0x5   :  { %4425 = vmatprep.subr.msk.bf16.mxu0 %vm217_vm0, %v203_v5  ;;  %v219_v7 = vsel %vm217_vm0, %v203_v5, 0  ;;  %3997 = vmatprep.subr.bf16.mxu1 %v4795_v24  ;;  %v4827_v51 = vpack.c.bf16 %v27_v50, %v26_v49  ;;  %v18_v58 = vld [vmem:[%s6187_s1] sm:$0xff]  ;;  %v19_v59 = vld [vmem:[%s6187_s1 + $0x8] sm:$0xff]  ;;  %v4960_v50 = vld [vmem:[%s6187_s1 + $0x50] sm:$0xff] }
   0x6   :  { %3990 = vmatpush3.bf16.msra.mxu0 %v219_v7 }
   0x7   :  { %4003 = vmatprep.subr.bf16.mxu0 %v4807_v27 }
   0x8   :  { %208 = vrot.lane.b32.xlu0 %v202_v6, %s4724_s23  ;;  %3998 = vmatpush3.bf16.msra.mxu1 %v4795_v24  ;;  %v22_v6 = vld [vmem:[%s6187_s1 + $0x20] sm:$0xff] }
   0x9   :  { %4011 = vmatprep.subr.bf16.mxu1 %v4807_v27 }
  0x76   :  { %v207_v8 = vpop.permute.xlu0 %206 }
  0x77   :  { %3991 = vmatprep.mubr.msk.bf16.mxu0 %vm210_vm1, %v207_v8 }
  0x7a   :  { %v209_v9 = vpop.permute.xlu0 %208 }
  0x7b   :  { %3992 = vmatmul.mubr.msk.bf16.vlgmr.msra.gmra.mrb[0].mxu0 %vm210_vm1, %v209_v9 }
  0x7c   :  { %4004 = vmatpush3.bf16.msra.mxu0 %v4807_v27 }
  0x7d   :  { %4005 = vmatprep.subr.bf16.mxu0 %v4827_v51 }
  0x80   :  { %4006 = vmatpush3.bf16.msra.mxu0 %v4827_v51 }
  0x81   :  { %4019 = vmatprep.subr.bf16.mxu0 %v6193_v60 }
 0x14e   :  { %v3993_v10 = vpop.f32.mrb[0].mxu0 }
 0x14f   :  { %v4772_v11 = vadd.f32 %v3993_v10, %v200_v2  ;;  %v255_v12 = vpop.f32.mrb[1].mxu0 }
 0x150   :  { %v4774_v13 = vadd.f32 %v255_v12, %v198_v0  ;;  %v3994_v14 = vpop.f32.mrb[2].mxu0  ;;  %v23_v0 = vld [vmem:[%s6187_s1 + $0x28] sm:$0xf] }
 0x151   :  { %v258_v15 = vpop.f32.mrb[3].mxu0  ;;  %v276_v16 = vmul.f32 %v4772_v11, %v4772_v11 }
 0x152   :  { %v4778_v17 = vadd.f32 %v258_v15, %v199_v1  ;;  %v274_v18 = vmul.f32 %v4774_v13, %v4774_v13  ;;  %v21_v1 = vld [vmem:[%s6187_s1 + $0x18] sm:$0xff] }
 0x153   :  { %v285_v19 = vsel %vm284_vm2, %v276_v16, 0.0 }
 0x154   :  { %286 = vadd.xlane.f32.xlu0 %v285_v19  ;;  %v278_v20 = vsel %vm277_vm3, %v274_v18, 0.0  ;;  %v275_v21 = vmul.f32 %v4778_v17, %v4778_v17 }
 0x155   :  { %279 = vadd.xlane.f32.xlu1 %v278_v20 }
 0x156   :  { %v281_v22 = vsel %vm277_vm3, %v275_v21, 0.0  ;;  %v38_v21 = vld [vmem:[%s6187_s1 + $0xa0] sm:$0xff] }
 0x159   :  { %282 = vadd.xlane.f32.xlu1 %v281_v22  ;;  %v39_v22 = vld [vmem:[%s6187_s1 + $0xa8] sm:$0xff] }
 0x15a   :  { %v4894_v26 = vpack.c.bf16 %v39_v22, %v38_v21  ;;  %v5005_v22 = vld [vmem:[%s6187_s1 + $0x70] sm:$0xff] }
 0x1e1   :  { %v287_v28 = vpop.xlane.xlu0 %286 }
 0x1e2   :  { %v291_v29 = vmul.f32 0.03125, %v287_v28  ;;  %v280_v30 = vpop.xlane.xlu1 %279  ;;  %v40_v28 = vld [vmem:[%s6187_s1 + $0xb0] sm:$0xff] }
 0x1e3   :  { %v289_v31 = vmul.f32 0.03125, %v280_v30 }
 0x1e4   :  { %v294_v32 = vadd.f32 1e-06, %v291_v29  ;;  %v41_v29 = vld [vmem:[%s6187_s1 + $0xb8] sm:$0xff] }
 0x1e5   :  { %v292_v33 = vadd.f32 1e-06, %v289_v31  ;;  %v4907_v30 = vpack.c.bf16 %v41_v29, %v40_v28  ;;  %v42_v31 = vld [vmem:[%s6187_s1 + $0xc0] sm:$0xff] }
 0x1e6   :  { %4498 = vrsqrt.f32 %v294_v32  ;;  %v283_v34 = vpop.xlane.xlu1 %282  ;;  %v43_v32 = vld [vmem:[%s6187_s1 + $0xc8] sm:$0xff] }
 0x1e7   :  { %4500 = vrsqrt.f32 %v292_v33  ;;  %v290_v35 = vmul.f32 0.03125, %v283_v34  ;;  %v4919_v33 = vpack.c.bf16 %v43_v32, %v42_v31  ;;  %v44_v34 = vld [vmem:[%s6187_s1 + $0xd0] sm:$0xff]  ;;  %v5013_v31 = vld [vmem:[%s6187_s1 + $0x78] sm:$0xff] }
 0x1e9   :  { %v293_v36 = vadd.f32 1e-06, %v290_v35  ;;  %v45_v35 = vld [vmem:[%s6187_s1 + $0xd8] sm:$0xff] }
 0x1eb   :  { %4502 = vrsqrt.f32 %v293_v36  ;;  %v4931_v36 = vpack.c.bf16 %v45_v35, %v44_v34 }
 0x1f0   :  { %v4499_v37 = vpop.eup %4498 }
 0x1f1   :  { %v4501_v38 = vpop.eup %4500  ;;  %v300_v39 = vmul.f32 %v4499_v37, %v4772_v11  ;;  %v46_v37 = vld [vmem:[%s6187_s1 + $0xe0] sm:$0xff] }
 0x1f2   :  { %v298_v41 = vmul.f32 %v4501_v38, %v4774_v13  ;;  %v47_v38 = vld [vmem:[%s6187_s1 + $0xe8] sm:$0xff] }
 0x1f3   :  { %v307_v44 = vmul.f32 %v3628_v40, %v300_v39  ;;  %v4943_v39 = vpack.c.bf16 %v47_v38, %v46_v37  ;;  %v5024_v38 = vld [vmem:[%s6187_s1 + $0x80] sm:$0xff] }
 0x1f4   :  { %v305_v45 = vmul.f32 %v3628_v40, %v298_v41 }
 0x1f5   :  { %v4503_v42 = vpop.eup %4502  ;;  %v313_v48 = vpack.c.bf16 %v307_v44, %v307_v44 }
 0x1f6   :  { %v299_v43 = vmul.f32 %v4503_v42, %v4778_v17 }
 0x1f8   :  { %v306_v46 = vmul.f32 %v3628_v40, %v299_v43 }
 0x1fa   :  { %v312_v47 = vpack.c.bf16 %v306_v46, %v305_v45 }
 0x1fc   :  { %3999 = vmatprep.mubr.msk.bf16.mxu1 %vm277_vm3, %v312_v47 }
 0x1fd   :  { %4000 = vmatmul.mubr.msk.bf16.vlgmr.msra.gmra.mrb[0].mxu1 %vm277_vm3, %v313_v48 }
 0x1fe   :  { %4012 = vmatpush3.bf16.msra.mxu1 %v4807_v27 }
 0x1ff   :  { %4013 = vmatprep.subr.bf16.mxu1 %v4827_v51 }
 0x202   :  { %4014 = vmatpush3.bf16.msra.mxu1 %v4827_v51 }
 0x203   :  { %4043 = vmatprep.subr.bf16.mxu1 %v6193_v60 }
 0x2d0   :  { %v4833_v52 = vpop.f32.mrb[0].mxu1 }
 0x2d1   :  { %v4835_v53 = vpop.f32.mrb[1].mxu1  ;;  %v4845_v57 = vpack.c.bf16 %v4833_v52, %v4833_v52  ;;  %v382_v3 = vmul.f32 %v4833_v52, %v20_v63 }
 0x2d2   :  { %v4002_v54 = vpop.f32.mrb[2].mxu1  ;;  %v380_v7 = vmul.f32 %v4835_v53, %v18_v58 }
 0x2d3   :  { %v4837_v55 = vpop.f32.mrb[3].mxu1 }
 0x2d4   :  { %v4841_v56 = vpack.c.bf16 %v4837_v55, %v4835_v53  ;;  %v381_v14 = vmul.f32 %v4837_v55, %v19_v59 }
 0x2d6   :  { %464 = vrot.lane.b32.xlu1 %v4841_v56, %s4724_s23  ;;  %4007 = vmatprep.mubr.msk.bf16.mxu0 %vm277_vm3, %v4841_v56 }
 0x2d7   :  { %4008 = vmatmul.mubr.msk.bf16.vlgmr.msra.gmra.mrb[4].mxu0 %vm277_vm3, %v4845_v57 }
 0x2d8   :  { %4023 = vmatprep.mubr.msk.bf16.mxu0 %vm4727_vm4, %v6193_v60 }
 0x2da   :  { %466 = vrot.lane.b32.xlu1 %v4845_v57, %s4724_s23 }
 0x2de   :  { %450 = vrot.lane.b32.xlu1 %v18_v58, %s4725_s13  ;;  %v4965_v58 = vld [vmem:[%s6187_s1 + $0x58] sm:$0xff] }
 0x2e2   :  { %452 = vrot.lane.b32.xlu1 %v19_v59, %s4725_s13 }
 0x348   :  { %v465_v61 = vpop.permute.xlu1 %464 }
 0x349   :  { %4015 = vmatprep.mubr.msk.bf16.mxu1 %vm277_vm3, %v465_v61 }
 0x34c   :  { %v467_v62 = vpop.permute.xlu1 %466 }
 0x34d   :  { %4016 = vmatmul.mubr.msk.bf16.vlgmr.msra.gmra.mrb[4].mxu1 %vm277_vm3, %v467_v62 }
 0x34e   :  { %4047 = vmatprep.mubr.msk.bf16.mxu1 %vm4727_vm4, %v6193_v60 }
 0x350   :  { %v4953_v47 = vpop.permute.xlu1 %450 }
 0x351   :  { %v459_v59 = vmul.f32 %v4953_v47, %v4835_v53 }
 0x354   :  { %v4955_v48 = vpop.permute.xlu1 %452 }
 0x355   :  { %v460_v61 = vmul.f32 %v4955_v48, %v4837_v55 }
 0x3aa   :  { %v4009_v2 = vpop.f32.mrb[4].mxu0 }
 0x3ab   :  { %v443_v4 = vmul.f32 %v4009_v2, %v23_v0  ;;  %v427_v5 = vpop.f32.mrb[5].mxu0 }
 0x3ac   :  { %v441_v8 = vmul.f32 %v427_v5, %v21_v1  ;;  %v4010_v9 = vpop.f32.mrb[6].mxu0 }
 0x3ad   :  { %v446_v10 = vadd.f32 %v443_v4, %v382_v3  ;;  %v430_v12 = vpop.f32.mrb[7].mxu0 }
 0x3ae   :  { %v444_v15 = vadd.f32 %v441_v8, %v380_v7  ;;  %v442_v16 = vmul.f32 %v430_v12, %v22_v6  ;;  %v4987_v7 = vld [vmem:[%s6187_s1 + $0x68] sm:$0xff] }
 0x3af   :  { %v546_v20 = vpack.c.bf16 %v446_v10, %v446_v10 }
 0x3b0   :  { %v445_v18 = vadd.f32 %v442_v16, %v381_v14 }
 0x3b1   :  { %v565_v25 = vsel %vm563_vm5, %v546_v20, 0 }
 0x3b2   :  { %v545_v19 = vpack.c.bf16 %v445_v18, %v444_v15 }
 0x3b4   :  { %4020 = vmatpush3.bf16.msra.mxu0 %v545_v19 }
 0x3b5   :  { %4021 = vmatprep.subr.bf16.mxu0 %v6193_v60 }
 0x3b8   :  { %4022 = vmatpush3.bf16.msra.mxu0 %v565_v25 }
 0x3b9   :  { %4067 = vmatprep.subr.bf16.mxu0 %v6193_v60 }
 0x3bb   :  { %4024 = vmatmul.mubr.msk.bf16.vlgmr.msra.gmra.mrb[8].mxu0 %vm547_vm6, %v4894_v26 }
 0x3bc   :  { %4027 = vmatprep.mubr.msk.bf16.mxu0 %vm4727_vm4, %v6193_v60 }
 0x3c3   :  { %4028 = vmatmul.mubr.msk.bf16.gmra.mrb[12].mxu0 %vm547_vm6, %v4907_v30 }
 0x3c4   :  { %4031 = vmatprep.mubr.msk.bf16.mxu0 %vm4727_vm4, %v6193_v60 }
 0x3cb   :  { %4032 = vmatmul.mubr.msk.bf16.gmra.mrb[16].mxu0 %vm547_vm6, %v4919_v33 }
 0x3cc   :  { %4035 = vmatprep.mubr.msk.bf16.mxu0 %vm4727_vm4, %v6193_v60 }
 0x3d3   :  { %4036 = vmatmul.mubr.msk.bf16.gmra.mrb[20].mxu0 %vm547_vm6, %v4931_v36 }
 0x3d4   :  { %4039 = vmatprep.mubr.msk.bf16.mxu0 %vm4727_vm4, %v6193_v60 }
 0x3db   :  { %4040 = vmatmul.mubr.msk.bf16.gmra.mrb[24].mxu0 %vm547_vm6, %v4943_v39 }
 0x3dc   :  { %4071 = vmatprep.mubr.msk.bf16.mxu0 %vm4727_vm4, %v6193_v60 }
 0x420   :  { %v4017_v40 = vpop.f32.mrb[4].mxu1 }
 0x421   :  { %v508_v41 = vpop.f32.mrb[5].mxu1  ;;  %v524_v46 = vmul.f32 %v4017_v40, %v23_v0 }
 0x422   :  { %v522_v42 = vmul.f32 %v508_v41, %v21_v1  ;;  %v4018_v43 = vpop.f32.mrb[6].mxu1 }
 0x423   :  { %v511_v44 = vpop.f32.mrb[7].mxu1  ;;  %v5032_v43 = vld [vmem:[%s6187_s1 + $0x88] sm:$0xff] }
 0x424   :  { %v523_v45 = vmul.f32 %v511_v44, %v22_v6  ;;  %528 = vrot.lane.b32.xlu1 %v522_v42, %s4725_s13  ;;  %v4980_v6 = vld [vmem:[%s6187_s1 + $0x60] sm:$0xff] }
 0x426   :  { %530 = vrot.lane.b32.xlu0 %v523_v45, %s4725_s13 }
 0x428   :  { %454 = vrot.lane.b32.xlu1 %v20_v63, %s4725_s13 }
 0x42c   :  { %532 = vrot.lane.b32.xlu1 %v524_v46, %s4725_s13 }
 0x48e   :  { %v601_v54 = vpop.f32.mrb[8].mxu0 }
 0x48f   :  { %v4972_v62 = vmul.f32 %v601_v54, %v4960_v50  ;;  %v4025_v63 = vpop.f32.mrb[9].mxu0  ;;  %v5042_v54 = vld [vmem:[%s6187_s1 + $0x90] sm:$0xff] }
 0x490   :  { %v604_v1 = vpop.f32.mrb[10].mxu0 }
 0x491   :  { %v4975_v4 = vmul.f32 %v604_v1, %v4965_v58  ;;  %v4026_v5 = vpop.f32.mrb[11].mxu0 }
 0x493   :  { %v650_v9 = vpack.c.bf16 %v4975_v4, %v4972_v62 }
 0x496   :  { %v529_v49 = vpop.permute.xlu1 %528  ;;  %v609_v55 = vpop.f32.mrb[12].mxu0 }
 0x497   :  { %v537_v2 = vadd.f32 %v529_v49, %v459_v59  ;;  %v4992_v10 = vmul.f32 %v609_v55, %v4980_v6  ;;  %v4029_v12 = vpop.f32.mrb[13].mxu0  ;;  %v4728_v55 = vmov 32  }
 0x498   :  { %v531_v0 = vpop.permute.xlu0 %530  ;;  %v612_v14 = vpop.f32.mrb[14].mxu0  ;;  %4435 = vset.pattern.permute.xlu1 %v4728_v55 }
 0x499   :  { %v538_v3 = vadd.f32 %v531_v0, %v460_v61  ;;  %v4998_v16 = vmul.f32 %v612_v14, %v4987_v7  ;;  %v4030_v18 = vpop.f32.mrb[15].mxu0  ;;  %v5047_v61 = vld [vmem:[%s6187_s1 + $0x98] sm:$0xff] }
 0x49a   :  { %v4982_v53 = vpop.permute.xlu1 %454 }
 0x49b   :  { %v655_v8 = vpack.c.bf16 %v538_v3, %v537_v2  ;;  %v461_v15 = vmul.f32 %v4833_v52, %v4982_v53  ;;  %v651_v21 = vpack.c.bf16 %v4998_v16, %v4992_v10 }
 0x49d   :  { %659 = vrot.lane.b32.xlu1 %v655_v8, %s4724_s23  ;;  %v4729_v8 = vmov 33  }
 0x49e   :  { %v533_v19 = vpop.permute.xlu1 %532  ;;  %v617_v25 = vpop.f32.mrb[16].mxu0  ;;  %4438 = vset.pattern.permute.xlu0 %v4729_v8 }
 0x49f   :  { %v539_v20 = vadd.f32 %v533_v19, %v461_v15  ;;  %v5008_v29 = vmul.f32 %v617_v25, %v5005_v22  ;;  %v4033_v52 = vpop.f32.mrb[17].mxu0  ;;  %137 = vperm.xlu0 %4438, %v4980_v6   ;;  %v5099_v25 = vld [vmem:[%s6187_s1 + $0x10e] ss:$0 sm:$0xff] }
 0x4a0   :  { %v620_v32 = vpop.f32.mrb[18].mxu0 }
 0x4a1   :  { %v656_v28 = vpack.c.bf16 %v539_v20, %v539_v20  ;;  %v5017_v34 = vmul.f32 %v620_v32, %v5013_v31  ;;  %v4034_v35 = vpop.f32.mrb[19].mxu0 }
 0x4a3   :  { %661 = vrot.lane.b32.xlu1 %v656_v28, %s4724_s23  ;;  %v652_v37 = vpack.c.bf16 %v5017_v34, %v5008_v29  ;;  %4439 = vset.pattern.permute.xlu0 %v4728_v55  ;;  %v5104_v28 = vld [vmem:[%s6187_s1 + $0x10f] ss:$0 sm:$0xff] }
 0x4a4   :  { %67 = vperm.xlu0 %4439, %v4965_v58  }
 0x4a6   :  { %v625_v40 = vpop.f32.mrb[20].mxu0 }
 0x4a7   :  { %v5027_v41 = vmul.f32 %v625_v40, %v5024_v38  ;;  %v4037_v42 = vpop.f32.mrb[21].mxu0  ;;  %62 = vperm.xlu1 %4435, %v4960_v50   ;;  %v4730_v40 = vmov -1e+30  }
 0x4a8   :  { %v628_v44 = vpop.f32.mrb[22].mxu0  ;;  %72 = vperm.xlu0 %4439, %v4980_v6  }
 0x4a9   :  { %v5035_v45 = vmul.f32 %v628_v44, %v5032_v43  ;;  %v4038_v46 = vpop.f32.mrb[23].mxu0 }
 0x4ab   :  { %v653_v49 = vpack.c.bf16 %v5035_v45, %v5027_v41  ;;  %4436 = vset.pattern.permute.xlu1 %v4729_v8 }
 0x4ac   :  { %129 = vperm.xlu1 %4436, %v4960_v50   ;;  %87 = vperm.xlu0 %4439, %v5013_v31  }
 0x4ae   :  { %v633_v59 = vpop.f32.mrb[24].mxu0 }
 0x4af   :  { %v648_v63 = vmul.f32 %v633_v59, %v5042_v54  ;;  %v4041_v0 = vpop.f32.mrb[25].mxu0 }
 0x4b0   :  { %v636_v1 = vpop.f32.mrb[26].mxu0  ;;  %133 = vperm.xlu1 %4436, %v4965_v58   ;;  %4444 = vset.pattern.permute.xlu0 %v4729_v8 }
 0x4b1   :  { %v649_v2 = vmul.f32 %v636_v1, %v5047_v61  ;;  %v4042_v3 = vpop.f32.mrb[27].mxu0  ;;  %153 = vperm.xlu0 %4444, %v5024_v38  }
 0x4b3   :  { %v654_v5 = vpack.c.bf16 %v649_v2, %v648_v63 }
 0x4b4   :  { %4437 = vset.pattern.permute.xlu1 %v4728_v55 }
 0x4b5   :  { %77 = vperm.xlu1 %4437, %v4987_v7   ;;  %4445 = vset.pattern.permute.xlu0 %v4728_v55 }
 0x4b6   :  { %92 = vperm.xlu0 %4445, %v5024_v38  }
 0x4b9   :  { %4440 = vset.pattern.permute.xlu1 %v4729_v8 }
 0x4ba   :  { %141 = vperm.xlu1 %4440, %v4987_v7   ;;  %107 = vperm.xlu0 %4445, %v5047_v61  }
 0x4be   :  { %4441 = vset.pattern.permute.xlu1 %v4728_v55  ;;  %4449 = vset.pattern.permute.xlu0 %v4729_v8 }
 0x4bf   :  { %82 = vperm.xlu1 %4441, %v5005_v22  }
 0x4c3   :  { %4442 = vset.pattern.permute.xlu1 %v4729_v8 }
 0x4c4   :  { %145 = vperm.xlu1 %4442, %v5005_v22  }
 0x4c8   :  { %149 = vperm.xlu1 %4442, %v5013_v31  }
 0x4cc   :  { %4443 = vset.pattern.permute.xlu1 %v4728_v55 }
 0x4cd   :  { %97 = vperm.xlu1 %4443, %v5032_v43  }
 0x4d1   :  { %4446 = vset.pattern.permute.xlu1 %v4729_v8 }
 0x4d2   :  { %157 = vperm.xlu1 %4446, %v5032_v43  }
 0x4d6   :  { %4447 = vset.pattern.permute.xlu1 %v4728_v55 }
 0x4d7   :  { %102 = vperm.xlu1 %4447, %v5042_v54  }
 0x4db   :  { %4448 = vset.pattern.permute.xlu1 %v4729_v8 }
 0x4dc   :  { %161 = vperm.xlu1 %4448, %v5042_v54  }
 0x4e0   :  { %165 = vperm.xlu1 %4448, %v5047_v61  }
 0x50f   :  { %v660_v12 = vpop.permute.xlu1 %659 }
 0x510   :  { %v679_v14 = vsel %vm277_vm3, %v660_v12, 0 }
 0x511   :  { %4044 = vmatpush3.bf16.xpose.msra.mxu1 %v679_v14 }
 0x512   :  { %4045 = vmatprep.subr.bf16.mxu1 %v6193_v60 }
 0x515   :  { %v662_v15 = vpop.permute.xlu1 %661 }
 0x516   :  { %v682_v18 = vsel %vm277_vm3, %v662_v15, 0 }
 0x519   :  { %4046 = vmatpush3.bf16.xpose.msra.mxu1 %v682_v18 }
 0x51e   :  { %v138_v20 = vpop.permute.xlu0 %137 }
 0x51f   :  { %vm170_vm13 = vcmp.le.f32.partialorder %v5104_v28, %v138_v20 }
 0x520   :  { %4048 = vmatmul.mubr.msk.bf16.vlgmr.msra.gmra.mrb[8].mxu1 %vm277_vm3, %v650_v9 }
 0x521   :  { %4051 = vmatprep.mubr.msk.bf16.mxu1 %vm4727_vm4, %v6193_v60 }
 0x523   :  { %v68_v29 = vpop.permute.xlu0 %67 }
 0x524   :  { %vm115_vm10 = vcmp.eq.f32.partialorder %v68_v29, %v5099_v25 }
 0x526   :  { %v63_v62 = vpop.permute.xlu1 %62 }
 0x527   :  { %vm114_vm7 = vcmp.eq.f32.partialorder %v63_v62, %v5099_v25  ;;  %v73_v34 = vpop.permute.xlu0 %72 }
 0x528   :  { %4052 = vmatmul.mubr.msk.bf16.gmra.mrb[12].mxu1 %vm277_vm3, %v651_v21  ;;  %vm116_vm14 = vcmp.eq.f32.partialorder %v73_v34, %v5099_v25 }
 0x529   :  { %4055 = vmatprep.mubr.msk.bf16.mxu1 %vm4727_vm4, %v6193_v60  ;;  %vm180_vm1 = vmand %vm116_vm14, %vm170_vm13 }
 0x52a   :  { %v5131_v12 = vsel %vm180_vm1, 0.0, %v4730_v40 }
 0x52b   :  { %v130_v4 = vpop.permute.xlu1 %129  ;;  %v88_v1 = vpop.permute.xlu0 %87 }
 0x52c   :  { %vm168_vm8 = vcmp.le.f32.partialorder %v5104_v28, %v130_v4 }
 0x52d   :  { %vm178_vm11 = vmand %vm114_vm7, %vm168_vm8 }
 0x52e   :  { %v5111_v41 = vsel %vm178_vm11, 0.0, %v4730_v40  ;;  %vm119_vm11 = vcmp.eq.f32.partialorder %v88_v1, %v5099_v25 }
 0x52f   :  { %v134_v9 = vpop.permute.xlu1 %133 }
 0x530   :  { %4056 = vmatmul.mubr.msk.bf16.gmra.mrb[16].mxu1 %vm277_vm3, %v652_v37  ;;  %vm169_vm9 = vcmp.le.f32.partialorder %v5104_v28, %v134_v9  ;;  %v154_v62 = vpop.permute.xlu0 %153 }
 0x531   :  { %4059 = vmatprep.mubr.msk.bf16.mxu1 %vm4727_vm4, %v6193_v60  ;;  %vm179_vm12 = vmand %vm115_vm10, %vm169_vm9  ;;  %vm174_vm14 = vcmp.le.f32.partialorder %v5104_v28, %v154_v62 }
 0x532   :  { %v5118_v59 = vsel %vm179_vm12, 0.0, %v4730_v40 }
 0x534   :  { %v78_v10 = vpop.permute.xlu1 %77 }
 0x535   :  { %vm117_vm15 = vcmp.eq.f32.partialorder %v78_v10, %v5099_v25 }
 0x538   :  { %4060 = vmatmul.mubr.msk.bf16.gmra.mrb[20].mxu1 %vm277_vm3, %v653_v49 }
 0x539   :  { %4063 = vmatprep.mubr.msk.bf16.mxu1 %vm4727_vm4, %v6193_v60  ;;  %v142_v16 = vpop.permute.xlu1 %141 }
 0x53a   :  { %vm171_vm0 = vcmp.le.f32.partialorder %v5104_v28, %v142_v16 }
 0x53b   :  { %vm181_vm7 = vmand %vm117_vm15, %vm171_vm0 }
 0x53c   :  { %v5137_v9 = vsel %vm181_vm7, 0.0, %v4730_v40 }
 0x53e   :  { %v83_v19 = vpop.permute.xlu1 %82 }
 0x53f   :  { %vm118_vm8 = vcmp.eq.f32.partialorder %v83_v19, %v5099_v25  ;;  %v93_v19 = vpop.permute.xlu0 %92 }
 0x540   :  { %4064 = vmatmul.mubr.msk.bf16.gmra.mrb[24].mxu1 %vm277_vm3, %v654_v5  ;;  %vm120_vm15 = vcmp.eq.f32.partialorder %v93_v19, %v5099_v25 }
 0x541   :  { %vm184_vm7 = vmand %vm120_vm15, %vm174_vm14  ;;  %vm1005_vm15 = vcmask 654336  }
 0x543   :  { %v146_v21 = vpop.permute.xlu1 %145 }
 0x544   :  { %vm172_vm9 = vcmp.le.f32.partialorder %v5104_v28, %v146_v21 }
 0x545   :  { %vm182_vm12 = vmand %vm118_vm8, %vm172_vm9 }
 0x547   :  { %v150_v52 = vpop.permute.xlu1 %149 }
 0x548   :  { %vm173_vm10 = vcmp.le.f32.partialorder %v5104_v28, %v150_v52 }
 0x549   :  { %vm183_vm13 = vmand %vm119_vm11, %vm173_vm10 }
 0x54c   :  { %v98_v49 = vpop.permute.xlu1 %97 }
 0x54d   :  { %vm121_vm0 = vcmp.eq.f32.partialorder %v98_v49, %v5099_v25  ;;  %v108_v49 = vpop.permute.xlu0 %107 }
 0x551   :  { %v158_v8 = vpop.permute.xlu1 %157 }
 0x552   :  { %vm175_vm1 = vcmp.le.f32.partialorder %v5104_v28, %v158_v8 }
 0x553   :  { %vm185_vm8 = vmand %vm121_vm0, %vm175_vm1 }
 0x556   :  { %v103_v20 = vpop.permute.xlu1 %102 }
 0x557   :  { %vm122_vm9 = vcmp.eq.f32.partialorder %v103_v20, %v5099_v25 }
 0x5f3   :  { %v718_v32 = vpop.f32.mrb[8].mxu1 }
 0x5f4   :  { %v757_v35 = vmul.f32 0.35355338, %v718_v32  ;;  %v4049_v37 = vpop.f32.mrb[9].mxu1 }
 0x5f5   :  { %v721_v42 = vpop.f32.mrb[10].mxu1 }
 0x5f6   :  { %v758_v44 = vmul.f32 0.35355338, %v721_v42  ;;  %v4050_v45 = vpop.f32.mrb[11].mxu1  ;;  %v5114_v46 = vadd.f32 %v757_v35, %v5111_v41  ;;  %v5151_v35 = vsel %vm182_vm12, 0.0, %v4730_v40  ;;  %vm123_vm12 = vcmp.eq.f32.partialorder %v108_v49, %v5099_v25 }
 0x5f7   :  { %v5157_v45 = vsel %vm183_vm13, 0.0, %v4730_v40 }
 0x5f8   :  { %v777_v63 = vsel %vm547_vm6, %v5114_v46, -inf  ;;  %v5124_v0 = vadd.f32 %v758_v44, %v5118_v59 }
 0x5f9   :  { %778 = vmax.xlane.f32.xlu0 %v777_v63  ;;  %v162_v63 = vpop.permute.xlu1 %161 }
 0x5fa   :  { %v780_v2 = vsel %vm547_vm6, %v5124_v0, -inf  ;;  %vm176_vm10 = vcmp.le.f32.partialorder %v5104_v28, %v162_v63 }
 0x5fb   :  { %781 = vmax.xlane.f32.xlu1 %v780_v2  ;;  %v726_v3 = vpop.f32.mrb[12].mxu1  ;;  %vm186_vm11 = vmand %vm122_vm9, %vm176_vm10 }
 0x5fc   :  { %v759_v5 = vmul.f32 0.35355338, %v726_v3  ;;  %v4053_v55 = vpop.f32.mrb[13].mxu1 }
 0x5fd   :  { %v729_v14 = vpop.f32.mrb[14].mxu1  ;;  %v166_v8 = vpop.permute.xlu1 %165 }
 0x5fe   :  { %v760_v15 = vmul.f32 0.35355338, %v729_v14  ;;  %v4054_v18 = vpop.f32.mrb[15].mxu1  ;;  %v5134_v4 = vadd.f32 %v759_v5, %v5131_v12  ;;  %vm177_vm13 = vcmp.le.f32.partialorder %v5104_v28, %v166_v8 }
 0x5ff   :  { %vm187_vm14 = vmand %vm123_vm12, %vm177_vm13 }
 0x600   :  { %v783_v10 = vsel %vm547_vm6, %v5134_v4, -inf  ;;  %v5144_v16 = vadd.f32 %v760_v15, %v5137_v9  ;;  %v5172_v15 = vsel %vm184_vm7, 0.0, %v4730_v40  ;;  %v5191_v25 = vsel %vm187_vm14, 0.0, %v4730_v40 }
 0x601   :  { %784 = vmax.xlane.f32.xlu0 %v783_v10 }
 0x602   :  { %v786_v21 = vsel %vm547_vm6, %v5144_v16, -inf }
 0x603   :  { %v734_v29 = vpop.f32.mrb[16].mxu1 }
 0x604   :  { %v761_v32 = vmul.f32 0.35355338, %v734_v29  ;;  %v4057_v34 = vpop.f32.mrb[17].mxu1 }
 0x605   :  { %787 = vmax.xlane.f32.xlu0 %v786_v21  ;;  %v737_v37 = vpop.f32.mrb[18].mxu1  ;;  %v5185_v21 = vsel %vm186_vm11, 0.0, %v4730_v40 }
 0x606   :  { %v762_v42 = vmul.f32 0.35355338, %v737_v37  ;;  %v4058_v52 = vpop.f32.mrb[19].mxu1  ;;  %v5154_v44 = vadd.f32 %v761_v32, %v5151_v35  ;;  %v5177_v32 = vsel %vm185_vm8, 0.0, %v4730_v40 }
 0x608   :  { %v789_v1 = vsel %vm547_vm6, %v5154_v44, -inf  ;;  %v5164_v2 = vadd.f32 %v762_v42, %v5157_v45 }
 0x609   :  { %790 = vmax.xlane.f32.xlu1 %v789_v1 }
 0x60a   :  { %v792_v3 = vsel %vm547_vm6, %v5164_v2, -inf }
 0x60b   :  { %793 = vmax.xlane.f32.xlu0 %v792_v3  ;;  %v742_v5 = vpop.f32.mrb[20].mxu1 }
 0x60c   :  { %v763_v55 = vmul.f32 0.35355338, %v742_v5  ;;  %v4061_v14 = vpop.f32.mrb[21].mxu1 }
 0x60d   :  { %v745_v18 = vpop.f32.mrb[22].mxu1 }
 0x60e   :  { %v764_v62 = vmul.f32 0.35355338, %v745_v18  ;;  %v4062_v10 = vpop.f32.mrb[23].mxu1  ;;  %v773_v29 = vadd.f32 %v763_v55, %v5172_v15 }
 0x610   :  { %v795_v34 = vsel %vm547_vm6, %v773_v29, -inf  ;;  %v774_v20 = vadd.f32 %v764_v62, %v5177_v32 }
 0x611   :  { %796 = vmax.xlane.f32.xlu1 %v795_v34 }
 0x612   :  { %v798_v19 = vsel %vm547_vm6, %v774_v20, -inf }
 0x613   :  { %799 = vmax.xlane.f32.xlu0 %v798_v19  ;;  %v750_v37 = vpop.f32.mrb[24].mxu1 }
 0x614   :  { %v765_v42 = vmul.f32 0.35355338, %v750_v37  ;;  %v4065_v52 = vpop.f32.mrb[25].mxu1 }
 0x615   :  { %v753_v63 = vpop.f32.mrb[26].mxu1 }
 0x616   :  { %v766_v1 = vmul.f32 0.35355338, %v753_v63  ;;  %v5188_v3 = vadd.f32 %v765_v42, %v5185_v21  ;;  %v4066_v5 = vpop.f32.mrb[27].mxu1 }
 0x618   :  { %v801_v28 = vsel %vm547_vm6, %v5188_v3, -inf  ;;  %v5196_v55 = vadd.f32 %v766_v1, %v5191_v25 }
 0x619   :  { %802 = vmax.xlane.f32.xlu1 %v801_v28 }
 0x61a   :  { %v804_v14 = vsel %vm547_vm6, %v5196_v55, -inf }
 0x61b   :  { %805 = vmax.xlane.f32.xlu0 %v804_v14 }
 0x686   :  { %v779_v49 = vpop.xlane.xlu0 %778 }
 0x687   :  { %v807_v18 = vsub.f32 %v5114_v46, %v779_v49 }
 0x688   :  { %v782_v8 = vpop.xlane.xlu1 %781 }
 0x689   :  { %v817_v62 = vmul.f32 1.442695, %v807_v18  ;;  %v808_v10 = vsub.f32 %v5124_v0, %v782_v8 }
 0x68b   :  { %4504 = vpow2.f32 %v817_v62  ;;  %v819_v40 = vmul.f32 1.442695, %v808_v10 }
 0x68d   :  { %4506 = vpow2.f32 %v819_v40 }
 0x68e   :  { %v785_v34 = vpop.xlane.xlu0 %784 }
 0x68f   :  { %v809_v19 = vsub.f32 %v5134_v4, %v785_v34 }
 0x691   :  { %v821_v37 = vmul.f32 1.442695, %v809_v19 }
 0x692   :  { %v788_v42 = vpop.xlane.xlu0 %787 }
 0x693   :  { %4508 = vpow2.f32 %v821_v37  ;;  %v810_v52 = vsub.f32 %v5144_v16, %v788_v42 }
 0x695   :  { %v5204_v63 = vpop.eup %4504  ;;  %v823_v1 = vmul.f32 1.442695, %v810_v52 }
 0x696   :  { %v791_v5 = vpop.xlane.xlu1 %790  ;;  %v837_v46 = vsel %vm547_vm6, %v5204_v63, 0.0 }
 0x697   :  { %v5208_v28 = vpop.eup %4506  ;;  %4510 = vpow2.f32 %v823_v1  ;;  %v811_v0 = vsub.f32 %v5154_v44, %v791_v5  ;;  %838 = vadd.xlane.f32.xlu1 %v837_v46 }
 0x698   :  { %v794_v14 = vpop.xlane.xlu0 %793  ;;  %v840_v4 = vsel %vm547_vm6, %v5208_v28, 0.0 }
 0x699   :  { %v825_v49 = vmul.f32 1.442695, %v811_v0  ;;  %v812_v16 = vsub.f32 %v5164_v2, %v794_v14  ;;  %841 = vadd.xlane.f32.xlu0 %v840_v4 }
 0x69b   :  { %4512 = vpow2.f32 %v825_v49  ;;  %v827_v18 = vmul.f32 1.442695, %v812_v16 }
 0x69d   :  { %v5214_v8 = vpop.eup %4508  ;;  %4514 = vpow2.f32 %v827_v18 }
 0x69e   :  { %v797_v62 = vpop.xlane.xlu1 %796  ;;  %v843_v10 = vsel %vm547_vm6, %v5214_v8, 0.0 }
 0x69f   :  { %v813_v40 = vsub.f32 %v773_v29, %v797_v62  ;;  %844 = vadd.xlane.f32.xlu1 %v843_v10 }
 0x6a0   :  { %v800_v44 = vpop.xlane.xlu0 %799 }
 0x6a1   :  { %v5218_v34 = vpop.eup %4510  ;;  %v829_v19 = vmul.f32 1.442695, %v813_v40  ;;  %v814_v37 = vsub.f32 %v774_v20, %v800_v44 }
 0x6a2   :  { %v846_v2 = vsel %vm547_vm6, %v5218_v34, 0.0 }
 0x6a3   :  { %4516 = vpow2.f32 %v829_v19  ;;  %v831_v42 = vmul.f32 1.442695, %v814_v37  ;;  %847 = vadd.xlane.f32.xlu0 %v846_v2 }
 0x6a5   :  { %v5222_v52 = vpop.eup %4512  ;;  %4518 = vpow2.f32 %v831_v42 }
 0x6a6   :  { %v849_v1 = vsel %vm547_vm6, %v5222_v52, 0.0  ;;  %v803_v4 = vpop.xlane.xlu1 %802 }
 0x6a7   :  { %v5226_v5 = vpop.eup %4514  ;;  %850 = vadd.xlane.f32.xlu1 %v849_v1  ;;  %v815_v49 = vsub.f32 %v5188_v3, %v803_v4 }
 0x6a8   :  { %v852_v29 = vsel %vm547_vm6, %v5226_v5, 0.0  ;;  %v806_v18 = vpop.xlane.xlu0 %805 }
 0x6a9   :  { %853 = vadd.xlane.f32.xlu0 %v852_v29  ;;  %v833_v16 = vmul.f32 1.442695, %v815_v49  ;;  %v816_v62 = vsub.f32 %v5196_v55, %v806_v18 }
 0x6ab   :  { %4520 = vpow2.f32 %v833_v16  ;;  %v835_v10 = vmul.f32 1.442695, %v816_v62 }
 0x6ad   :  { %v5230_v20 = vpop.eup %4516  ;;  %4522 = vpow2.f32 %v835_v10 }
 0x6ae   :  { %v855_v46 = vsel %vm547_vm6, %v5230_v20, 0.0 }
 0x6af   :  { %v5234_v0 = vpop.eup %4518  ;;  %856 = vadd.xlane.f32.xlu0 %v855_v46 }
 0x6b0   :  { %v858_v14 = vsel %vm547_vm6, %v5234_v0, 0.0 }
 0x6b3   :  { %859 = vadd.xlane.f32.xlu0 %v858_v14 }
 0x6b5   :  { %v5244_v40 = vpop.eup %4520 }
 0x6b6   :  { %v861_v44 = vsel %vm547_vm6, %v5244_v40, 0.0 }
 0x6b8   :  { %892 = vrot.lane.b32.xlu1 %v4841_v56, %s4731_s18  ;;  %v4523_v56 = vpop.eup %4522 }
 0x6b9   :  { %v864_v19 = vsel %vm547_vm6, %v4523_v56, 0.0 }
 0x6c9   :  { %894 = vrot.lane.b32.xlu0 %v4845_v57, %s4731_s18 }
 0x6dc   :  { %862 = vadd.xlane.f32.xlu1 %v861_v44 }
 0x6e8   :  { %865 = vadd.xlane.f32.xlu0 %v864_v19 }
 0x6ed   :  { %1062 = vrot.lane.b32.xlu1 %v4790_v23, %s4725_s13 }
 0x6fe   :  { %1064 = vrot.lane.b32.xlu0 %v4795_v24, %s4725_s13 }
 0x724   :  { %v839_v57 = vpop.xlane.xlu1 %838 }
 0x726   :  { %v842_v3 = vpop.xlane.xlu0 %841 }
 0x727   :  { %4524 = vrcp.f32 %v842_v3 }
 0x728   :  { %4526 = vrcp.f32 %v839_v57 }
 0x72c   :  { %v845_v55 = vpop.xlane.xlu1 %844 }
 0x730   :  { %v848_v37 = vpop.xlane.xlu0 %847 }
 0x731   :  { %4528 = vrcp.f32 %v848_v37  ;;  %v4525_v46 = vpop.eup %4524 }
 0x732   :  { %4530 = vrcp.f32 %v845_v55  ;;  %v4527_v14 = vpop.eup %4526  ;;  %v870_v24 = vmul.f32 %v4525_v46, %v5208_v28 }
 0x733   :  { %v868_v49 = vmul.f32 %v4527_v14, %v5204_v63 }
 0x734   :  { %v851_v2 = vpop.xlane.xlu1 %850 }
 0x735   :  { %v887_v18 = vpack.c.bf16 %v870_v24, %v868_v49 }
 0x736   :  { %v854_v42 = vpop.xlane.xlu0 %853 }
 0x737   :  { %4532 = vrcp.f32 %v854_v42 }
 0x738   :  { %v893_v1 = vpop.permute.xlu1 %892  ;;  %4534 = vrcp.f32 %v851_v2 }
 0x739   :  { %4068 = vmatpush3.bf16.msra.mxu0 %v893_v1 }
 0x73a   :  { %4069 = vmatprep.subr.bf16.mxu0 %v6193_v60 }
 0x73b   :  { %v4529_v62 = vpop.eup %4528 }
 0x73c   :  { %v857_v29 = vpop.xlane.xlu0 %856  ;;  %v4531_v10 = vpop.eup %4530  ;;  %v874_v44 = vmul.f32 %v4529_v62, %v5218_v34 }
 0x73d   :  { %v872_v28 = vmul.f32 %v4531_v10, %v5214_v8 }
 0x73f   :  { %v888_v19 = vpack.c.bf16 %v874_v44, %v872_v28 }
 0x740   :  { %v860_v23 = vpop.xlane.xlu0 %859 }
 0x741   :  { %4536 = vrcp.f32 %v860_v23  ;;  %v4533_v63 = vpop.eup %4532 }
 0x742   :  { %4538 = vrcp.f32 %v857_v29  ;;  %v4535_v57 = vpop.eup %4534  ;;  %v878_v3 = vmul.f32 %v4533_v63, %v5226_v5 }
 0x743   :  { %v876_v55 = vmul.f32 %v4535_v57, %v5222_v52 }
 0x744   :  { %v895_v4 = vpop.permute.xlu0 %894 }
 0x745   :  { %v913_v16 = vsel %vm563_vm5, %v895_v4, 0  ;;  %v889_v37 = vpack.c.bf16 %v878_v3, %v876_v55 }
 0x746   :  { %4070 = vmatpush3.bf16.msra.mxu0 %v913_v16 }
 0x749   :  { %4072 = vmatmul.mubr.msk.bf16.vlgmr.msra.gmra.mrb[28].mxu0 %vm547_vm6, %v887_v18 }
 0x74a   :  { %4075 = vmatprep.mubr.msk.bf16.mxu0 %vm4727_vm4, %v6193_v60 }
 0x74b   :  { %v4537_v2 = vpop.eup %4536 }
 0x74c   :  { %v4539_v34 = vpop.eup %4538  ;;  %v882_v8 = vmul.f32 %v4537_v2, %v5234_v0  ;;  %v49_v0 = vld [vmem:[%s6187_s1 + $0xf8] sm:$0xff] }
 0x74d   :  { %v880_v42 = vmul.f32 %v4539_v34, %v5230_v20  ;;  %v48_v20 = vld [vmem:[%s6187_s1 + $0xf0] sm:$0xff] }
 0x74e   :  { %v5283_v4 = vpack.c.bf16 %v49_v0, %v48_v20  ;;  %v50_v0 = vld [vmem:[%s6187_s1 + $0x100] sm:$0xf] }
 0x74f   :  { %v890_v1 = vpack.c.bf16 %v882_v8, %v880_v42 }
 0x750   :  { %4101 = vmatprep.mubr.msk.bf16.mxu1 %vm1005_vm15, %v5283_v4 }
 0x751   :  { %4076 = vmatmul.mubr.msk.bf16.gmra.mrb[32].mxu0 %vm547_vm6, %v888_v19 }
 0x752   :  { %4079 = vmatprep.mubr.msk.bf16.mxu0 %vm4727_vm4, %v6193_v60 }
 0x759   :  { %4080 = vmatmul.mubr.msk.bf16.gmra.mrb[36].mxu0 %vm547_vm6, %v889_v37 }
 0x75a   :  { %4083 = vmatprep.mubr.msk.bf16.mxu0 %vm4727_vm4, %v6193_v60 }
 0x761   :  { %4084 = vmatmul.mubr.msk.bf16.gmra.mrb[40].mxu0 %vm547_vm6, %v890_v1 }
 0x762   :  { %4087 = vmatprep.mubr.msk.bf16.mxu0 %vm4727_vm4, %v6193_v60 }
 0x769   :  { %v863_v5 = vpop.xlane.xlu1 %862 }
 0x76a   :  { %4540 = vrcp.f32 %v863_v5 }
 0x774   :  { %v4541_v29 = vpop.eup %4540 }
 0x775   :  { %v866_v52 = vpop.xlane.xlu0 %865  ;;  %v884_v23 = vmul.f32 %v4541_v29, %v5244_v40 }
 0x776   :  { %4542 = vrcp.f32 %v866_v52 }
 0x780   :  { %v4543_v46 = vpop.eup %4542 }
 0x781   :  { %v886_v14 = vmul.f32 %v4543_v46, %v4523_v56 }
 0x783   :  { %v891_v24 = vpack.c.bf16 %v886_v14, %v884_v23 }
 0x785   :  { %4088 = vmatmul.mubr.msk.bf16.gmra.mrb[44].mxu0 %vm547_vm6, %v891_v24 }
 0x81c   :  { %v949_v49 = vpop.f32.mrb[28].mxu0 }
 0x81d   :  { %v4073_v40 = vpop.f32.mrb[29].mxu0  ;;  %v988_v16 = vmul.f32 %v949_v49, %v4960_v50 }
 0x81e   :  { %v952_v56 = vpop.f32.mrb[30].mxu0  ;;  %v1065_v40 = vpop.permute.xlu0 %1064 }
 0x81f   :  { %v989_v18 = vmul.f32 %v952_v56, %v4965_v58  ;;  %v4074_v62 = vpop.f32.mrb[31].mxu0 }
 0x821   :  { %v1000_v10 = vpack.c.bf16 %v989_v18, %v988_v16 }
 0x823   :  { %4091 = vmatprep.subr.bf16.mxu1 %v1000_v10 }
 0x824   :  { %v957_v44 = vpop.f32.mrb[32].mxu0  ;;  %4092 = vmatpush3.bf16.msra.mxu1 %v1000_v10 }
 0x825   :  { %v4077_v28 = vpop.f32.mrb[33].mxu0  ;;  %v990_v63 = vmul.f32 %v957_v44, %v4980_v6 }
 0x826   :  { %v960_v19 = vpop.f32.mrb[34].mxu0 }
 0x827   :  { %v991_v57 = vmul.f32 %v960_v19, %v4987_v7  ;;  %v4078_v3 = vpop.f32.mrb[35].mxu0 }
 0x829   :  { %v1001_v55 = vpack.c.bf16 %v991_v57, %v990_v63 }
 0x82b   :  { %4093 = vmatprep.subr.bf16.mxu1 %v1001_v55 }
 0x82c   :  { %v965_v37 = vpop.f32.mrb[36].mxu0  ;;  %4094 = vmatpush3.bf16.msra.mxu1 %v1001_v55 }
 0x82d   :  { %v4081_v2 = vpop.f32.mrb[37].mxu0  ;;  %v992_v58 = vmul.f32 %v965_v37, %v5005_v22 }
 0x82e   :  { %v968_v50 = vpop.f32.mrb[38].mxu0 }
 0x82f   :  { %v993_v34 = vmul.f32 %v968_v50, %v5013_v31  ;;  %v4082_v8 = vpop.f32.mrb[39].mxu0 }
 0x830   :  { %v4457_v8 = vld [vmem:[%s6188_s2 + $0x20] ss:$12 sps:$4 sm:$0xff]  }
 0x831   :  { %v1002_v42 = vpack.c.bf16 %v993_v34, %v992_v58  ;;  %v4452_v58 = vld [vmem:[%s6188_s2 + $0x4] ss:$12 sps:$4 sm:$0xff]   ;;  %v4455_v34 = vld [vmem:[%s6188_s2 + $0x1c] ss:$12 sps:$4 sm:$0xff]  }
 0x833   :  { %4095 = vmatprep.subr.bf16.mxu1 %v1002_v42 }
 0x834   :  { %v973_v1 = vpop.f32.mrb[40].mxu0  ;;  %4096 = vmatpush3.bf16.msra.mxu1 %v1002_v42  ;;  %v6191_v42 = vmov 0  }
 0x835   :  { %v4085_v5 = vpop.f32.mrb[41].mxu0  ;;  %v994_v7 = vmul.f32 %v973_v1, %v5024_v38  ;;  %v1063_v38 = vpop.permute.xlu1 %1062 }
 0x836   :  { %v976_v6 = vpop.f32.mrb[42].mxu0 }
 0x837   :  { %v995_v52 = vmul.f32 %v976_v6, %v5032_v43  ;;  %v4086_v29 = vpop.f32.mrb[43].mxu0  ;;  %v5300_v43 = vpack.c.bf16 %v50_v0, %v50_v0 }
 0x839   :  { %v1003_v46 = vpack.c.bf16 %v995_v52, %v994_v7 }
 0x83b   :  { %4097 = vmatprep.subr.bf16.mxu1 %v1003_v46 }
 0x83c   :  { %4098 = vmatpush3.bf16.msra.mxu1 %v1003_v46 }
 0x858   :  { %v981_v23 = vpop.f32.mrb[44].mxu0 }
 0x859   :  { %v4089_v14 = vpop.f32.mrb[45].mxu0  ;;  %v996_v31 = vmul.f32 %v981_v23, %v5042_v54 }
 0x85a   :  { %v984_v22 = vpop.f32.mrb[46].mxu0 }
 0x85b   :  { %v997_v24 = vmul.f32 %v984_v22, %v5047_v61  ;;  %v4090_v20 = vpop.f32.mrb[47].mxu0 }
 0x85c   :  { %v3656_v20 = vld [vmem:[%s6187_s1 + $0x141] ss:$0 sm:$0xff] }
 0x85d   :  { %v1004_v49 = vpack.c.bf16 %v997_v24, %v996_v31 }
 0x85f   :  { %4099 = vmatprep.subr.bf16.mxu1 %v1004_v49 }
 0x860   :  { %4100 = vmatpush3.bf16.msra.mxu1 %v1004_v49 }
 0x861   :  { %4105 = vmatprep.subr.bf16.mxu1 %v1063_v38 }
 0x863   :  { %4102 = vmatmul.mubr.msk.bf16.vlgmr.msra.gmra.mrb[28].mxu1 %vm1005_vm15, %v5300_v43 }
 0x864   :  { %4106 = vmatpush3.bf16.msra.mxu1 %v1063_v38 }
 0x865   :  { %4107 = vmatprep.subr.bf16.mxu1 %v1065_v40 }
 0x868   :  { %4108 = vmatpush3.bf16.msra.mxu1 %v1065_v40 }
 0x936   :  { %v4103_v54 = vpop.f32.mrb[28].mxu1 }
 0x937   :  { %v1046_v61 = vpop.f32.mrb[29].mxu1  ;;  %v1061_v62 = vpack.c.bf16 %v4103_v54, %v4103_v54 }
 0x938   :  { %v4104_v56 = vpop.f32.mrb[30].mxu1 }
 0x939   :  { %v1049_v16 = vpop.f32.mrb[31].mxu1 }
 0x93a   :  { %v1060_v18 = vpack.c.bf16 %v1049_v16, %v1046_v61 }
 0x93c   :  { %4109 = vmatprep.mubr.msk.bf16.mxu1 %vm277_vm3, %v1060_v18  ;;  %v4458_v18 = vld [vmem:[%s6189_s3] sm:$0xff]  }
 0x93d   :  { %4110 = vmatmul.mubr.msk.bf16.vlgmr.msra.gmra.mrb[32].mxu1 %vm277_vm3, %v1061_v62  ;;  %4113 = vmatprep.subr.bf16.mxu0 %v4458_v18  ;;  %v4459_v62 = vld [vmem:[%s6189_s3 + $0x8] sm:$0xff]  }
 0x93e   :  { %1220 = vmatprep.mubr.bf16.mxu1 %v6191_v42  ;;  %4114 = vmatpush3.bf16.msra.mxu0 %v4458_v18 }
 0x93f   :  { %4115 = vmatprep.subr.bf16.mxu0 %v4459_v62 }
 0x942   :  { %4116 = vmatpush3.bf16.msra.mxu0 %v4459_v62 }
 0xa10   :  { %v4111_v10 = vpop.f32.mrb[32].mxu1 }
 0xa11   :  { %v1108_v44 = vpop.f32.mrb[33].mxu1  ;;  %v5307_v28 = vadd.f32 %v4111_v10, %v4772_v11  ;;  %v4460_v10 = vld [vmem:[%s6189_s3 + $0x10] sm:$0xff]  }
 0xa12   :  { %v5310_v19 = vadd.f32 %v1108_v44, %v4774_v13  ;;  %v4112_v63 = vpop.f32.mrb[34].mxu1  ;;  %4117 = vmatprep.subr.bf16.mxu0 %v4460_v10  ;;  %v4461_v44 = vld [vmem:[%s6189_s3 + $0x18] sm:$0xff]  }
 0xa13   :  { %v1111_v57 = vpop.f32.mrb[35].mxu1  ;;  %v1127_v11 = vmul.f32 %v5307_v28, %v5307_v28  ;;  %4118 = vmatpush3.bf16.msra.mxu0 %v4460_v10  ;;  %v4462_v63 = vld [vmem:[%s6189_s3 + $0x20] sm:$0xff]  }
 0xa14   :  { %v5313_v3 = vadd.f32 %v1111_v57, %v4778_v17  ;;  %v1125_v55 = vmul.f32 %v5310_v19, %v5310_v19  ;;  %v4454_v17 = vld [vmem:[%s6188_s2 + $0x8] ss:$12 sps:$4 sm:$0xff]   ;;  %4119 = vmatprep.subr.bf16.mxu0 %v4461_v44 }
 0xa15   :  { %v1134_v50 = vsel %vm284_vm2, %v1127_v11, 0.0  ;;  %1188 = vmatprep.subr.bf16.mxu1 %v4454_v17  ;;  %v4463_v57 = vld [vmem:[%s6189_s3 + $0x28] sm:$0xff]  }
 0xa16   :  { %v1128_v37 = vsel %vm277_vm3, %v1125_v55, 0.0  ;;  %v1126_v2 = vmul.f32 %v5313_v3, %v5313_v3  ;;  %1189 = vmatpush1.bf16.msra.mxu1 %v4452_v58  ;;  %v4464_v55 = vld [vmem:[%s6189_s3 + $0x30] sm:$0xff]  }
 0xa17   :  { %1129 = vadd.xlane.f32.xlu1 %v1128_v37  ;;  %1190 = vmatprep.subr.bf16.mxu1 %v4457_v8  ;;  %v4465_v37 = vld [vmem:[%s6189_s3 + $0x38] sm:$0xff]  }
 0xa18   :  { %v1131_v13 = vsel %vm277_vm3, %v1126_v2, 0.0  ;;  %4120 = vmatpush3.bf16.msra.mxu0 %v4461_v44 }
 0xa19   :  { %1132 = vadd.xlane.f32.xlu0 %v1131_v13  ;;  %4121 = vmatprep.subr.bf16.mxu0 %v4462_v63 }
 0xa1a   :  { %1191 = vmatpush1.bf16.msra.mxu1 %v4455_v34 }
 0xa1b   :  { %1135 = vadd.xlane.f32.xlu1 %v1134_v50 }
 0xa1c   :  { %4122 = vmatpush3.bf16.msra.mxu0 %v4462_v63 }
 0xa1d   :  { %4123 = vmatprep.subr.bf16.mxu0 %v4463_v57 }
 0xa20   :  { %4124 = vmatpush3.bf16.msra.mxu0 %v4463_v57 }
 0xa21   :  { %4125 = vmatprep.subr.bf16.mxu0 %v4464_v55 }
 0xa24   :  { %4126 = vmatpush3.bf16.msra.mxu0 %v4464_v55 }
 0xa25   :  { %4127 = vmatprep.subr.bf16.mxu0 %v4465_v37 }
 0xa28   :  { %4128 = vmatpush3.bf16.msra.mxu0 %v4465_v37 }
 0xa29   :  { %4141 = vmatprep.subr.bf16.mxu0 %v4807_v27 }
 0xaa4   :  { %v1130_v1 = vpop.xlane.xlu1 %1129 }
 0xaa5   :  { %v1137_v5 = vmul.f32 0.03125, %v1130_v1 }
 0xaa6   :  { %v1133_v6 = vpop.xlane.xlu0 %1132 }
 0xaa7   :  { %v1140_v7 = vadd.f32 1e-06, %v1137_v5  ;;  %v1138_v52 = vmul.f32 0.03125, %v1133_v6 }
 0xaa8   :  { %v1136_v29 = vpop.xlane.xlu1 %1135 }
 0xaa9   :  { %4544 = vrsqrt.f32 %v1140_v7  ;;  %v1141_v46 = vadd.f32 1e-06, %v1138_v52  ;;  %v1139_v23 = vmul.f32 0.03125, %v1136_v29 }
 0xaab   :  { %4546 = vrsqrt.f32 %v1141_v46  ;;  %v1142_v14 = vadd.f32 1e-06, %v1139_v23 }
 0xaad   :  { %4548 = vrsqrt.f32 %v1142_v14 }
 0xab3   :  { %v4545_v22 = vpop.eup %4544 }
 0xab4   :  { %v1146_v31 = vmul.f32 %v4545_v22, %v5310_v19 }
 0xab5   :  { %v4547_v24 = vpop.eup %4546 }
 0xab6   :  { %v1147_v0 = vmul.f32 %v4547_v24, %v5313_v3  ;;  %v1153_v38 = vmul.f32 %v3656_v20, %v1146_v31 }
 0xab7   :  { %v4549_v49 = vpop.eup %4548 }
 0xab8   :  { %v1154_v40 = vmul.f32 %v3656_v20, %v1147_v0  ;;  %v1148_v61 = vmul.f32 %v4549_v49, %v5307_v28 }
 0xaba   :  { %v1160_v54 = vpack.c.bf16 %v1154_v40, %v1153_v38  ;;  %v1155_v56 = vmul.f32 %v3656_v20, %v1148_v61 }
 0xabc   :  { %3661 = vmatmul.mubr.msk.bf16.vlgmr.msra.gmra.mrb[36].mxu1 %vm277_vm3, %v1160_v54  ;;  %v1161_v16 = vpack.c.bf16 %v1155_v56, %v1155_v56 }
 0xabd   :  { %1230 = vmatprep.mubr.bf16.mxu1 %v6191_v42 }
 0xac4   :  { %3662 = vmatmul.mubr.msk.bf16.gmra.mrb[40].mxu1 %vm277_vm3, %v1161_v16 }
 0xb8f   :  { %v1222_v2 = vpop.f32.mrb[36].mxu1 }
 0xb90   :  { %v3663_v11 = vmul.f32 -1.442695, %v1222_v2  ;;  %v1224_v13 = vpop.f32.mrb[37].mxu1 }
 0xb91   :  { %v1226_v50 = vpop.f32.mrb[38].mxu1 }
 0xb92   :  { %4550 = vpow2.f32 %v3663_v11  ;;  %v3664_v17 = vmul.f32 -1.442695, %v1226_v50  ;;  %v1228_v58 = vpop.f32.mrb[39].mxu1 }
 0xb94   :  { %4552 = vpow2.f32 %v3664_v17 }
 0xb97   :  { %v1232_v34 = vpop.f32.mrb[40].mxu1 }
 0xb98   :  { %v3665_v8 = vmul.f32 -1.442695, %v1232_v34  ;;  %v1234_v1 = vpop.f32.mrb[41].mxu1 }
 0xb99   :  { %v1236_v5 = vpop.f32.mrb[42].mxu1 }
 0xb9a   :  { %4554 = vpow2.f32 %v3665_v8  ;;  %v1237_v6 = vpop.f32.mrb[43].mxu1 }
 0xb9c   :  { %v4551_v7 = vpop.eup %4550 }
 0xb9d   :  { %v1248_v52 = vadd.f32 1.0, %v4551_v7 }
 0xb9e   :  { %v4553_v29 = vpop.eup %4552 }
 0xb9f   :  { %4556 = vrcp.f32 %v1248_v52  ;;  %v1249_v46 = vadd.f32 1.0, %v4553_v29 }
 0xba1   :  { %4558 = vrcp.f32 %v1249_v46 }
 0xba4   :  { %v4555_v23 = vpop.eup %4554 }
 0xba5   :  { %v1250_v14 = vadd.f32 1.0, %v4555_v23  ;;  %v3674_v23 = vld [vmem:[%s6187_s1 + $0x142] ss:$0 sm:$0xff] }
 0xba7   :  { %4560 = vrcp.f32 %v1250_v14 }
 0xba9   :  { %v4557_v22 = vpop.eup %4556 }
 0xbaa   :  { %v1257_v31 = vmul.f32 %v4557_v22, %v1222_v2 }
 0xbab   :  { %v4559_v24 = vpop.eup %4558 }
 0xbac   :  { %v1260_v20 = vmul.f32 %v1257_v31, %v1224_v13  ;;  %v1258_v0 = vmul.f32 %v4559_v24, %v1226_v50  ;;  %v5401_v13 = vld [vmem:[%s6188_s2 + $0x48] ss:$12 sps:$4 sm:$0xff]  }
 0xbae   :  { %v1261_v49 = vmul.f32 %v1258_v0, %v1228_v58 }
 0xbb0   :  { %v1279_v38 = vpack.c.bf16 %v1261_v49, %v1260_v20 }
 0xbb1   :  { %v4561_v40 = vpop.eup %4560 }
 0xbb2   :  { %v1259_v54 = vmul.f32 %v4561_v40, %v1232_v34  ;;  %4129 = vmatprep.mubr.bf16.mxu0 %v1279_v38 }
 0xbb4   :  { %v1262_v61 = vmul.f32 %v1259_v54, %v1234_v1 }
 0xbb6   :  { %v1280_v56 = vpack.c.bf16 %v1262_v61, %v1262_v61 }
 0xbb8   :  { %4130 = vmatmul.mubr.bf16.vlgmr.msra.gmra.mrb[48].mxu0 %v1280_v56 }
 0xbb9   :  { %4142 = vmatpush3.bf16.msra.mxu0 %v4807_v27 }
 0xbba   :  { %4143 = vmatprep.subr.bf16.mxu0 %v4827_v51 }
 0xbbd   :  { %4144 = vmatpush3.bf16.msra.mxu0 %v4827_v51 }
 0xbbe   :  { %4157 = vmatprep.subr.bf16.mxu0 %v6193_v60 }
 0xc8b   :  { %v4131_v16 = vpop.f32.mrb[48].mxu0 }
 0xc8c   :  { %v5376_v18 = vadd.f32 %v4131_v16, %v5307_v28  ;;  %v1363_v62 = vpop.f32.mrb[49].mxu0 }
 0xc8d   :  { %v5379_v10 = vadd.f32 %v1363_v62, %v5310_v19  ;;  %v4132_v44 = vpop.f32.mrb[50].mxu0 }
 0xc8e   :  { %v1366_v63 = vpop.f32.mrb[51].mxu0  ;;  %v1384_v57 = vmul.f32 %v5376_v18, %v5376_v18 }
 0xc8f   :  { %v5384_v55 = vadd.f32 %v1366_v63, %v5313_v3  ;;  %v1382_v37 = vmul.f32 %v5379_v10, %v5379_v10  ;;  %v5396_v3 = vld [vmem:[%s6188_s2 + $0x30] ss:$12 sps:$4 sm:$0xff]  }
 0xc90   :  { %v1391_v2 = vsel %vm284_vm2, %v1384_v57, 0.0  ;;  %4133 = vmatprep.subr.bf16.mxu1 %v5396_v3 }
 0xc91   :  { %1392 = vadd.xlane.f32.xlu0 %v1391_v2  ;;  %v1385_v28 = vsel %vm277_vm3, %v1382_v37, 0.0  ;;  %v1383_v19 = vmul.f32 %v5384_v55, %v5384_v55  ;;  %4134 = vmatpush3.bf16.msra.mxu1 %v5396_v3  ;;  %v4692_v37 = vld [vmem:[%s6187_s1 + $0x10] sm:$0xf] }
 0xc92   :  { %1386 = vadd.xlane.f32.xlu1 %v1385_v28  ;;  %4135 = vmatprep.subr.bf16.mxu1 %v5401_v13  ;;  %v4693_v28 = vld [vmem:[%s6187_s1 + $0x28] sm:$0xf] }
 0xc93   :  { %v1388_v11 = vsel %vm277_vm3, %v1383_v19, 0.0 }
 0xc95   :  { %4136 = vmatpush3.bf16.msra.mxu1 %v5401_v13 }
 0xc96   :  { %1389 = vadd.xlane.f32.xlu1 %v1388_v11  ;;  %4149 = vmatprep.subr.bf16.mxu1 %v4807_v27 }
 0xd1e   :  { %v1393_v50 = vpop.xlane.xlu0 %1392 }
 0xd1f   :  { %v1396_v17 = vmul.f32 0.03125, %v1393_v50  ;;  %v1387_v58 = vpop.xlane.xlu1 %1386  ;;  %v4694_v50 = vld [vmem:[%s6187_s1] sm:$0xff] }
 0xd20   :  { %v1394_v34 = vmul.f32 0.03125, %v1387_v58  ;;  %v4695_v58 = vld [vmem:[%s6187_s1 + $0x18] sm:$0xff] }
 0xd21   :  { %v1399_v8 = vadd.f32 1e-06, %v1396_v17 }
 0xd22   :  { %v1397_v1 = vadd.f32 1e-06, %v1394_v34 }
 0xd23   :  { %4562 = vrsqrt.f32 %v1399_v8  ;;  %v1390_v5 = vpop.xlane.xlu1 %1389 }
 0xd24   :  { %4564 = vrsqrt.f32 %v1397_v1  ;;  %v1395_v6 = vmul.f32 0.03125, %v1390_v5 }
 0xd26   :  { %v1398_v7 = vadd.f32 1e-06, %v1395_v6  ;;  %v4696_v6 = vld [vmem:[%s6187_s1 + $0x8] sm:$0xff] }
 0xd28   :  { %4566 = vrsqrt.f32 %v1398_v7 }
 0xd2d   :  { %v4563_v52 = vpop.eup %4562 }
 0xd2e   :  { %v4565_v29 = vpop.eup %4564  ;;  %v1405_v46 = vmul.f32 %v4563_v52, %v5376_v18 }
 0xd2f   :  { %v1403_v14 = vmul.f32 %v4565_v29, %v5379_v10  ;;  %v4697_v29 = vld [vmem:[%s6187_s1 + $0x20] sm:$0xff] }
 0xd30   :  { %v1412_v24 = vmul.f32 %v3674_v23, %v1405_v46 }
 0xd31   :  { %v1410_v20 = vmul.f32 %v3674_v23, %v1403_v14 }
 0xd32   :  { %v4567_v22 = vpop.eup %4566  ;;  %v1419_v38 = vpack.c.bf16 %v1412_v24, %v1412_v24 }
 0xd33   :  { %v1404_v31 = vmul.f32 %v4567_v22, %v5384_v55 }
 0xd35   :  { %v1411_v0 = vmul.f32 %v3674_v23, %v1404_v31 }
 0xd37   :  { %v1418_v49 = vpack.c.bf16 %v1411_v0, %v1410_v20 }
 0xd39   :  { %4137 = vmatprep.mubr.msk.bf16.mxu1 %vm277_vm3, %v1418_v49 }
 0xd3a   :  { %4138 = vmatmul.mubr.msk.bf16.vlgmr.msra.gmra.mrb[44].mxu1 %vm277_vm3, %v1419_v38 }
 0xd3b   :  { %4150 = vmatpush3.bf16.msra.mxu1 %v4807_v27 }
 0xd3c   :  { %4151 = vmatprep.subr.bf16.mxu1 %v4827_v51 }
 0xd3f   :  { %4152 = vmatpush3.bf16.msra.mxu1 %v4827_v51 }
 0xd40   :  { %4181 = vmatprep.subr.bf16.mxu1 %v6193_v60 }
 0xe0d   :  { %v5420_v40 = vpop.f32.mrb[44].mxu1 }
 0xe0e   :  { %v5424_v54 = vpack.c.bf16 %v5420_v40, %v5420_v40  ;;  %v5426_v61 = vpop.f32.mrb[45].mxu1  ;;  %v1488_v2 = vmul.f32 %v4692_v37, %v5420_v40  ;;  %v5500_v37 = vld [vmem:[%s6187_s1 + $0x50] sm:$0xff] }
 0xe0f   :  { %v4140_v56 = vpop.f32.mrb[46].mxu1  ;;  %v1486_v17 = vmul.f32 %v4694_v50, %v5426_v61 }
 0xe10   :  { %1558 = vrot.lane.b32.xlu0 %v5424_v54, %s4724_s23  ;;  %v5430_v16 = vpop.f32.mrb[47].mxu1 }
 0xe11   :  { %v5434_v62 = vpack.c.bf16 %v5430_v16, %v5426_v61  ;;  %v1487_v7 = vmul.f32 %v4696_v6, %v5430_v16  ;;  %v1552_v6 = vmul.f32 %v5430_v16, %v4955_v48 }
 0xe13   :  { %1556 = vrot.lane.b32.xlu1 %v5434_v62, %s4724_s23  ;;  %4145 = vmatprep.mubr.msk.bf16.mxu0 %vm277_vm3, %v5434_v62 }
 0xe14   :  { %4146 = vmatmul.mubr.msk.bf16.vlgmr.msra.gmra.mrb[52].mxu0 %vm277_vm3, %v5424_v54 }
 0xe15   :  { %4161 = vmatprep.mubr.msk.bf16.mxu0 %vm4727_vm4, %v6193_v60 }
 0xe82   :  { %v1559_v63 = vpop.permute.xlu0 %1558 }
 0xe85   :  { %v1557_v44 = vpop.permute.xlu1 %1556 }
 0xe86   :  { %4153 = vmatprep.mubr.msk.bf16.mxu1 %vm277_vm3, %v1557_v44 }
 0xe87   :  { %4154 = vmatmul.mubr.msk.bf16.vlgmr.msra.gmra.mrb[48].mxu1 %vm277_vm3, %v1559_v63 }
 0xe88   :  { %4185 = vmatprep.mubr.msk.bf16.mxu1 %vm4727_vm4, %v6193_v60 }
 0xee7   :  { %v4147_v57 = vpop.f32.mrb[52].mxu0 }
 0xee8   :  { %v1547_v19 = vmul.f32 %v4693_v28, %v4147_v57  ;;  %v1531_v11 = vpop.f32.mrb[53].mxu0  ;;  %v1553_v57 = vmul.f32 %v5420_v40, %v4982_v53 }
 0xee9   :  { %v1545_v34 = vmul.f32 %v4695_v58, %v1531_v11  ;;  %v4148_v8 = vpop.f32.mrb[54].mxu0 }
 0xeea   :  { %v1550_v1 = vadd.f32 %v1547_v19, %v1488_v2  ;;  %v1534_v5 = vpop.f32.mrb[55].mxu0 }
 0xeeb   :  { %v1548_v52 = vadd.f32 %v1545_v34, %v1486_v17  ;;  %v1546_v46 = vmul.f32 %v4697_v29, %v1534_v5  ;;  %v1551_v5 = vmul.f32 %v5426_v61, %v4953_v47  ;;  %v5526_v61 = vld [vmem:[%s6187_s1 + $0x68] sm:$0xff] }
 0xeec   :  { %v1633_v22 = vpack.c.bf16 %v1550_v1, %v1550_v1 }
 0xeed   :  { %v1549_v23 = vadd.f32 %v1546_v46, %v1487_v7 }
 0xeee   :  { %v1635_v31 = vsel %vm563_vm5, %v1633_v22, 0 }
 0xeef   :  { %v1632_v14 = vpack.c.bf16 %v1549_v23, %v1548_v52  ;;  %v5520_v23 = vld [vmem:[%s6187_s1 + $0x60] sm:$0xff] }
 0xef1   :  { %4158 = vmatpush3.bf16.msra.mxu0 %v1632_v14 }
 0xef2   :  { %4159 = vmatprep.subr.bf16.mxu0 %v6193_v60 }
 0xef5   :  { %4160 = vmatpush3.bf16.msra.mxu0 %v1635_v31 }
 0xef6   :  { %4205 = vmatprep.subr.bf16.mxu0 %v6193_v60 }
 0xef8   :  { %4162 = vmatmul.mubr.msk.bf16.vlgmr.msra.gmra.mrb[56].mxu0 %vm547_vm6, %v4894_v26 }
 0xef9   :  { %4165 = vmatprep.mubr.msk.bf16.mxu0 %vm4727_vm4, %v6193_v60 }
 0xf00   :  { %4166 = vmatmul.mubr.msk.bf16.gmra.mrb[60].mxu0 %vm547_vm6, %v4907_v30 }
 0xf01   :  { %4169 = vmatprep.mubr.msk.bf16.mxu0 %vm4727_vm4, %v6193_v60 }
 0xf08   :  { %4170 = vmatmul.mubr.msk.bf16.gmra.mrb[64].mxu0 %vm547_vm6, %v4919_v33 }
 0xf09   :  { %4173 = vmatprep.mubr.msk.bf16.mxu0 %vm4727_vm4, %v6193_v60 }
 0xf10   :  { %4174 = vmatmul.mubr.msk.bf16.gmra.mrb[68].mxu0 %vm547_vm6, %v4931_v36 }
 0xf11   :  { %4177 = vmatprep.mubr.msk.bf16.mxu0 %vm4727_vm4, %v6193_v60 }
 0xf18   :  { %4178 = vmatmul.mubr.msk.bf16.gmra.mrb[72].mxu0 %vm547_vm6, %v4943_v39 }
 0xf19   :  { %4209 = vmatprep.mubr.msk.bf16.mxu0 %vm4727_vm4, %v6193_v60 }
 0xf5a   :  { %v4155_v24 = vpop.f32.mrb[48].mxu1 }
 0xf5b   :  { %v1616_v20 = vmul.f32 %v4693_v28, %v4155_v24  ;;  %v1600_v0 = vpop.f32.mrb[49].mxu1 }
 0xf5c   :  { %v1614_v49 = vmul.f32 %v4695_v58, %v1600_v0  ;;  %v4156_v38 = vpop.f32.mrb[50].mxu1  ;;  %v5508_v58 = vld [vmem:[%s6187_s1 + $0x58] sm:$0xff] }
 0xf5d   :  { %1624 = vrot.lane.b32.xlu0 %v1616_v20, %s4725_s13  ;;  %v1603_v56 = vpop.f32.mrb[51].mxu1  ;;  %v5533_v38 = vld [vmem:[%s6187_s1 + $0x70] sm:$0xff] }
 0xf5e   :  { %1620 = vrot.lane.b32.xlu1 %v1614_v49, %s4725_s13  ;;  %v1615_v44 = vmul.f32 %v4697_v29, %v1603_v56 }
 0xf62   :  { %1622 = vrot.lane.b32.xlu1 %v1615_v44, %s4725_s13 }
 0xfcb   :  { %v1671_v63 = vpop.f32.mrb[56].mxu0 }
 0xfcc   :  { %v5503_v2 = vmul.f32 %v5500_v37, %v1671_v63  ;;  %v4163_v28 = vpop.f32.mrb[57].mxu0 }
 0xfcd   :  { %v1674_v11 = vpop.f32.mrb[58].mxu0 }
 0xfce   :  { %v1711_v40 = vmul.f32 %v5508_v58, %v1674_v11  ;;  %v4164_v34 = vpop.f32.mrb[59].mxu0 }
 0xfcf   :  { %v1625_v19 = vpop.permute.xlu0 %1624 }
 0xfd0   :  { %v1631_v50 = vadd.f32 %v1625_v19, %v1553_v57  ;;  %v1621_v17 = vpop.permute.xlu1 %1620  ;;  %v1720_v1 = vpack.c.bf16 %v1711_v40, %v5503_v2  ;;  %v5539_v57 = vld [vmem:[%s6187_s1 + $0x78] sm:$0xff] }
 0xfd1   :  { %v1629_v52 = vadd.f32 %v1621_v17, %v1551_v5 }
 0xfd2   :  { %v1726_v8 = vpack.c.bf16 %v1631_v50, %v1631_v50  ;;  %v5545_v50 = vld [vmem:[%s6187_s1 + $0x80] sm:$0xff] }
 0xfd3   :  { %v1679_v46 = vpop.f32.mrb[60].mxu0 }
 0xfd4   :  { %1731 = vrot.lane.b32.xlu0 %v1726_v8, %s4724_s23  ;;  %v1623_v7 = vpop.permute.xlu1 %1622  ;;  %v1712_v14 = vmul.f32 %v5520_v23, %v1679_v46  ;;  %v4167_v22 = vpop.f32.mrb[61].mxu0  ;;  %v5551_v8 = vld [vmem:[%s6187_s1 + $0x88] sm:$0xff] }
 0xfd5   :  { %v1630_v29 = vadd.f32 %v1623_v7, %v1552_v6  ;;  %v1682_v24 = vpop.f32.mrb[62].mxu0 }
 0xfd6   :  { %v1713_v16 = vmul.f32 %v5526_v61, %v1682_v24  ;;  %v4168_v20 = vpop.f32.mrb[63].mxu0 }
 0xfd7   :  { %v1725_v31 = vpack.c.bf16 %v1630_v29, %v1629_v52  ;;  %v5557_v29 = vld [vmem:[%s6187_s1 + $0x90] sm:$0xff] }
 0xfd8   :  { %v1721_v0 = vpack.c.bf16 %v1713_v16, %v1712_v14 }
 0xfd9   :  { %1729 = vrot.lane.b32.xlu1 %v1725_v31, %s4724_s23  ;;  %v5563_v31 = vld [vmem:[%s6187_s1 + $0x98] sm:$0xff] }
 0xfdb   :  { %v1687_v49 = vpop.f32.mrb[64].mxu0 }
 0xfdc   :  { %v1714_v56 = vmul.f32 %v5533_v38, %v1687_v49  ;;  %v4171_v44 = vpop.f32.mrb[65].mxu0 }
 0xfdd   :  { %v1690_v63 = vpop.f32.mrb[66].mxu0 }
 0xfde   :  { %v1715_v2 = vmul.f32 %v5539_v57, %v1690_v63  ;;  %v4172_v28 = vpop.f32.mrb[67].mxu0 }
 0xfe0   :  { %v1722_v19 = vpack.c.bf16 %v1715_v2, %v1714_v56 }
 0xfe3   :  { %v1695_v11 = vpop.f32.mrb[68].mxu0 }
 0xfe4   :  { %v1716_v17 = vmul.f32 %v5545_v50, %v1695_v11  ;;  %v4175_v40 = vpop.f32.mrb[69].mxu0 }
 0xfe5   :  { %v1698_v34 = vpop.f32.mrb[70].mxu0 }
 0xfe6   :  { %v1717_v5 = vmul.f32 %v5551_v8, %v1698_v34  ;;  %v4176_v6 = vpop.f32.mrb[71].mxu0 }
 0xfe8   :  { %v1723_v7 = vpack.c.bf16 %v1717_v5, %v1716_v17 }
 0xfeb   :  { %v1703_v52 = vpop.f32.mrb[72].mxu0 }
 0xfec   :  { %v1718_v46 = vmul.f32 %v5557_v29, %v1703_v52  ;;  %v4179_v14 = vpop.f32.mrb[73].mxu0 }
 0xfed   :  { %v1706_v22 = vpop.f32.mrb[74].mxu0 }
 0xfee   :  { %v1719_v24 = vmul.f32 %v5563_v31, %v1706_v22  ;;  %v4180_v16 = vpop.f32.mrb[75].mxu0 }
 0xff0   :  { %v1724_v20 = vpack.c.bf16 %v1719_v24, %v1718_v46 }
0x1046   :  { %v1732_v44 = vpop.permute.xlu0 %1731 }
0x1047   :  { %v1752_v63 = vsel %vm277_vm3, %v1732_v44, 0 }
0x104b   :  { %v1730_v49 = vpop.permute.xlu1 %1729 }
0x104c   :  { %v1749_v56 = vsel %vm277_vm3, %v1730_v49, 0 }
0x104d   :  { %4182 = vmatpush3.bf16.xpose.msra.mxu1 %v1749_v56 }
0x104e   :  { %4183 = vmatprep.subr.bf16.mxu1 %v6193_v60 }
0x1055   :  { %4184 = vmatpush3.bf16.xpose.msra.mxu1 %v1752_v63 }
0x105c   :  { %4186 = vmatmul.mubr.msk.bf16.vlgmr.msra.gmra.mrb[52].mxu1 %vm277_vm3, %v1720_v1 }
0x105d   :  { %4189 = vmatprep.mubr.msk.bf16.mxu1 %vm4727_vm4, %v6193_v60 }
0x1064   :  { %4190 = vmatmul.mubr.msk.bf16.gmra.mrb[56].mxu1 %vm277_vm3, %v1721_v0 }
0x1065   :  { %4193 = vmatprep.mubr.msk.bf16.mxu1 %vm4727_vm4, %v6193_v60 }
0x106c   :  { %4194 = vmatmul.mubr.msk.bf16.gmra.mrb[60].mxu1 %vm277_vm3, %v1722_v19 }
0x106d   :  { %4197 = vmatprep.mubr.msk.bf16.mxu1 %vm4727_vm4, %v6193_v60 }
0x1074   :  { %4198 = vmatmul.mubr.msk.bf16.gmra.mrb[64].mxu1 %vm277_vm3, %v1723_v7 }
0x1075   :  { %4201 = vmatprep.mubr.msk.bf16.mxu1 %vm4727_vm4, %v6193_v60 }
0x107c   :  { %4202 = vmatmul.mubr.msk.bf16.gmra.mrb[68].mxu1 %vm277_vm3, %v1724_v20 }
0x107d   :  { %4239 = vmatprep.mubr.msk.bf16.mxu1 %vm1005_vm15, %v5283_v4 }
0x112f   :  { %v1788_v1 = vpop.f32.mrb[52].mxu1 }
0x1130   :  { %v1827_v0 = vmul.f32 0.35355338, %v1788_v1  ;;  %v4187_v2 = vpop.f32.mrb[53].mxu1 }
0x1131   :  { %v1791_v28 = vpop.f32.mrb[54].mxu1 }
0x1132   :  { %v1828_v11 = vmul.f32 0.35355338, %v1791_v28  ;;  %v4188_v17 = vpop.f32.mrb[55].mxu1  ;;  %v1837_v19 = vadd.f32 %v1827_v0, %v5111_v41 }
0x1134   :  { %v1847_v40 = vsel %vm547_vm6, %v1837_v19, -inf  ;;  %v1838_v34 = vadd.f32 %v1828_v11, %v5118_v59 }
0x1135   :  { %1848 = vmax.xlane.f32.xlu1 %v1847_v40 }
0x1136   :  { %v1850_v5 = vsel %vm547_vm6, %v1838_v34, -inf }
0x1137   :  { %1851 = vmax.xlane.f32.xlu0 %v1850_v5  ;;  %v1796_v6 = vpop.f32.mrb[56].mxu1 }
0x1138   :  { %v1829_v7 = vmul.f32 0.35355338, %v1796_v6  ;;  %v4191_v52 = vpop.f32.mrb[57].mxu1 }
0x1139   :  { %v1799_v46 = vpop.f32.mrb[58].mxu1 }
0x113a   :  { %v1830_v14 = vmul.f32 0.35355338, %v1799_v46  ;;  %v4192_v22 = vpop.f32.mrb[59].mxu1  ;;  %v1839_v24 = vadd.f32 %v1829_v7, %v5131_v12 }
0x113c   :  { %v1853_v16 = vsel %vm547_vm6, %v1839_v24, -inf  ;;  %v1840_v20 = vadd.f32 %v1830_v14, %v5137_v9 }
0x113d   :  { %1854 = vmax.xlane.f32.xlu0 %v1853_v16 }
0x113e   :  { %v1856_v49 = vsel %vm547_vm6, %v1840_v20, -inf }
0x113f   :  { %1857 = vmax.xlane.f32.xlu1 %v1856_v49  ;;  %v1804_v56 = vpop.f32.mrb[60].mxu1 }
0x1140   :  { %v1831_v44 = vmul.f32 0.35355338, %v1804_v56  ;;  %v4195_v63 = vpop.f32.mrb[61].mxu1 }
0x1141   :  { %v1807_v1 = vpop.f32.mrb[62].mxu1 }
0x1142   :  { %v1832_v0 = vmul.f32 0.35355338, %v1807_v1  ;;  %v4196_v2 = vpop.f32.mrb[63].mxu1  ;;  %v1841_v28 = vadd.f32 %v1831_v44, %v5151_v35 }
0x1144   :  { %v1859_v11 = vsel %vm547_vm6, %v1841_v28, -inf  ;;  %v1842_v17 = vadd.f32 %v1832_v0, %v5157_v45 }
0x1145   :  { %1860 = vmax.xlane.f32.xlu0 %v1859_v11 }
0x1146   :  { %v1862_v40 = vsel %vm547_vm6, %v1842_v17, -inf }
0x1147   :  { %1863 = vmax.xlane.f32.xlu1 %v1862_v40  ;;  %v1812_v5 = vpop.f32.mrb[64].mxu1 }
0x1148   :  { %v1833_v6 = vmul.f32 0.35355338, %v1812_v5  ;;  %v4199_v7 = vpop.f32.mrb[65].mxu1 }
0x1149   :  { %v1815_v52 = vpop.f32.mrb[66].mxu1 }
0x114a   :  { %v1834_v46 = vmul.f32 0.35355338, %v1815_v52  ;;  %v4200_v14 = vpop.f32.mrb[67].mxu1  ;;  %v1843_v22 = vadd.f32 %v1833_v6, %v5172_v15 }
0x114c   :  { %v1865_v16 = vsel %vm547_vm6, %v1843_v22, -inf  ;;  %v1844_v49 = vadd.f32 %v1834_v46, %v5177_v32 }
0x114d   :  { %1866 = vmax.xlane.f32.xlu0 %v1865_v16 }
0x114e   :  { %v1868_v56 = vsel %vm547_vm6, %v1844_v49, -inf }
0x114f   :  { %1869 = vmax.xlane.f32.xlu1 %v1868_v56  ;;  %v1820_v44 = vpop.f32.mrb[68].mxu1 }
0x1150   :  { %v1835_v63 = vmul.f32 0.35355338, %v1820_v44  ;;  %v4203_v1 = vpop.f32.mrb[69].mxu1 }
0x1151   :  { %v1823_v0 = vpop.f32.mrb[70].mxu1 }
0x1152   :  { %v1836_v2 = vmul.f32 0.35355338, %v1823_v0  ;;  %v5601_v11 = vadd.f32 %v1835_v63, %v5185_v21  ;;  %v4204_v40 = vpop.f32.mrb[71].mxu1 }
0x1154   :  { %v1871_v5 = vsel %vm547_vm6, %v5601_v11, -inf  ;;  %v5606_v6 = vadd.f32 %v1836_v2, %v5191_v25 }
0x1155   :  { %1872 = vmax.xlane.f32.xlu0 %v1871_v5 }
0x1156   :  { %v1874_v7 = vsel %vm547_vm6, %v5606_v6, -inf }
0x1157   :  { %1875 = vmax.xlane.f32.xlu1 %v1874_v7 }
0x11c2   :  { %v1849_v52 = vpop.xlane.xlu1 %1848 }
0x11c3   :  { %v1877_v46 = vsub.f32 %v1837_v19, %v1849_v52 }
0x11c4   :  { %v1852_v14 = vpop.xlane.xlu0 %1851 }
0x11c5   :  { %v1887_v16 = vmul.f32 1.442695, %v1877_v46  ;;  %v1878_v56 = vsub.f32 %v1838_v34, %v1852_v14 }
0x11c7   :  { %4568 = vpow2.f32 %v1887_v16  ;;  %v1889_v44 = vmul.f32 1.442695, %v1878_v56 }
0x11c9   :  { %4570 = vpow2.f32 %v1889_v44 }
0x11ca   :  { %v1855_v63 = vpop.xlane.xlu0 %1854 }
0x11cb   :  { %v1879_v1 = vsub.f32 %v1839_v24, %v1855_v63 }
0x11cc   :  { %v1858_v0 = vpop.xlane.xlu1 %1857 }
0x11cd   :  { %v1891_v40 = vmul.f32 1.442695, %v1879_v1  ;;  %v1880_v42 = vsub.f32 %v1840_v20, %v1858_v0 }
0x11cf   :  { %4572 = vpow2.f32 %v1891_v40  ;;  %v1893_v2 = vmul.f32 1.442695, %v1880_v42 }
0x11d1   :  { %v5610_v5 = vpop.eup %4568  ;;  %4574 = vpow2.f32 %v1893_v2 }
0x11d2   :  { %v1861_v60 = vpop.xlane.xlu0 %1860  ;;  %v1907_v19 = vsel %vm547_vm6, %v5610_v5, 0.0 }
0x11d3   :  { %v5614_v7 = vpop.eup %4570  ;;  %v1881_v34 = vsub.f32 %v1841_v28, %v1861_v60  ;;  %1908 = vadd.xlane.f32.xlu0 %v1907_v19 }
0x11d4   :  { %v1864_v52 = vpop.xlane.xlu1 %1863  ;;  %v1910_v24 = vsel %vm547_vm6, %v5614_v7, 0.0 }
0x11d5   :  { %v1895_v46 = vmul.f32 1.442695, %v1881_v34  ;;  %v1882_v14 = vsub.f32 %v1842_v17, %v1864_v52  ;;  %1911 = vadd.xlane.f32.xlu1 %v1910_v24 }
0x11d7   :  { %4576 = vpow2.f32 %v1895_v46  ;;  %v1897_v42 = vmul.f32 1.442695, %v1882_v14 }
0x11d9   :  { %v5618_v20 = vpop.eup %4572  ;;  %4578 = vpow2.f32 %v1897_v42 }
0x11da   :  { %v1867_v16 = vpop.xlane.xlu0 %1866  ;;  %v1913_v56 = vsel %vm547_vm6, %v5618_v20, 0.0 }
0x11db   :  { %v5622_v44 = vpop.eup %4574  ;;  %v1883_v60 = vsub.f32 %v1843_v22, %v1867_v16  ;;  %1914 = vadd.xlane.f32.xlu0 %v1913_v56 }
0x11dc   :  { %v1870_v28 = vpop.xlane.xlu1 %1869  ;;  %v1916_v63 = vsel %vm547_vm6, %v5622_v44, 0.0 }
0x11dd   :  { %v1899_v1 = vmul.f32 1.442695, %v1883_v60  ;;  %v1884_v17 = vsub.f32 %v1844_v49, %v1870_v28  ;;  %1917 = vadd.xlane.f32.xlu1 %v1916_v63 }
0x11df   :  { %4580 = vpow2.f32 %v1899_v1  ;;  %v1901_v0 = vmul.f32 1.442695, %v1884_v17 }
0x11e1   :  { %v5626_v40 = vpop.eup %4576  ;;  %4582 = vpow2.f32 %v1901_v0 }
0x11e2   :  { %v1919_v2 = vsel %vm547_vm6, %v5626_v40, 0.0  ;;  %v1873_v46 = vpop.xlane.xlu0 %1872 }
0x11e3   :  { %v5630_v19 = vpop.eup %4578  ;;  %1920 = vadd.xlane.f32.xlu0 %v1919_v2  ;;  %v1885_v14 = vsub.f32 %v5601_v11, %v1873_v46 }
0x11e4   :  { %v1922_v22 = vsel %vm547_vm6, %v5630_v19, 0.0  ;;  %v1876_v16 = vpop.xlane.xlu1 %1875 }
0x11e5   :  { %1923 = vadd.xlane.f32.xlu1 %v1922_v22  ;;  %v1903_v42 = vmul.f32 1.442695, %v1885_v14  ;;  %v1886_v56 = vsub.f32 %v5606_v6, %v1876_v16 }
0x11e7   :  { %4584 = vpow2.f32 %v1903_v42  ;;  %v1905_v60 = vmul.f32 1.442695, %v1886_v56 }
0x11e9   :  { %v5634_v34 = vpop.eup %4580  ;;  %4586 = vpow2.f32 %v1905_v60 }
0x11ea   :  { %v1925_v49 = vsel %vm547_vm6, %v5634_v34, 0.0 }
0x11eb   :  { %v5638_v52 = vpop.eup %4582  ;;  %1926 = vadd.xlane.f32.xlu1 %v1925_v49  ;;  %v6195_v49 = vmov 0.0  }
0x11ec   :  { %v1928_v24 = vsel %vm547_vm6, %v5638_v52, 0.0 }
0x11ef   :  { %1929 = vadd.xlane.f32.xlu1 %v1928_v24 }
0x11f1   :  { %v5648_v28 = vpop.eup %4584 }
0x11f2   :  { %v1931_v63 = vsel %vm547_vm6, %v5648_v28, 0.0 }
0x11f9   :  { %1962 = vrot.lane.b32.xlu0 %v5434_v62, %s4731_s18  ;;  %v4587_v62 = vpop.eup %4586 }
0x11fa   :  { %v1934_v1 = vsel %vm547_vm6, %v4587_v62, 0.0 }
0x1200   :  { %1964 = vrot.lane.b32.xlu1 %v5424_v54, %s4731_s18 }
0x1218   :  { %1932 = vadd.xlane.f32.xlu0 %v1931_v63 }
0x1224   :  { %1935 = vadd.xlane.f32.xlu1 %v1934_v1 }
0x122e   :  { %2123 = vrot.lane.b32.xlu0 %v5396_v3, %s4725_s13 }
0x1235   :  { %2125 = vrot.lane.b32.xlu1 %v5401_v13, %s4725_s13 }
0x1260   :  { %v1909_v54 = vpop.xlane.xlu0 %1908 }
0x1262   :  { %v1912_v11 = vpop.xlane.xlu1 %1911 }
0x1263   :  { %4588 = vrcp.f32 %v1912_v11 }
0x1264   :  { %4590 = vrcp.f32 %v1909_v54 }
0x1268   :  { %v1915_v6 = vpop.xlane.xlu0 %1914 }
0x126a   :  { %v1918_v17 = vpop.xlane.xlu1 %1917 }
0x126b   :  { %4592 = vrcp.f32 %v1918_v17 }
0x126c   :  { %4594 = vrcp.f32 %v1915_v6 }
0x126d   :  { %v4589_v46 = vpop.eup %4588 }
0x126e   :  { %v4591_v14 = vpop.eup %4590  ;;  %v1940_v13 = vmul.f32 %v4589_v46, %v5614_v7 }
0x126f   :  { %v1938_v16 = vmul.f32 %v4591_v14, %v5610_v5 }
0x1270   :  { %v1921_v0 = vpop.xlane.xlu0 %1920 }
0x1271   :  { %v1957_v60 = vpack.c.bf16 %v1940_v13, %v1938_v16 }
0x1272   :  { %v1924_v2 = vpop.xlane.xlu1 %1923 }
0x1273   :  { %4596 = vrcp.f32 %v1924_v2 }
0x1274   :  { %v1963_v22 = vpop.permute.xlu0 %1962  ;;  %4598 = vrcp.f32 %v1921_v0 }
0x1275   :  { %4206 = vmatpush3.bf16.msra.mxu0 %v1963_v22  ;;  %v4593_v63 = vpop.eup %4592 }
0x1276   :  { %4207 = vmatprep.subr.bf16.mxu0 %v6195_v49  ;;  %v4595_v1 = vpop.eup %4594  ;;  %v1944_v54 = vmul.f32 %v4593_v63, %v5622_v44 }
0x1277   :  { %v1942_v7 = vmul.f32 %v4595_v1, %v5618_v20 }
0x1278   :  { %v1927_v24 = vpop.xlane.xlu1 %1926 }
0x1279   :  { %v1958_v11 = vpack.c.bf16 %v1944_v54, %v1942_v7 }
0x127c   :  { %v1930_v3 = vpop.xlane.xlu1 %1929 }
0x127d   :  { %4600 = vrcp.f32 %v1930_v3  ;;  %v4597_v5 = vpop.eup %4596 }
0x127e   :  { %4602 = vrcp.f32 %v1927_v24  ;;  %v4599_v6 = vpop.eup %4598  ;;  %v1948_v17 = vmul.f32 %v4597_v5, %v5630_v19 }
0x127f   :  { %v1946_v0 = vmul.f32 %v4599_v6, %v5626_v40 }
0x1280   :  { %v1965_v42 = vpop.permute.xlu1 %1964 }
0x1281   :  { %v1983_v56 = vsel %vm563_vm5, %v1965_v42, 0  ;;  %v1959_v2 = vpack.c.bf16 %v1948_v17, %v1946_v0 }
0x1282   :  { %4208 = vmatpush3.bf16.msra.mxu0 %v1983_v56 }
0x1285   :  { %4210 = vmatmul.mubr.msk.bf16.vlgmr.msra.gmra.mrb[76].mxu0 %vm547_vm6, %v1957_v60 }
0x1286   :  { %4213 = vmatprep.mubr.msk.bf16.mxu0 %vm4727_vm4, %v6195_v49 }
0x1287   :  { %v4601_v22 = vpop.eup %4600 }
0x1288   :  { %v4603_v44 = vpop.eup %4602  ;;  %v1952_v20 = vmul.f32 %v4601_v22, %v5638_v52 }
0x1289   :  { %v1950_v24 = vmul.f32 %v4603_v44, %v5634_v34 }
0x128b   :  { %v1960_v46 = vpack.c.bf16 %v1952_v20, %v1950_v24 }
0x128d   :  { %4214 = vmatmul.mubr.msk.bf16.gmra.mrb[80].mxu0 %vm547_vm6, %v1958_v11 }
0x128e   :  { %4217 = vmatprep.mubr.msk.bf16.mxu0 %vm4727_vm4, %v6195_v49 }
0x1295   :  { %4218 = vmatmul.mubr.msk.bf16.gmra.mrb[84].mxu0 %vm547_vm6, %v1959_v2 }
0x1296   :  { %4221 = vmatprep.mubr.msk.bf16.mxu0 %vm4727_vm4, %v6195_v49 }
0x129d   :  { %4222 = vmatmul.mubr.msk.bf16.gmra.mrb[88].mxu0 %vm547_vm6, %v1960_v46 }
0x129e   :  { %4225 = vmatprep.mubr.msk.bf16.mxu0 %vm4727_vm4, %v6195_v49 }
0x12a5   :  { %v1933_v19 = vpop.xlane.xlu0 %1932 }
0x12a6   :  { %4604 = vrcp.f32 %v1933_v19 }
0x12b0   :  { %v4605_v3 = vpop.eup %4604 }
0x12b1   :  { %v1936_v40 = vpop.xlane.xlu1 %1935  ;;  %v1954_v13 = vmul.f32 %v4605_v3, %v5648_v28 }
0x12b2   :  { %4606 = vrcp.f32 %v1936_v40 }
0x12bc   :  { %v4607_v14 = vpop.eup %4606 }
0x12bd   :  { %v1956_v42 = vmul.f32 %v4607_v14, %v4587_v62 }
0x12bf   :  { %v1961_v16 = vpack.c.bf16 %v1956_v42, %v1954_v13 }
0x12c1   :  { %4226 = vmatmul.mubr.msk.bf16.gmra.mrb[92].mxu0 %vm547_vm6, %v1961_v16 }
0x1358   :  { %v2019_v52 = vpop.f32.mrb[76].mxu0 }
0x1359   :  { %v4211_v34 = vpop.f32.mrb[77].mxu0  ;;  %v2058_v60 = vmul.f32 %v5500_v37, %v2019_v52 }
0x135a   :  { %v2022_v56 = vpop.f32.mrb[78].mxu0  ;;  %v2124_v34 = vpop.permute.xlu0 %2123 }
0x135b   :  { %v2059_v63 = vmul.f32 %v5508_v58, %v2022_v56  ;;  %v4212_v1 = vpop.f32.mrb[79].mxu0 }
0x135d   :  { %v2068_v54 = vpack.c.bf16 %v2059_v63, %v2058_v60 }
0x135f   :  { %4229 = vmatprep.subr.bf16.mxu1 %v2068_v54 }
0x1360   :  { %v2027_v7 = vpop.f32.mrb[80].mxu0  ;;  %4230 = vmatpush3.bf16.msra.mxu1 %v2068_v54 }
0x1361   :  { %v4215_v11 = vpop.f32.mrb[81].mxu0  ;;  %v2060_v28 = vmul.f32 %v5520_v23, %v2027_v7 }
0x1362   :  { %v2030_v5 = vpop.f32.mrb[82].mxu0 }
0x1363   :  { %v2061_v62 = vmul.f32 %v5526_v61, %v2030_v5  ;;  %v4216_v6 = vpop.f32.mrb[83].mxu0 }
0x1365   :  { %v2069_v17 = vpack.c.bf16 %v2061_v62, %v2060_v28 }
0x1367   :  { %4231 = vmatprep.subr.bf16.mxu1 %v2069_v17 }
0x1368   :  { %v2035_v0 = vpop.f32.mrb[84].mxu0  ;;  %4232 = vmatpush3.bf16.msra.mxu1 %v2069_v17 }
0x1369   :  { %v4219_v2 = vpop.f32.mrb[85].mxu0  ;;  %v2062_v58 = vmul.f32 %v5533_v38, %v2035_v0 }
0x136a   :  { %v2038_v37 = vpop.f32.mrb[86].mxu0 }
0x136b   :  { %v2063_v22 = vmul.f32 %v5539_v57, %v2038_v37  ;;  %v4220_v44 = vpop.f32.mrb[87].mxu0 }
0x136c   :  { %v4473_v44 = vld [vmem:[%s6188_s2 + $0x50] ss:$12 sps:$4 sm:$0xff]  }
0x136d   :  { %v2070_v20 = vpack.c.bf16 %v2063_v22, %v2062_v58  ;;  %v4468_v58 = vld [vmem:[%s6188_s2 + $0x34] ss:$12 sps:$4 sm:$0xff]   ;;  %v4471_v22 = vld [vmem:[%s6188_s2 + $0x4c] ss:$12 sps:$4 sm:$0xff]  }
0x136f   :  { %4233 = vmatprep.subr.bf16.mxu1 %v2070_v20 }
0x1370   :  { %v2043_v24 = vpop.f32.mrb[88].mxu0  ;;  %4234 = vmatpush3.bf16.msra.mxu1 %v2070_v20 }
0x1371   :  { %v4223_v46 = vpop.f32.mrb[89].mxu0  ;;  %v2064_v61 = vmul.f32 %v5545_v50, %v2043_v24  ;;  %v2126_v50 = vpop.permute.xlu1 %2125 }
0x1372   :  { %v2046_v23 = vpop.f32.mrb[90].mxu0 }
0x1373   :  { %v2065_v19 = vmul.f32 %v5551_v8, %v2046_v23  ;;  %v4224_v40 = vpop.f32.mrb[91].mxu0 }
0x1375   :  { %v2071_v3 = vpack.c.bf16 %v2065_v19, %v2064_v61 }
0x1377   :  { %4235 = vmatprep.subr.bf16.mxu1 %v2071_v3 }
0x1378   :  { %4236 = vmatpush3.bf16.msra.mxu1 %v2071_v3 }
0x1394   :  { %v2051_v14 = vpop.f32.mrb[92].mxu0 }
0x1395   :  { %v4227_v13 = vpop.f32.mrb[93].mxu0  ;;  %v2066_v57 = vmul.f32 %v5557_v29, %v2051_v14 }
0x1396   :  { %v2054_v38 = vpop.f32.mrb[94].mxu0 }
0x1397   :  { %v2067_v42 = vmul.f32 %v5563_v31, %v2054_v38  ;;  %v4228_v16 = vpop.f32.mrb[95].mxu0  ;;  %v6196_v31 = vmov 0  }
0x1399   :  { %v2072_v52 = vpack.c.bf16 %v2067_v42, %v2066_v57  ;;  %v3706_v42 = vld [vmem:[%s6187_s1 + $0x143] ss:$0 sm:$0xff] }
0x139b   :  { %4237 = vmatprep.subr.bf16.mxu1 %v2072_v52 }
0x139c   :  { %4238 = vmatpush3.bf16.msra.mxu1 %v2072_v52 }
0x139d   :  { %4243 = vmatprep.subr.bf16.mxu1 %v2124_v34 }
0x139f   :  { %4240 = vmatmul.mubr.msk.bf16.vlgmr.msra.gmra.mrb[72].mxu1 %vm1005_vm15, %v5300_v43 }
0x13a0   :  { %4244 = vmatpush3.bf16.msra.mxu1 %v2124_v34 }
0x13a1   :  { %4245 = vmatprep.subr.bf16.mxu1 %v2126_v50 }
0x13a4   :  { %4246 = vmatpush3.bf16.msra.mxu1 %v2126_v50 }
0x1472   :  { %v4241_v8 = vpop.f32.mrb[72].mxu1 }
0x1473   :  { %v2107_v56 = vpop.f32.mrb[73].mxu1  ;;  %v2122_v1 = vpack.c.bf16 %v4241_v8, %v4241_v8 }
0x1474   :  { %v4242_v60 = vpop.f32.mrb[74].mxu1 }
0x1475   :  { %v2110_v63 = vpop.f32.mrb[75].mxu1 }
0x1476   :  { %v2121_v29 = vpack.c.bf16 %v2110_v63, %v2107_v56 }
0x1478   :  { %4247 = vmatprep.mubr.msk.bf16.mxu1 %vm277_vm3, %v2121_v29  ;;  %v4474_v29 = vld [vmem:[%s6189_s3 + $0x40] sm:$0xff]  }
0x1479   :  { %4248 = vmatmul.mubr.msk.bf16.vlgmr.msra.gmra.mrb[76].mxu1 %vm277_vm3, %v2122_v1  ;;  %4251 = vmatprep.subr.bf16.mxu0 %v4474_v29  ;;  %v4475_v1 = vld [vmem:[%s6189_s3 + $0x48] sm:$0xff]  }
0x147a   :  { %2281 = vmatprep.mubr.bf16.mxu1 %v6196_v31  ;;  %4252 = vmatpush3.bf16.msra.mxu0 %v4474_v29 }
0x147b   :  { %4253 = vmatprep.subr.bf16.mxu0 %v4475_v1 }
0x147e   :  { %4254 = vmatpush3.bf16.msra.mxu0 %v4475_v1 }
0x154c   :  { %v4249_v54 = vpop.f32.mrb[76].mxu1 }
0x154d   :  { %v2169_v7 = vpop.f32.mrb[77].mxu1  ;;  %v5697_v11 = vadd.f32 %v4249_v54, %v5376_v18  ;;  %v4476_v54 = vld [vmem:[%s6189_s3 + $0x50] sm:$0xff]  }
0x154e   :  { %v5700_v5 = vadd.f32 %v2169_v7, %v5379_v10  ;;  %v4250_v28 = vpop.f32.mrb[78].mxu1  ;;  %4255 = vmatprep.subr.bf16.mxu0 %v4476_v54  ;;  %v4477_v7 = vld [vmem:[%s6189_s3 + $0x58] sm:$0xff]  }
0x154f   :  { %v2172_v62 = vpop.f32.mrb[79].mxu1  ;;  %v2188_v18 = vmul.f32 %v5697_v11, %v5697_v11  ;;  %4256 = vmatpush3.bf16.msra.mxu0 %v4476_v54  ;;  %v4478_v28 = vld [vmem:[%s6189_s3 + $0x60] sm:$0xff]  }
0x1550   :  { %v5703_v6 = vadd.f32 %v2172_v62, %v5384_v55  ;;  %v2186_v17 = vmul.f32 %v5700_v5, %v5700_v5  ;;  %v4470_v55 = vld [vmem:[%s6188_s2 + $0x38] ss:$12 sps:$4 sm:$0xff]   ;;  %4257 = vmatprep.subr.bf16.mxu0 %v4477_v7  ;;  %v4479_v62 = vld [vmem:[%s6189_s3 + $0x68] sm:$0xff]  }
0x1551   :  { %v2195_v37 = vsel %vm284_vm2, %v2188_v18, 0.0  ;;  %2249 = vmatprep.subr.bf16.mxu1 %v4470_v55 }
0x1552   :  { %v2189_v0 = vsel %vm277_vm3, %v2186_v17, 0.0  ;;  %v2187_v2 = vmul.f32 %v5703_v6, %v5703_v6  ;;  %2250 = vmatpush1.bf16.msra.mxu1 %v4468_v58  ;;  %v4480_v17 = vld [vmem:[%s6189_s3 + $0x70] sm:$0xff]  }
0x1553   :  { %2190 = vadd.xlane.f32.xlu0 %v2189_v0  ;;  %2251 = vmatprep.subr.bf16.mxu1 %v4473_v44  ;;  %v4481_v0 = vld [vmem:[%s6189_s3 + $0x78] sm:$0xff]  }
0x1554   :  { %v2192_v10 = vsel %vm277_vm3, %v2187_v2, 0.0  ;;  %4258 = vmatpush3.bf16.msra.mxu0 %v4477_v7 }
0x1555   :  { %2193 = vadd.xlane.f32.xlu1 %v2192_v10  ;;  %4259 = vmatprep.subr.bf16.mxu0 %v4478_v28 }
0x1556   :  { %2252 = vmatpush1.bf16.msra.mxu1 %v4471_v22 }
0x1557   :  { %2196 = vadd.xlane.f32.xlu0 %v2195_v37 }
0x1558   :  { %4260 = vmatpush3.bf16.msra.mxu0 %v4478_v28 }
0x1559   :  { %4261 = vmatprep.subr.bf16.mxu0 %v4479_v62 }
0x155c   :  { %4262 = vmatpush3.bf16.msra.mxu0 %v4479_v62 }
0x155d   :  { %4263 = vmatprep.subr.bf16.mxu0 %v4480_v17 }
0x1560   :  { %4264 = vmatpush3.bf16.msra.mxu0 %v4480_v17 }
0x1561   :  { %4265 = vmatprep.subr.bf16.mxu0 %v4481_v0 }
0x1564   :  { %4266 = vmatpush3.bf16.msra.mxu0 %v4481_v0 }
0x1565   :  { %4279 = vmatprep.subr.bf16.mxu0 %v4807_v27 }
0x15e0   :  { %v2191_v20 = vpop.xlane.xlu0 %2190 }
0x15e1   :  { %v2198_v24 = vmul.f32 0.03125, %v2191_v20 }
0x15e2   :  { %v2194_v46 = vpop.xlane.xlu1 %2193 }
0x15e3   :  { %v2201_v23 = vadd.f32 1e-06, %v2198_v24  ;;  %v2199_v61 = vmul.f32 0.03125, %v2194_v46 }
0x15e4   :  { %v2197_v19 = vpop.xlane.xlu0 %2196 }
0x15e5   :  { %4608 = vrsqrt.f32 %v2201_v23  ;;  %v2202_v40 = vadd.f32 1e-06, %v2199_v61  ;;  %v2200_v3 = vmul.f32 0.03125, %v2197_v19 }
0x15e7   :  { %4610 = vrsqrt.f32 %v2202_v40  ;;  %v2203_v14 = vadd.f32 1e-06, %v2200_v3 }
0x15e9   :  { %4612 = vrsqrt.f32 %v2203_v14 }
0x15ef   :  { %v4609_v13 = vpop.eup %4608 }
0x15f0   :  { %v2207_v38 = vmul.f32 %v4609_v13, %v5700_v5 }
0x15f1   :  { %v4611_v57 = vpop.eup %4610 }
0x15f2   :  { %v2208_v16 = vmul.f32 %v4611_v57, %v5703_v6  ;;  %v2214_v34 = vmul.f32 %v3706_v42, %v2207_v38 }
0x15f3   :  { %v4613_v52 = vpop.eup %4612 }
0x15f4   :  { %v2215_v50 = vmul.f32 %v3706_v42, %v2208_v16  ;;  %v2209_v56 = vmul.f32 %v4613_v52, %v5697_v11 }
0x15f6   :  { %v2221_v8 = vpack.c.bf16 %v2215_v50, %v2214_v34  ;;  %v2216_v60 = vmul.f32 %v3706_v42, %v2209_v56 }
0x15f8   :  { %3715 = vmatmul.mubr.msk.bf16.vlgmr.msra.gmra.mrb[80].mxu1 %vm277_vm3, %v2221_v8  ;;  %v2222_v63 = vpack.c.bf16 %v2216_v60, %v2216_v60 }
0x15f9   :  { %2291 = vmatprep.mubr.bf16.mxu1 %v6196_v31 }
0x1600   :  { %3716 = vmatmul.mubr.msk.bf16.gmra.mrb[84].mxu1 %vm277_vm3, %v2222_v63 }
0x16cb   :  { %v2283_v2 = vpop.f32.mrb[80].mxu1 }
0x16cc   :  { %v3717_v18 = vmul.f32 -1.442695, %v2283_v2  ;;  %v2285_v10 = vpop.f32.mrb[81].mxu1 }
0x16cd   :  { %v2287_v37 = vpop.f32.mrb[82].mxu1 }
0x16ce   :  { %4614 = vpow2.f32 %v3717_v18  ;;  %v3718_v55 = vmul.f32 -1.442695, %v2287_v37  ;;  %v2289_v58 = vpop.f32.mrb[83].mxu1 }
0x16d0   :  { %4616 = vpow2.f32 %v3718_v55 }
0x16d3   :  { %v2293_v22 = vpop.f32.mrb[84].mxu1 }
0x16d4   :  { %v3719_v44 = vmul.f32 -1.442695, %v2293_v22  ;;  %v2295_v20 = vpop.f32.mrb[85].mxu1 }
0x16d5   :  { %v2297_v24 = vpop.f32.mrb[86].mxu1 }
0x16d6   :  { %4618 = vpow2.f32 %v3719_v44  ;;  %v2298_v46 = vpop.f32.mrb[87].mxu1 }
0x16d8   :  { %v4615_v23 = vpop.eup %4614 }
0x16d9   :  { %v2309_v61 = vadd.f32 1.0, %v4615_v23 }
0x16da   :  { %v4617_v19 = vpop.eup %4616 }
0x16db   :  { %4620 = vrcp.f32 %v2309_v61  ;;  %v2310_v40 = vadd.f32 1.0, %v4617_v19 }
0x16dd   :  { %4622 = vrcp.f32 %v2310_v40 }
0x16e0   :  { %v4619_v3 = vpop.eup %4618 }
0x16e1   :  { %v2311_v14 = vadd.f32 1.0, %v4619_v3  ;;  %v3744_v3 = vld [vmem:[%s6187_s1 + $0x144] ss:$0 sm:$0xff] }
0x16e3   :  { %4624 = vrcp.f32 %v2311_v14 }
0x16e5   :  { %v4621_v13 = vpop.eup %4620 }
0x16e6   :  { %v2318_v38 = vmul.f32 %v4621_v13, %v2283_v2 }
0x16e7   :  { %v4623_v57 = vpop.eup %4622 }
0x16e8   :  { %v2321_v42 = vmul.f32 %v2318_v38, %v2285_v10  ;;  %v2319_v16 = vmul.f32 %v4623_v57, %v2287_v37  ;;  %v5790_v10 = vld [vmem:[%s6188_s2 + $0x78] ss:$12 sps:$4 sm:$0xff]  }
0x16ea   :  { %v2322_v52 = vmul.f32 %v2319_v16, %v2289_v58 }
0x16ec   :  { %v2341_v34 = vpack.c.bf16 %v2322_v52, %v2321_v42 }
0x16ed   :  { %v4625_v50 = vpop.eup %4624 }
0x16ee   :  { %v2320_v8 = vmul.f32 %v4625_v50, %v2293_v22  ;;  %4267 = vmatprep.mubr.bf16.mxu0 %v2341_v34 }
0x16f0   :  { %v2323_v56 = vmul.f32 %v2320_v8, %v2295_v20 }
0x16f2   :  { %v2342_v60 = vpack.c.bf16 %v2323_v56, %v2323_v56 }
0x16f4   :  { %4268 = vmatmul.mubr.bf16.vlgmr.msra.gmra.mrb[96].mxu0 %v2342_v60 }
0x16f5   :  { %4280 = vmatpush3.bf16.msra.mxu0 %v4807_v27 }
0x16f6   :  { %4281 = vmatprep.subr.bf16.mxu0 %v4827_v51 }
0x16f9   :  { %4282 = vmatpush3.bf16.msra.mxu0 %v4827_v51 }
0x16fa   :  { %4295 = vmatprep.subr.bf16.mxu0 %v6195_v49 }
0x17c7   :  { %v4269_v63 = vpop.f32.mrb[96].mxu0 }
0x17c8   :  { %v5765_v29 = vadd.f32 %v4269_v63, %v5697_v11  ;;  %v2425_v1 = vpop.f32.mrb[97].mxu0 }
0x17c9   :  { %v5768_v54 = vadd.f32 %v2425_v1, %v5700_v5  ;;  %v4270_v7 = vpop.f32.mrb[98].mxu0 }
0x17ca   :  { %v2428_v28 = vpop.f32.mrb[99].mxu0  ;;  %v2446_v62 = vmul.f32 %v5765_v29, %v5765_v29 }
0x17cb   :  { %v5773_v17 = vadd.f32 %v2428_v28, %v5703_v6  ;;  %v2444_v0 = vmul.f32 %v5768_v54, %v5768_v54  ;;  %v5785_v6 = vld [vmem:[%s6188_s2 + $0x60] ss:$12 sps:$4 sm:$0xff]   ;;  %v4708_v28 = vld [vmem:[%s6187_s1 + $0x10] sm:$0xf] }
0x17cc   :  { %v2453_v2 = vsel %vm284_vm2, %v2446_v62, 0.0  ;;  %4271 = vmatprep.subr.bf16.mxu1 %v5785_v6 }
0x17cd   :  { %2454 = vadd.xlane.f32.xlu1 %v2453_v2  ;;  %v2447_v11 = vsel %vm277_vm3, %v2444_v0, 0.0  ;;  %v2445_v5 = vmul.f32 %v5773_v17, %v5773_v17  ;;  %4272 = vmatpush3.bf16.msra.mxu1 %v5785_v6  ;;  %v4709_v0 = vld [vmem:[%s6187_s1 + $0x28] sm:$0xf] }
0x17ce   :  { %2448 = vadd.xlane.f32.xlu0 %v2447_v11  ;;  %4273 = vmatprep.subr.bf16.mxu1 %v5790_v10 }
0x17cf   :  { %v2450_v18 = vsel %vm277_vm3, %v2445_v5, 0.0  ;;  %v4710_v5 = vld [vmem:[%s6187_s1] sm:$0xff] }
0x17d1   :  { %4274 = vmatpush3.bf16.msra.mxu1 %v5790_v10 }
0x17d2   :  { %2451 = vadd.xlane.f32.xlu0 %v2450_v18  ;;  %4287 = vmatprep.subr.bf16.mxu1 %v4807_v27 }
0x185a   :  { %v2455_v37 = vpop.xlane.xlu1 %2454 }
0x185b   :  { %v2458_v55 = vmul.f32 0.03125, %v2455_v37  ;;  %v2449_v58 = vpop.xlane.xlu0 %2448  ;;  %v4711_v37 = vld [vmem:[%s6187_s1 + $0x18] sm:$0xff] }
0x185c   :  { %v2456_v22 = vmul.f32 0.03125, %v2449_v58 }
0x185d   :  { %v2461_v44 = vadd.f32 1e-06, %v2458_v55 }
0x185e   :  { %v2459_v20 = vadd.f32 1e-06, %v2456_v22 }
0x185f   :  { %4626 = vrsqrt.f32 %v2461_v44  ;;  %v2452_v24 = vpop.xlane.xlu0 %2451 }
0x1860   :  { %4628 = vrsqrt.f32 %v2459_v20  ;;  %v2457_v46 = vmul.f32 0.03125, %v2452_v24  ;;  %v4712_v20 = vld [vmem:[%s6187_s1 + $0x8] sm:$0xff] }
0x1862   :  { %v2460_v23 = vadd.f32 1e-06, %v2457_v46 }
0x1864   :  { %4630 = vrsqrt.f32 %v2460_v23  ;;  %v4713_v23 = vld [vmem:[%s6187_s1 + $0x20] sm:$0xff] }
0x1869   :  { %v4627_v61 = vpop.eup %4626 }
0x186a   :  { %v4629_v19 = vpop.eup %4628  ;;  %v2467_v40 = vmul.f32 %v4627_v61, %v5765_v29 }
0x186b   :  { %v2465_v14 = vmul.f32 %v4629_v19, %v5768_v54 }
0x186c   :  { %v2474_v57 = vmul.f32 %v3744_v3, %v2467_v40 }
0x186d   :  { %v2472_v42 = vmul.f32 %v3744_v3, %v2465_v14 }
0x186e   :  { %v4631_v13 = vpop.eup %4630  ;;  %v2481_v34 = vpack.c.bf16 %v2474_v57, %v2474_v57 }
0x186f   :  { %v2466_v38 = vmul.f32 %v4631_v13, %v5773_v17 }
0x1871   :  { %v2473_v16 = vmul.f32 %v3744_v3, %v2466_v38 }
0x1873   :  { %v2480_v52 = vpack.c.bf16 %v2473_v16, %v2472_v42 }
0x1875   :  { %4275 = vmatprep.mubr.msk.bf16.mxu1 %vm277_vm3, %v2480_v52 }
0x1876   :  { %4276 = vmatmul.mubr.msk.bf16.vlgmr.msra.gmra.mrb[88].mxu1 %vm277_vm3, %v2481_v34 }
0x1877   :  { %4288 = vmatpush3.bf16.msra.mxu1 %v4807_v27 }
0x1878   :  { %4289 = vmatprep.subr.bf16.mxu1 %v4827_v51 }
0x187b   :  { %4290 = vmatpush3.bf16.msra.mxu1 %v4827_v51 }
0x187c   :  { %4319 = vmatprep.subr.bf16.mxu1 %v6195_v49 }
0x1949   :  { %v5809_v50 = vpop.f32.mrb[88].mxu1 }
0x194a   :  { %v5813_v8 = vpack.c.bf16 %v5809_v50, %v5809_v50  ;;  %v5815_v56 = vpop.f32.mrb[89].mxu1  ;;  %v2550_v62 = vmul.f32 %v4708_v28, %v5809_v50 }
0x194b   :  { %v4278_v60 = vpop.f32.mrb[90].mxu1  ;;  %v2548_v18 = vmul.f32 %v4710_v5, %v5815_v56  ;;  %v2613_v28 = vmul.f32 %v5815_v56, %v4953_v47 }
0x194c   :  { %2620 = vrot.lane.b32.xlu1 %v5813_v8, %s4724_s23  ;;  %v5819_v63 = vpop.f32.mrb[91].mxu1  ;;  %v5895_v60 = vld [vmem:[%s6187_s1 + $0x58] sm:$0xff] }
0x194d   :  { %v5823_v27 = vpack.c.bf16 %v5819_v63, %v5815_v56  ;;  %v2549_v24 = vmul.f32 %v4712_v20, %v5819_v63 }
0x194f   :  { %2618 = vrot.lane.b32.xlu0 %v5823_v27, %s4724_s23  ;;  %4283 = vmatprep.mubr.msk.bf16.mxu0 %vm277_vm3, %v5823_v27 }
0x1950   :  { %4284 = vmatmul.mubr.msk.bf16.vlgmr.msra.gmra.mrb[100].mxu0 %vm277_vm3, %v5813_v8 }
0x1951   :  { %4299 = vmatprep.mubr.msk.bf16.mxu0 %vm4727_vm4, %v6195_v49 }
0x19be   :  { %v2621_v1 = vpop.permute.xlu1 %2620 }
0x19c1   :  { %v2619_v51 = vpop.permute.xlu0 %2618 }
0x19c2   :  { %4291 = vmatprep.mubr.msk.bf16.mxu1 %vm277_vm3, %v2619_v51 }
0x19c3   :  { %4292 = vmatmul.mubr.msk.bf16.vlgmr.msra.gmra.mrb[92].mxu1 %vm277_vm3, %v2621_v1 }
0x19c4   :  { %4323 = vmatprep.mubr.msk.bf16.mxu1 %vm4727_vm4, %v6195_v49 }
0x1a23   :  { %v4285_v7 = vpop.f32.mrb[100].mxu0 }
0x1a24   :  { %v2609_v2 = vmul.f32 %v4709_v0, %v4285_v7  ;;  %v2593_v11 = vpop.f32.mrb[101].mxu0 }
0x1a25   :  { %v2607_v55 = vmul.f32 %v4711_v37, %v2593_v11  ;;  %v4286_v58 = vpop.f32.mrb[102].mxu0 }
0x1a26   :  { %v2612_v22 = vadd.f32 %v2609_v2, %v2550_v62  ;;  %v2596_v44 = vpop.f32.mrb[103].mxu0  ;;  %v2614_v62 = vmul.f32 %v5819_v63, %v4955_v48  ;;  %v5908_v58 = vld [vmem:[%s6187_s1 + $0x60] sm:$0xff] }
0x1a27   :  { %v2610_v46 = vadd.f32 %v2607_v55, %v2548_v18  ;;  %v2608_v61 = vmul.f32 %v4713_v23, %v2596_v44  ;;  %v2615_v18 = vmul.f32 %v5809_v50, %v4982_v53  ;;  %v5914_v44 = vld [vmem:[%s6187_s1 + $0x68] sm:$0xff] }
0x1a28   :  { %v2695_v3 = vpack.c.bf16 %v2612_v22, %v2612_v22 }
0x1a29   :  { %v2611_v19 = vadd.f32 %v2608_v61, %v2549_v24 }
0x1a2a   :  { %v2697_v14 = vsel %vm563_vm5, %v2695_v3, 0  ;;  %v5928_v3 = vld [vmem:[%s6187_s1 + $0x78] sm:$0xff] }
0x1a2b   :  { %v2694_v40 = vpack.c.bf16 %v2611_v19, %v2610_v46 }
0x1a2d   :  { %4296 = vmatpush3.bf16.msra.mxu0 %v2694_v40 }
0x1a2e   :  { %4297 = vmatprep.subr.bf16.mxu0 %v6195_v49 }
0x1a31   :  { %4298 = vmatpush3.bf16.msra.mxu0 %v2697_v14 }
0x1a32   :  { %4343 = vmatprep.subr.bf16.mxu0 %v6195_v49 }
0x1a34   :  { %4300 = vmatmul.mubr.msk.bf16.vlgmr.msra.gmra.mrb[104].mxu0 %vm547_vm6, %v4894_v26 }
0x1a35   :  { %4303 = vmatprep.mubr.msk.bf16.mxu0 %vm4727_vm4, %v6195_v49 }
0x1a3c   :  { %4304 = vmatmul.mubr.msk.bf16.gmra.mrb[108].mxu0 %vm547_vm6, %v4907_v30 }
0x1a3d   :  { %4307 = vmatprep.mubr.msk.bf16.mxu0 %vm4727_vm4, %v6195_v49 }
0x1a44   :  { %4308 = vmatmul.mubr.msk.bf16.gmra.mrb[112].mxu0 %vm547_vm6, %v4919_v33 }
0x1a45   :  { %4311 = vmatprep.mubr.msk.bf16.mxu0 %vm4727_vm4, %v6195_v49 }
0x1a4c   :  { %4312 = vmatmul.mubr.msk.bf16.gmra.mrb[116].mxu0 %vm547_vm6, %v4931_v36 }
0x1a4d   :  { %4315 = vmatprep.mubr.msk.bf16.mxu0 %vm4727_vm4, %v6195_v49 }
0x1a54   :  { %4316 = vmatmul.mubr.msk.bf16.gmra.mrb[120].mxu0 %vm547_vm6, %v4943_v39  ;;  %v5887_v39 = vld [vmem:[%s6187_s1 + $0x50] sm:$0xff] }
0x1a55   :  { %4347 = vmatprep.mubr.msk.bf16.mxu0 %vm4727_vm4, %v6195_v49 }
0x1a96   :  { %v4293_v26 = vpop.f32.mrb[92].mxu1 }
0x1a97   :  { %v2662_v30 = vpop.f32.mrb[93].mxu1  ;;  %v2678_v42 = vmul.f32 %v4709_v0, %v4293_v26 }
0x1a98   :  { %v2676_v13 = vmul.f32 %v4711_v37, %v2662_v30  ;;  %v4294_v38 = vpop.f32.mrb[94].mxu1 }
0x1a99   :  { %v2665_v33 = vpop.f32.mrb[95].mxu1  ;;  %v5934_v38 = vld [vmem:[%s6187_s1 + $0x80] sm:$0xff] }
0x1a9a   :  { %v2677_v57 = vmul.f32 %v4713_v23, %v2665_v33  ;;  %2682 = vrot.lane.b32.xlu1 %v2676_v13, %s4725_s13  ;;  %v5922_v23 = vld [vmem:[%s6187_s1 + $0x70] sm:$0xff] }
0x1a9c   :  { %2684 = vrot.lane.b32.xlu0 %v2677_v57, %s4725_s13 }
0x1a9e   :  { %2686 = vrot.lane.b32.xlu1 %v2678_v42, %s4725_s13 }
0x1b07   :  { %v2733_v36 = vpop.f32.mrb[104].mxu0 }
0x1b08   :  { %v5890_v16 = vmul.f32 %v5887_v39, %v2733_v36  ;;  %v4301_v52 = vpop.f32.mrb[105].mxu0  ;;  %v5940_v36 = vld [vmem:[%s6187_s1 + $0x88] sm:$0xff] }
0x1b09   :  { %v2736_v34 = vpop.f32.mrb[106].mxu0 }
0x1b0a   :  { %v2773_v51 = vmul.f32 %v5895_v60, %v2736_v34  ;;  %v4302_v1 = vpop.f32.mrb[107].mxu0 }
0x1b0b   :  { %v5946_v1 = vld [vmem:[%s6187_s1 + $0x90] sm:$0xff] }
0x1b0c   :  { %v2683_v7 = vpop.permute.xlu1 %2682  ;;  %v2782_v0 = vpack.c.bf16 %v2773_v51, %v5890_v16 }
0x1b0d   :  { %v2691_v11 = vadd.f32 %v2683_v7, %v2613_v28 }
0x1b0e   :  { %v2685_v2 = vpop.permute.xlu0 %2684 }
0x1b0f   :  { %v2692_v5 = vadd.f32 %v2685_v2, %v2614_v62  ;;  %v2741_v37 = vpop.f32.mrb[108].mxu0  ;;  %v5952_v2 = vld [vmem:[%s6187_s1 + $0x98] sm:$0xff] }
0x1b10   :  { %v2687_v55 = vpop.permute.xlu1 %2686  ;;  %v2774_v47 = vmul.f32 %v5908_v58, %v2741_v37  ;;  %v4305_v56 = vpop.f32.mrb[109].mxu0 }
0x1b11   :  { %v2787_v22 = vpack.c.bf16 %v2692_v5, %v2691_v11  ;;  %v2693_v48 = vadd.f32 %v2687_v55, %v2615_v18  ;;  %v2744_v63 = vpop.f32.mrb[110].mxu0 }
0x1b12   :  { %v2775_v53 = vmul.f32 %v5914_v44, %v2744_v63  ;;  %v4306_v50 = vpop.f32.mrb[111].mxu0 }
0x1b13   :  { %v2788_v20 = vpack.c.bf16 %v2693_v48, %v2693_v48  ;;  %2791 = vrot.lane.b32.xlu0 %v2787_v22, %s4724_s23 }
0x1b14   :  { %v2783_v24 = vpack.c.bf16 %v2775_v53, %v2774_v47 }
0x1b15   :  { %2793 = vrot.lane.b32.xlu1 %v2788_v20, %s4724_s23 }
0x1b17   :  { %v2749_v46 = vpop.f32.mrb[112].mxu0 }
0x1b18   :  { %v2776_v61 = vmul.f32 %v5922_v23, %v2749_v46  ;;  %v4309_v19 = vpop.f32.mrb[113].mxu0 }
0x1b19   :  { %v2752_v40 = vpop.f32.mrb[114].mxu0 }
0x1b1a   :  { %v2777_v14 = vmul.f32 %v5928_v3, %v2752_v40  ;;  %v4310_v26 = vpop.f32.mrb[115].mxu0 }
0x1b1c   :  { %v2784_v30 = vpack.c.bf16 %v2777_v14, %v2776_v61 }
0x1b1f   :  { %v2757_v13 = vpop.f32.mrb[116].mxu0 }
0x1b20   :  { %v2778_v33 = vmul.f32 %v5934_v38, %v2757_v13  ;;  %v4313_v57 = vpop.f32.mrb[117].mxu0 }
0x1b21   :  { %v2760_v42 = vpop.f32.mrb[118].mxu0 }
0x1b22   :  { %v2779_v16 = vmul.f32 %v5940_v36, %v2760_v42  ;;  %v4314_v52 = vpop.f32.mrb[119].mxu0 }
0x1b24   :  { %v2785_v34 = vpack.c.bf16 %v2779_v16, %v2778_v33 }
0x1b27   :  { %v2765_v51 = vpop.f32.mrb[120].mxu0 }
0x1b28   :  { %v2780_v7 = vmul.f32 %v5946_v1, %v2765_v51  ;;  %v4317_v28 = vpop.f32.mrb[121].mxu0 }
0x1b29   :  { %v2768_v62 = vpop.f32.mrb[122].mxu0 }
0x1b2a   :  { %v2781_v11 = vmul.f32 %v5952_v2, %v2768_v62  ;;  %v4318_v5 = vpop.f32.mrb[123].mxu0 }
0x1b2c   :  { %v2786_v18 = vpack.c.bf16 %v2781_v11, %v2780_v7 }
0x1b85   :  { %v2792_v37 = vpop.permute.xlu0 %2791 }
0x1b86   :  { %v2811_v55 = vsel %vm277_vm3, %v2792_v37, 0 }
0x1b87   :  { %4320 = vmatpush3.bf16.xpose.msra.mxu1 %v2811_v55  ;;  %v2794_v47 = vpop.permute.xlu1 %2793 }
0x1b88   :  { %4321 = vmatprep.subr.bf16.mxu1 %v6195_v49  ;;  %v2814_v56 = vsel %vm277_vm3, %v2794_v47, 0 }
0x1b8f   :  { %4322 = vmatpush3.bf16.xpose.msra.mxu1 %v2814_v56 }
0x1b96   :  { %4324 = vmatmul.mubr.msk.bf16.vlgmr.msra.gmra.mrb[96].mxu1 %vm277_vm3, %v2782_v0 }
0x1b97   :  { %4327 = vmatprep.mubr.msk.bf16.mxu1 %vm4727_vm4, %v6195_v49 }
0x1b9e   :  { %4328 = vmatmul.mubr.msk.bf16.gmra.mrb[100].mxu1 %vm277_vm3, %v2783_v24 }
0x1b9f   :  { %4331 = vmatprep.mubr.msk.bf16.mxu1 %vm4727_vm4, %v6195_v49 }
0x1ba6   :  { %4332 = vmatmul.mubr.msk.bf16.gmra.mrb[104].mxu1 %vm277_vm3, %v2784_v30 }
0x1ba7   :  { %4335 = vmatprep.mubr.msk.bf16.mxu1 %vm4727_vm4, %v6195_v49 }
0x1bae   :  { %4336 = vmatmul.mubr.msk.bf16.gmra.mrb[108].mxu1 %vm277_vm3, %v2785_v34 }
0x1baf   :  { %4339 = vmatprep.mubr.msk.bf16.mxu1 %vm4727_vm4, %v6195_v49 }
0x1bb6   :  { %4340 = vmatmul.mubr.msk.bf16.gmra.mrb[112].mxu1 %vm277_vm3, %v2786_v18 }
0x1bb7   :  { %4377 = vmatprep.mubr.msk.bf16.mxu1 %vm1005_vm15, %v5283_v4 }
0x1c69   :  { %v2850_v0 = vpop.f32.mrb[96].mxu1 }
0x1c6a   :  { %v2889_v22 = vmul.f32 0.35355338, %v2850_v0  ;;  %v4325_v48 = vpop.f32.mrb[97].mxu1 }
0x1c6b   :  { %v2853_v63 = vpop.f32.mrb[98].mxu1 }
0x1c6c   :  { %v2890_v53 = vmul.f32 0.35355338, %v2853_v63  ;;  %v4326_v50 = vpop.f32.mrb[99].mxu1  ;;  %v2899_v20 = vadd.f32 %v2889_v22, %v5111_v41 }
0x1c6e   :  { %v2900_v24 = vadd.f32 %v2890_v53, %v5118_v59  ;;  %v2909_v46 = vsel %vm547_vm6, %v2899_v20, -inf }
0x1c6f   :  { %2910 = vmax.xlane.f32.xlu0 %v2909_v46 }
0x1c70   :  { %v2912_v61 = vsel %vm547_vm6, %v2900_v24, -inf }
0x1c71   :  { %2913 = vmax.xlane.f32.xlu1 %v2912_v61  ;;  %v2858_v19 = vpop.f32.mrb[100].mxu1 }
0x1c72   :  { %v2891_v40 = vmul.f32 0.35355338, %v2858_v19  ;;  %v4329_v14 = vpop.f32.mrb[101].mxu1 }
0x1c73   :  { %v2861_v4 = vpop.f32.mrb[102].mxu1 }
0x1c74   :  { %v2901_v26 = vadd.f32 %v2891_v40, %v5131_v12  ;;  %v2892_v30 = vmul.f32 0.35355338, %v2861_v4  ;;  %v4330_v13 = vpop.f32.mrb[103].mxu1 }
0x1c76   :  { %v2902_v33 = vadd.f32 %v2892_v30, %v5137_v9  ;;  %v2915_v41 = vsel %vm547_vm6, %v2901_v26, -inf }
0x1c77   :  { %2916 = vmax.xlane.f32.xlu0 %v2915_v41 }
0x1c78   :  { %v2918_v16 = vsel %vm547_vm6, %v2902_v33, -inf }
0x1c79   :  { %v2866_v59 = vpop.f32.mrb[104].mxu1 }
0x1c7a   :  { %v2893_v57 = vmul.f32 0.35355338, %v2866_v59  ;;  %v4333_v42 = vpop.f32.mrb[105].mxu1 }
0x1c7b   :  { %2919 = vmax.xlane.f32.xlu0 %v2918_v16  ;;  %v2869_v52 = vpop.f32.mrb[106].mxu1 }
0x1c7c   :  { %v2903_v34 = vadd.f32 %v2893_v57, %v5151_v35  ;;  %v2894_v51 = vmul.f32 0.35355338, %v2869_v52  ;;  %v4334_v7 = vpop.f32.mrb[107].mxu1 }
0x1c7e   :  { %v2904_v12 = vadd.f32 %v2894_v51, %v5157_v45  ;;  %v2921_v28 = vsel %vm547_vm6, %v2903_v34, -inf }
0x1c7f   :  { %2922 = vmax.xlane.f32.xlu1 %v2921_v28 }
0x1c80   :  { %v2924_v9 = vsel %vm547_vm6, %v2904_v12, -inf }
0x1c81   :  { %2925 = vmax.xlane.f32.xlu0 %v2924_v9  ;;  %v2874_v62 = vpop.f32.mrb[108].mxu1 }
0x1c82   :  { %v2895_v11 = vmul.f32 0.35355338, %v2874_v62  ;;  %v4337_v5 = vpop.f32.mrb[109].mxu1 }
0x1c83   :  { %v2877_v18 = vpop.f32.mrb[110].mxu1 }
0x1c84   :  { %v2905_v37 = vadd.f32 %v2895_v11, %v5172_v15  ;;  %v2896_v55 = vmul.f32 0.35355338, %v2877_v18  ;;  %v4338_v47 = vpop.f32.mrb[111].mxu1 }
0x1c86   :  { %v2906_v35 = vadd.f32 %v2896_v55, %v5177_v32  ;;  %v2927_v56 = vsel %vm547_vm6, %v2905_v37, -inf }
0x1c87   :  { %2928 = vmax.xlane.f32.xlu1 %v2927_v56 }
0x1c88   :  { %v2930_v45 = vsel %vm547_vm6, %v2906_v35, -inf }
0x1c89   :  { %2931 = vmax.xlane.f32.xlu0 %v2930_v45  ;;  %v2882_v0 = vpop.f32.mrb[112].mxu1 }
0x1c8a   :  { %v2897_v22 = vmul.f32 0.35355338, %v2882_v0  ;;  %v4341_v48 = vpop.f32.mrb[113].mxu1 }
0x1c8b   :  { %v2885_v63 = vpop.f32.mrb[114].mxu1 }
0x1c8c   :  { %v5990_v53 = vadd.f32 %v2897_v22, %v5185_v21  ;;  %v2898_v50 = vmul.f32 0.35355338, %v2885_v63  ;;  %v4342_v46 = vpop.f32.mrb[115].mxu1 }
0x1c8e   :  { %v5993_v15 = vadd.f32 %v2898_v50, %v5191_v25  ;;  %v2933_v32 = vsel %vm547_vm6, %v5990_v53, -inf }
0x1c8f   :  { %2934 = vmax.xlane.f32.xlu1 %v2933_v32 }
0x1c90   :  { %v2936_v61 = vsel %vm547_vm6, %v5993_v15, -inf }
0x1c91   :  { %2937 = vmax.xlane.f32.xlu0 %v2936_v61 }
0x1cfc   :  { %v2911_v19 = vpop.xlane.xlu0 %2910 }
0x1cfd   :  { %v2939_v40 = vsub.f32 %v2899_v20, %v2911_v19 }
0x1cfe   :  { %v2914_v14 = vpop.xlane.xlu1 %2913 }
0x1cff   :  { %v2949_v4 = vmul.f32 1.442695, %v2939_v40  ;;  %v2940_v30 = vsub.f32 %v2900_v24, %v2914_v14 }
0x1d01   :  { %4632 = vpow2.f32 %v2949_v4  ;;  %v2951_v21 = vmul.f32 1.442695, %v2940_v30 }
0x1d03   :  { %4634 = vpow2.f32 %v2951_v21 }
0x1d04   :  { %v2917_v13 = vpop.xlane.xlu0 %2916 }
0x1d05   :  { %v2941_v41 = vsub.f32 %v2901_v26, %v2917_v13 }
0x1d07   :  { %v2953_v25 = vmul.f32 1.442695, %v2941_v41 }
0x1d08   :  { %v2920_v59 = vpop.xlane.xlu0 %2919 }
0x1d09   :  { %4636 = vpow2.f32 %v2953_v25  ;;  %v2942_v57 = vsub.f32 %v2902_v33, %v2920_v59 }
0x1d0b   :  { %v5999_v42 = vpop.eup %4632  ;;  %v2955_v16 = vmul.f32 1.442695, %v2942_v57 }
0x1d0c   :  { %v2923_v52 = vpop.xlane.xlu1 %2922  ;;  %v2969_v51 = vsel %vm547_vm6, %v5999_v42, 0.0 }
0x1d0d   :  { %v6003_v20 = vpop.eup %4634  ;;  %4638 = vpow2.f32 %v2955_v16  ;;  %v2943_v24 = vsub.f32 %v2903_v34, %v2923_v52  ;;  %2970 = vadd.xlane.f32.xlu1 %v2969_v51 }
0x1d0e   :  { %v2926_v7 = vpop.xlane.xlu0 %2925  ;;  %v2972_v26 = vsel %vm547_vm6, %v6003_v20, 0.0 }
0x1d0f   :  { %v2957_v28 = vmul.f32 1.442695, %v2943_v24  ;;  %v2944_v9 = vsub.f32 %v2904_v12, %v2926_v7  ;;  %2973 = vadd.xlane.f32.xlu0 %v2972_v26 }
0x1d11   :  { %4640 = vpow2.f32 %v2957_v28  ;;  %v2959_v33 = vmul.f32 1.442695, %v2944_v9 }
0x1d13   :  { %v6007_v62 = vpop.eup %4636  ;;  %4642 = vpow2.f32 %v2959_v33 }
0x1d14   :  { %v2929_v11 = vpop.xlane.xlu1 %2928  ;;  %v2975_v5 = vsel %vm547_vm6, %v6007_v62, 0.0 }
0x1d15   :  { %v2945_v18 = vsub.f32 %v2905_v37, %v2929_v11  ;;  %2976 = vadd.xlane.f32.xlu1 %v2975_v5 }
0x1d16   :  { %v2932_v34 = vpop.xlane.xlu0 %2931 }
0x1d17   :  { %v6011_v55 = vpop.eup %4638  ;;  %v2961_v47 = vmul.f32 1.442695, %v2945_v18  ;;  %v2946_v56 = vsub.f32 %v2906_v35, %v2932_v34 }
0x1d18   :  { %v2978_v12 = vsel %vm547_vm6, %v6011_v55, 0.0 }
0x1d19   :  { %4644 = vpow2.f32 %v2961_v47  ;;  %v2963_v45 = vmul.f32 1.442695, %v2946_v56  ;;  %2979 = vadd.xlane.f32.xlu0 %v2978_v12 }
0x1d1b   :  { %v6015_v0 = vpop.eup %4640  ;;  %4646 = vpow2.f32 %v2963_v45 }
0x1d1c   :  { %v2981_v22 = vsel %vm547_vm6, %v6015_v0, 0.0  ;;  %v2935_v32 = vpop.xlane.xlu1 %2934 }
0x1d1d   :  { %v6019_v48 = vpop.eup %4642  ;;  %2982 = vadd.xlane.f32.xlu1 %v2981_v22  ;;  %v2947_v61 = vsub.f32 %v5990_v53, %v2935_v32 }
0x1d1e   :  { %v2984_v37 = vsel %vm547_vm6, %v6019_v48, 0.0  ;;  %v2938_v40 = vpop.xlane.xlu0 %2937 }
0x1d1f   :  { %2985 = vadd.xlane.f32.xlu0 %v2984_v37  ;;  %v2965_v19 = vmul.f32 1.442695, %v2947_v61  ;;  %v2948_v14 = vsub.f32 %v5993_v15, %v2938_v40 }
0x1d21   :  { %4648 = vpow2.f32 %v2965_v19  ;;  %v2967_v4 = vmul.f32 1.442695, %v2948_v14 }
0x1d23   :  { %v6023_v35 = vpop.eup %4644  ;;  %4650 = vpow2.f32 %v2967_v4 }
0x1d24   :  { %v2987_v63 = vsel %vm547_vm6, %v6023_v35, 0.0 }
0x1d25   :  { %v6027_v50 = vpop.eup %4646  ;;  %2988 = vadd.xlane.f32.xlu0 %v2987_v63 }
0x1d26   :  { %v2990_v46 = vsel %vm547_vm6, %v6027_v50, 0.0 }
0x1d29   :  { %2991 = vadd.xlane.f32.xlu0 %v2990_v46 }
0x1d2b   :  { %v6037_v30 = vpop.eup %4648 }
0x1d2c   :  { %v2993_v21 = vsel %vm547_vm6, %v6037_v30, 0.0 }
0x1d2e   :  { %3024 = vrot.lane.b32.xlu1 %v5823_v27, %s4731_s18  ;;  %v4651_v27 = vpop.eup %4650 }
0x1d2f   :  { %v2996_v13 = vsel %vm547_vm6, %v4651_v27, 0.0 }
0x1d3f   :  { %3026 = vrot.lane.b32.xlu0 %v5813_v8, %s4731_s18 }
0x1d52   :  { %2994 = vadd.xlane.f32.xlu1 %v2993_v21 }
0x1d5e   :  { %2997 = vadd.xlane.f32.xlu0 %v2996_v13 }
0x1d63   :  { %3185 = vrot.lane.b32.xlu1 %v5785_v6, %s4725_s13 }
0x1d74   :  { %3187 = vrot.lane.b32.xlu0 %v5790_v10, %s4725_s13 }
0x1d9a   :  { %v2971_v8 = vpop.xlane.xlu1 %2970 }
0x1d9c   :  { %v2974_v53 = vpop.xlane.xlu0 %2973 }
0x1d9d   :  { %4652 = vrcp.f32 %v2974_v53 }
0x1d9e   :  { %4654 = vrcp.f32 %v2971_v8 }
0x1da2   :  { %v2977_v15 = vpop.xlane.xlu1 %2976 }
0x1da6   :  { %v2980_v41 = vpop.xlane.xlu0 %2979 }
0x1da7   :  { %4656 = vrcp.f32 %v2980_v41  ;;  %v4653_v52 = vpop.eup %4652 }
0x1da8   :  { %4658 = vrcp.f32 %v2977_v15  ;;  %v4655_v51 = vpop.eup %4654  ;;  %v3002_v10 = vmul.f32 %v4653_v52, %v6003_v20 }
0x1da9   :  { %v3000_v7 = vmul.f32 %v4655_v51, %v5999_v42 }
0x1daa   :  { %v2983_v25 = vpop.xlane.xlu1 %2982 }
0x1dab   :  { %v3019_v28 = vpack.c.bf16 %v3002_v10, %v3000_v7 }
0x1dac   :  { %v2986_v59 = vpop.xlane.xlu0 %2985 }
0x1dad   :  { %4660 = vrcp.f32 %v2986_v59 }
0x1dae   :  { %v3025_v57 = vpop.permute.xlu1 %3024  ;;  %4662 = vrcp.f32 %v2983_v25 }
0x1daf   :  { %4344 = vmatpush3.bf16.msra.mxu0 %v3025_v57 }
0x1db0   :  { %4345 = vmatprep.subr.bf16.mxu0 %v6195_v49 }
0x1db1   :  { %v4657_v9 = vpop.eup %4656 }
0x1db2   :  { %v2989_v16 = vpop.xlane.xlu0 %2988  ;;  %v4659_v33 = vpop.eup %4658  ;;  %v3006_v11 = vmul.f32 %v4657_v9, %v6011_v55 }
0x1db3   :  { %v3004_v20 = vmul.f32 %v4659_v33, %v6007_v62 }
0x1db5   :  { %v3020_v5 = vpack.c.bf16 %v3006_v11, %v3004_v20 }
0x1db6   :  { %v2992_v6 = vpop.xlane.xlu0 %2991 }
0x1db7   :  { %4664 = vrcp.f32 %v2992_v6  ;;  %v4661_v42 = vpop.eup %4660 }
0x1db8   :  { %4666 = vrcp.f32 %v2989_v16  ;;  %v4663_v18 = vpop.eup %4662  ;;  %v3010_v34 = vmul.f32 %v4661_v42, %v6019_v48 }
0x1db9   :  { %v3008_v47 = vmul.f32 %v4663_v18, %v6015_v0 }
0x1dba   :  { %v3027_v24 = vpop.permute.xlu0 %3026 }
0x1dbb   :  { %v3045_v26 = vsel %vm563_vm5, %v3027_v24, 0  ;;  %v3021_v56 = vpack.c.bf16 %v3010_v34, %v3008_v47 }
0x1dbc   :  { %4346 = vmatpush3.bf16.msra.mxu0 %v3045_v26 }
0x1dbf   :  { %4348 = vmatmul.mubr.msk.bf16.vlgmr.msra.gmra.mrb[124].mxu0 %vm547_vm6, %v3019_v28 }
0x1dc0   :  { %4351 = vmatprep.mubr.msk.bf16.mxu0 %vm4727_vm4, %v6195_v49 }
0x1dc1   :  { %v4665_v12 = vpop.eup %4664 }
0x1dc2   :  { %v4667_v55 = vpop.eup %4666  ;;  %v3014_v62 = vmul.f32 %v4665_v12, %v6027_v50 }
0x1dc3   :  { %v3012_v45 = vmul.f32 %v4667_v55, %v6023_v35 }
0x1dc5   :  { %v3022_v22 = vpack.c.bf16 %v3014_v62, %v3012_v45 }
0x1dc7   :  { %4352 = vmatmul.mubr.msk.bf16.gmra.mrb[128].mxu0 %vm547_vm6, %v3020_v5 }
0x1dc8   :  { %4355 = vmatprep.mubr.msk.bf16.mxu0 %vm4727_vm4, %v6195_v49 }
0x1dcf   :  { %4356 = vmatmul.mubr.msk.bf16.gmra.mrb[132].mxu0 %vm547_vm6, %v3021_v56 }
0x1dd0   :  { %4359 = vmatprep.mubr.msk.bf16.mxu0 %vm4727_vm4, %v6195_v49 }
0x1dd7   :  { %4360 = vmatmul.mubr.msk.bf16.gmra.mrb[136].mxu0 %vm547_vm6, %v3022_v22 }
0x1dd8   :  { %4363 = vmatprep.mubr.msk.bf16.mxu0 %vm4727_vm4, %v6195_v49 }
0x1ddf   :  { %v2995_v48 = vpop.xlane.xlu1 %2994 }
0x1de0   :  { %4668 = vrcp.f32 %v2995_v48 }
0x1de3   :  { %v3186_v20 = vpop.permute.xlu1 %3185 }
0x1dea   :  { %v4669_v37 = vpop.eup %4668 }
0x1deb   :  { %v2998_v0 = vpop.xlane.xlu0 %2997  ;;  %v3016_v46 = vmul.f32 %v4669_v37, %v6037_v30  ;;  %v4484_v37 = vld [vmem:[%s6188_s2 + $0x64] ss:$12 sps:$4 sm:$0xff]  }
0x1dec   :  { %4670 = vrcp.f32 %v2998_v0 }
0x1df6   :  { %v4671_v63 = vpop.eup %4670 }
0x1df7   :  { %v3018_v32 = vmul.f32 %v4671_v63, %v4651_v27  ;;  %v4489_v63 = vld [vmem:[%s6188_s2 + $0x80] ss:$12 sps:$4 sm:$0xff]  }
0x1df9   :  { %v3023_v61 = vpack.c.bf16 %v3018_v32, %v3016_v46  ;;  %v4487_v46 = vld [vmem:[%s6188_s2 + $0x7c] ss:$12 sps:$4 sm:$0xff]  }
0x1dfb   :  { %4364 = vmatmul.mubr.msk.bf16.gmra.mrb[140].mxu0 %vm547_vm6, %v3023_v61 }
0x1e92   :  { %v3081_v50 = vpop.f32.mrb[124].mxu0 }
0x1e93   :  { %v4349_v35 = vpop.f32.mrb[125].mxu0  ;;  %v3120_v40 = vmul.f32 %v5887_v39, %v3081_v50 }
0x1e94   :  { %v3084_v19 = vpop.f32.mrb[126].mxu0 }
0x1e95   :  { %v3121_v14 = vmul.f32 %v5895_v60, %v3084_v19  ;;  %v4350_v4 = vpop.f32.mrb[127].mxu0 }
0x1e97   :  { %v3130_v21 = vpack.c.bf16 %v3121_v14, %v3120_v40 }
0x1e99   :  { %4367 = vmatprep.subr.bf16.mxu1 %v3130_v21 }
0x1e9a   :  { %v3089_v13 = vpop.f32.mrb[128].mxu0  ;;  %4368 = vmatpush3.bf16.msra.mxu1 %v3130_v21 }
0x1e9b   :  { %v4353_v8 = vpop.f32.mrb[129].mxu0  ;;  %v3122_v30 = vmul.f32 %v5908_v58, %v3089_v13 }
0x1e9c   :  { %v3092_v53 = vpop.f32.mrb[130].mxu0 }
0x1e9d   :  { %v3123_v27 = vmul.f32 %v5914_v44, %v3092_v53  ;;  %v4354_v15 = vpop.f32.mrb[131].mxu0 }
0x1e9f   :  { %v3131_v41 = vpack.c.bf16 %v3123_v27, %v3122_v30  ;;  %v3776_v30 = vld [vmem:[%s6187_s1 + $0x145] ss:$0 sm:$0xff] }
0x1ea1   :  { %4369 = vmatprep.subr.bf16.mxu1 %v3131_v41 }
0x1ea2   :  { %v3097_v25 = vpop.f32.mrb[132].mxu0  ;;  %4370 = vmatpush3.bf16.msra.mxu1 %v3131_v41 }
0x1ea3   :  { %v4357_v59 = vpop.f32.mrb[133].mxu0  ;;  %v3124_v60 = vmul.f32 %v5922_v23, %v3097_v25 }
0x1ea4   :  { %v3100_v39 = vpop.f32.mrb[134].mxu0 }
0x1ea5   :  { %v3125_v57 = vmul.f32 %v5928_v3, %v3100_v39  ;;  %v4358_v16 = vpop.f32.mrb[135].mxu0 }
0x1ea6   :  { %v4490_v16 = vld [vmem:[%s6189_s3 + $0x80] sm:$0xff]  }
0x1ea7   :  { %v3132_v52 = vpack.c.bf16 %v3125_v57, %v3124_v60  ;;  %4389 = vmatprep.subr.bf16.mxu0 %v4490_v16 }
0x1ea8   :  { %4390 = vmatpush3.bf16.msra.mxu0 %v4490_v16 }
0x1ea9   :  { %4371 = vmatprep.subr.bf16.mxu1 %v3132_v52 }
0x1eaa   :  { %v3105_v6 = vpop.f32.mrb[136].mxu0  ;;  %4372 = vmatpush3.bf16.msra.mxu1 %v3132_v52  ;;  %v4491_v52 = vld [vmem:[%s6189_s3 + $0x88] sm:$0xff]  }
0x1eab   :  { %v4361_v51 = vpop.f32.mrb[137].mxu0  ;;  %v3126_v44 = vmul.f32 %v5934_v38, %v3105_v6  ;;  %v3188_v38 = vpop.permute.xlu0 %3187  ;;  %4391 = vmatprep.subr.bf16.mxu0 %v4491_v52  ;;  %v4493_v6 = vld [vmem:[%s6189_s3 + $0x98] sm:$0xff]  }
0x1eac   :  { %v3108_v58 = vpop.f32.mrb[138].mxu0  ;;  %4392 = vmatpush3.bf16.msra.mxu0 %v4491_v52  ;;  %v4494_v51 = vld [vmem:[%s6189_s3 + $0xa0] sm:$0xff]  }
0x1ead   :  { %v3127_v10 = vmul.f32 %v5940_v36, %v3108_v58  ;;  %v4362_v24 = vpop.f32.mrb[139].mxu0  ;;  %v4495_v58 = vld [vmem:[%s6189_s3 + $0xa8] sm:$0xff]   ;;  %v3815_v52 = vld [vmem:[%s6187_s1 + $0x146] ss:$0 sm:$0xff] }
0x1eaf   :  { %v3133_v7 = vpack.c.bf16 %v3127_v10, %v3126_v44  ;;  %v4496_v44 = vld [vmem:[%s6189_s3 + $0xb0] sm:$0xff]   ;;  %v4497_v10 = vld [vmem:[%s6189_s3 + $0xb8] sm:$0xff]  }
0x1eb1   :  { %4373 = vmatprep.subr.bf16.mxu1 %v3133_v7 }
0x1eb2   :  { %4374 = vmatpush3.bf16.msra.mxu1 %v3133_v7 }
0x1ece   :  { %v3113_v26 = vpop.f32.mrb[140].mxu0 }
0x1ecf   :  { %v4365_v28 = vpop.f32.mrb[141].mxu0  ;;  %v3128_v3 = vmul.f32 %v5946_v1, %v3113_v26 }
0x1ed0   :  { %v3116_v23 = vpop.f32.mrb[142].mxu0 }
0x1ed1   :  { %v3129_v9 = vmul.f32 %v5952_v2, %v3116_v23  ;;  %v4366_v33 = vpop.f32.mrb[143].mxu0 }
0x1ed3   :  { %v3134_v11 = vpack.c.bf16 %v3129_v9, %v3128_v3 }
0x1ed5   :  { %4375 = vmatprep.subr.bf16.mxu1 %v3134_v11 }
0x1ed6   :  { %4376 = vmatpush3.bf16.msra.mxu1 %v3134_v11 }
0x1ed7   :  { %4381 = vmatprep.subr.bf16.mxu1 %v3186_v20 }
0x1ed9   :  { %4378 = vmatmul.mubr.msk.bf16.vlgmr.msra.gmra.mrb[116].mxu1 %vm1005_vm15, %v5300_v43 }
0x1eda   :  { %4382 = vmatpush3.bf16.msra.mxu1 %v3186_v20 }
0x1edb   :  { %4383 = vmatprep.subr.bf16.mxu1 %v3188_v38 }
0x1ede   :  { %4384 = vmatpush3.bf16.msra.mxu1 %v3188_v38 }
0x1fac   :  { %v4379_v36 = vpop.f32.mrb[116].mxu1 }
0x1fad   :  { %v3169_v5 = vpop.f32.mrb[117].mxu1  ;;  %v3184_v34 = vpack.c.bf16 %v4379_v36, %v4379_v36 }
0x1fae   :  { %v4380_v42 = vpop.f32.mrb[118].mxu1 }
0x1faf   :  { %v3172_v18 = vpop.f32.mrb[119].mxu1 }
0x1fb0   :  { %v3183_v1 = vpack.c.bf16 %v3172_v18, %v3169_v5 }
0x1fb2   :  { %4385 = vmatprep.mubr.msk.bf16.mxu1 %vm277_vm3, %v3183_v1 }
0x1fb3   :  { %4386 = vmatmul.mubr.msk.bf16.vlgmr.msra.gmra.mrb[120].mxu1 %vm277_vm3, %v3184_v34 }
0x1fb4   :  { %3343 = vmatprep.mubr.bf16.mxu1 %v6196_v31 }
0x2086   :  { %v4387_v2 = vpop.f32.mrb[120].mxu1 }
0x2087   :  { %v3231_v47 = vpop.f32.mrb[121].mxu1  ;;  %v6086_v43 = vadd.f32 %v4387_v2, %v5765_v29 }
0x2088   :  { %v6089_v56 = vadd.f32 %v3231_v47, %v5768_v54  ;;  %v4388_v12 = vpop.f32.mrb[122].mxu1 }
0x2089   :  { %v3234_v55 = vpop.f32.mrb[123].mxu1  ;;  %v3250_v29 = vmul.f32 %v6086_v43, %v6086_v43 }
0x208a   :  { %v6092_v62 = vadd.f32 %v3234_v55, %v5773_v17  ;;  %v3248_v45 = vmul.f32 %v6089_v56, %v6089_v56  ;;  %v4486_v17 = vld [vmem:[%s6188_s2 + $0x68] ss:$12 sps:$4 sm:$0xff]  }
0x208b   :  { %v3257_v0 = vsel %vm284_vm2, %v3250_v29, 0.0  ;;  %3311 = vmatprep.subr.bf16.mxu1 %v4486_v17  ;;  %vm3555_vm2 = vcmask 259072  }
0x208c   :  { %v3251_v22 = vsel %vm277_vm3, %v3248_v45, 0.0  ;;  %v3249_v48 = vmul.f32 %v6092_v62, %v6092_v62  ;;  %3312 = vmatpush1.bf16.msra.mxu1 %v4484_v37 }
0x208d   :  { %3252 = vadd.xlane.f32.xlu1 %v3251_v22  ;;  %3313 = vmatprep.subr.bf16.mxu1 %v4489_v63 }
0x208e   :  { %v3254_v54 = vsel %vm277_vm3, %v3249_v48, 0.0 }
0x208f   :  { %3255 = vadd.xlane.f32.xlu0 %v3254_v54 }
0x2090   :  { %3314 = vmatpush1.bf16.msra.mxu1 %v4487_v46 }
0x2091   :  { %3258 = vadd.xlane.f32.xlu1 %v3257_v0  ;;  %4409 = vmatprep.subr.bf16.mxu1 %v6195_v49 }
0x211a   :  { %v3253_v32 = vpop.xlane.xlu1 %3252 }
0x211b   :  { %v3260_v61 = vmul.f32 0.03125, %v3253_v32 }
0x211c   :  { %v3256_v50 = vpop.xlane.xlu0 %3255 }
0x211d   :  { %v3263_v35 = vadd.f32 1e-06, %v3260_v61  ;;  %v3261_v19 = vmul.f32 0.03125, %v3256_v50 }
0x211e   :  { %v3259_v40 = vpop.xlane.xlu1 %3258 }
0x211f   :  { %4672 = vrsqrt.f32 %v3263_v35  ;;  %v3264_v14 = vadd.f32 1e-06, %v3261_v19  ;;  %v3262_v4 = vmul.f32 0.03125, %v3259_v40 }
0x2121   :  { %4674 = vrsqrt.f32 %v3264_v14  ;;  %v3265_v21 = vadd.f32 1e-06, %v3262_v4  ;;  %v51_v14 = vld [vmem:[%s6187_s1 + $0x108] sm:$0x3f] }
0x2123   :  { %4676 = vrsqrt.f32 %v3265_v21  ;;  %v3505_v21 = vpack.c.bf16 %v51_v14, %v51_v14 }
0x2129   :  { %v4673_v13 = vpop.eup %4672 }
0x212a   :  { %v3269_v8 = vmul.f32 %v4673_v13, %v6089_v56 }
0x212b   :  { %v4675_v53 = vpop.eup %4674 }
0x212c   :  { %v3270_v27 = vmul.f32 %v4675_v53, %v6092_v62  ;;  %v3276_v25 = vmul.f32 %v3776_v30, %v3269_v8 }
0x212d   :  { %v4677_v15 = vpop.eup %4676 }
0x212e   :  { %v3277_v41 = vmul.f32 %v3776_v30, %v3270_v27  ;;  %v3271_v39 = vmul.f32 %v4677_v15, %v6086_v43  ;;  %v56_v27 = vld [vmem:[%s6187_s1 + $0x120] sm:$0xff] }
0x2130   :  { %v3283_v59 = vpack.c.bf16 %v3277_v41, %v3276_v25  ;;  %v3278_v60 = vmul.f32 %v3776_v30, %v3271_v39  ;;  %v55_v30 = vld [vmem:[%s6187_s1 + $0x118] sm:$0xff]  ;;  %v57_v41 = vld [vmem:[%s6187_s1 + $0x128] sm:$0xff]  ;;  %v58_v25 = vld [vmem:[%s6187_s1 + $0x130] sm:$0xff] }
0x2131   :  { %v3569_v15 = vpack.c.bf16 %v56_v27, %v55_v30 }
0x2132   :  { %3785 = vmatmul.mubr.msk.bf16.vlgmr.msra.gmra.mrb[124].mxu1 %vm277_vm3, %v3283_v59  ;;  %v3284_v57 = vpack.c.bf16 %v3278_v60, %v3278_v60  ;;  %v3570_v59 = vpack.c.bf16 %v58_v25, %v57_v41 }
0x2133   :  { %3353 = vmatprep.mubr.bf16.mxu1 %v6196_v31  ;;  %v4492_v31 = vld [vmem:[%s6189_s3 + $0x90] sm:$0xff]  }
0x2134   :  { %4393 = vmatprep.subr.bf16.mxu0 %v4492_v31 }
0x2135   :  { %4394 = vmatpush3.bf16.msra.mxu0 %v4492_v31 }
0x2136   :  { %4395 = vmatprep.subr.bf16.mxu0 %v4493_v6 }
0x2139   :  { %4396 = vmatpush3.bf16.msra.mxu0 %v4493_v6 }
0x213a   :  { %3786 = vmatmul.mubr.msk.bf16.gmra.mrb[128].mxu1 %vm277_vm3, %v3284_v57  ;;  %4397 = vmatprep.subr.bf16.mxu0 %v4494_v51 }
0x213b   :  { %4413 = vmatprep.mubr.msk.bf16.mxu1 %vm4727_vm4, %v6195_v49 }
0x213d   :  { %4398 = vmatpush3.bf16.msra.mxu0 %v4494_v51  ;;  %v3816_v51 = vld [vmem:[%s6187_s1 + $0x138] ss:$0 sm:$0xff] }
0x213e   :  { %4399 = vmatprep.subr.bf16.mxu0 %v4495_v58 }
0x2141   :  { %4400 = vmatpush3.bf16.msra.mxu0 %v4495_v58 }
0x2142   :  { %4401 = vmatprep.subr.bf16.mxu0 %v4496_v44 }
0x2145   :  { %4402 = vmatpush3.bf16.msra.mxu0 %v4496_v44 }
0x2146   :  { %4403 = vmatprep.subr.bf16.mxu0 %v4497_v10 }
0x2149   :  { %4404 = vmatpush3.bf16.msra.mxu0 %v4497_v10 }
0x214a   :  { %4417 = vmatprep.subr.bf16.mxu0 %v6195_v49 }
0x2205   :  { %v3345_v24 = vpop.f32.mrb[124].mxu1 }
0x2206   :  { %v3787_v7 = vmul.f32 -1.442695, %v3345_v24  ;;  %v3347_v26 = vpop.f32.mrb[125].mxu1 }
0x2207   :  { %v3349_v28 = vpop.f32.mrb[126].mxu1 }
0x2208   :  { %4678 = vpow2.f32 %v3787_v7  ;;  %v3788_v23 = vmul.f32 -1.442695, %v3349_v28  ;;  %v3351_v3 = vpop.f32.mrb[127].mxu1 }
0x220a   :  { %4680 = vpow2.f32 %v3788_v23 }
0x220d   :  { %v3355_v9 = vpop.f32.mrb[128].mxu1 }
0x220e   :  { %v3789_v33 = vmul.f32 -1.442695, %v3355_v9  ;;  %v3357_v11 = vpop.f32.mrb[129].mxu1 }
0x220f   :  { %v3359_v20 = vpop.f32.mrb[130].mxu1 }
0x2210   :  { %4682 = vpow2.f32 %v3789_v33  ;;  %v3360_v38 = vpop.f32.mrb[131].mxu1 }
0x2212   :  { %v4679_v36 = vpop.eup %4678 }
0x2213   :  { %v3371_v5 = vadd.f32 1.0, %v4679_v36 }
0x2214   :  { %v4681_v42 = vpop.eup %4680 }
0x2215   :  { %4684 = vrcp.f32 %v3371_v5  ;;  %v3372_v18 = vadd.f32 1.0, %v4681_v42 }
0x2217   :  { %4686 = vrcp.f32 %v3372_v18 }
0x221a   :  { %v4683_v1 = vpop.eup %4682 }
0x221b   :  { %v3373_v34 = vadd.f32 1.0, %v4683_v1 }
0x221d   :  { %4688 = vrcp.f32 %v3373_v34 }
0x221f   :  { %v4685_v2 = vpop.eup %4684 }
0x2220   :  { %v3380_v47 = vmul.f32 %v4685_v2, %v3345_v24 }
0x2221   :  { %v4687_v12 = vpop.eup %4686 }
0x2222   :  { %v3383_v55 = vmul.f32 %v3380_v47, %v3347_v26  ;;  %v3381_v45 = vmul.f32 %v4687_v12, %v3349_v28 }
0x2224   :  { %v3384_v22 = vmul.f32 %v3381_v45, %v3351_v3 }
0x2226   :  { %v3403_v48 = vpack.c.bf16 %v3384_v22, %v3383_v55 }
0x2227   :  { %v4689_v29 = vpop.eup %4688 }
0x2228   :  { %v3382_v54 = vmul.f32 %v4689_v29, %v3355_v9  ;;  %4405 = vmatprep.mubr.bf16.mxu0 %v3403_v48 }
0x222a   :  { %v3385_v0 = vmul.f32 %v3382_v54, %v3357_v11 }
0x222c   :  { %v3404_v17 = vpack.c.bf16 %v3385_v0, %v3385_v0 }
0x222e   :  { %4406 = vmatmul.mubr.bf16.vlgmr.msra.gmra.mrb[144].mxu0 %v3404_v17 }
0x222f   :  { %4421 = vmatprep.mubr.msk.bf16.mxu0 %vm4727_vm4, %v6195_v49  ;;  %4418 = vmatpush3.bf16.msra.mxu0 %v3569_v15  ;;  %vm3618_vm4 = vcmask 128000  }
0x2230   :  { %4419 = vmatprep.subr.bf16.mxu0 %v6195_v49 }
0x2233   :  { %4420 = vmatpush3.bf16.msra.mxu0 %v3570_v59 }
0x2301   :  { %v4407_v37 = vpop.f32.mrb[144].mxu0 }
0x2302   :  { %v3487_v63 = vpop.f32.mrb[145].mxu0  ;;  %v3503_v32 = vadd.f32 %v4407_v37, %v6086_v43 }
0x2303   :  { %v4408_v46 = vpop.f32.mrb[146].mxu0  ;;  %v3501_v50 = vadd.f32 %v3487_v63, %v6089_v56 }
0x2304   :  { %v3490_v61 = vpop.f32.mrb[147].mxu0  ;;  %v3507_v40 = vpack.c.bf16 %v3503_v32, %v3503_v32 }
0x2305   :  { %v3502_v35 = vadd.f32 %v3490_v61, %v6092_v62 }
0x2306   :  { %v3512_v4 = vsel %vm563_vm5, %v3507_v40, 0 }
0x2307   :  { %v3506_v19 = vpack.c.bf16 %v3502_v35, %v3501_v50 }
0x2309   :  { %4410 = vmatpush3.bf16.msra.mxu1 %v3506_v19 }
0x230a   :  { %4411 = vmatprep.subr.bf16.mxu1 %v6195_v49 }
0x230d   :  { %4412 = vmatpush3.bf16.msra.mxu1 %v3512_v4 }
0x2310   :  { %4414 = vmatmul.mubr.msk.bf16.vlgmr.msra.gmra.mrb[132].mxu1 %vm547_vm6, %v3505_v21 }
0x23e3   :  { %v3548_v43 = vpop.f32.mrb[132].mxu1 }
0x23e4   :  { %v3554_v56 = vmul.f32 %v3548_v43, %v3548_v43  ;;  %v4415_v13 = vpop.f32.mrb[133].mxu1 }
0x23e5   :  { %v3551_v62 = vpop.f32.mrb[134].mxu1 }
0x23e6   :  { %v3556_v8 = vsel %vm3555_vm2, %v3554_v56, 0.0  ;;  %v4416_v53 = vpop.f32.mrb[135].mxu1 }
0x23e7   :  { %3557 = vadd.xlane.f32.xlu1 %v3556_v8 }
0x2474   :  { %v3558_v39 = vpop.xlane.xlu1 %3557 }
0x2475   :  { %v3559_v60 = vmul.f32 0.03125, %v3558_v39 }
0x2477   :  { %v3560_v57 = vadd.f32 1e-06, %v3559_v60 }
0x2479   :  { %4690 = vrsqrt.f32 %v3560_v57 }
0x2483   :  { %v4691_v16 = vpop.eup %4690 }
0x2484   :  { %v3562_v49 = vmul.f32 %v4691_v16, %v3548_v43 }
0x2486   :  { %v3567_v31 = vmul.f32 %v3815_v52, %v3562_v49 }
0x2488   :  { %v3568_v6 = vpack.c.bf16 %v3567_v31, %v3567_v31 }
0x248a   :  { %4422 = vmatmul.mubr.msk.bf16.vlgmr.msra.gmra.mrb[148].mxu0 %vm277_vm3, %v3568_v6 }
0x255d   :  { %v3612_v58 = vpop.f32.mrb[148].mxu0 }
0x255e   :  { %v3613_v44 = vadd.f32 %v3816_v51, %v3612_v58  ;;  %v4423_v10 = vpop.f32.mrb[149].mxu0 }
0x255f   :  { %v3615_v24 = vpop.f32.mrb[150].mxu0 }
0x2560   :  { %3619 = vst.msk [vmem:[%s6190_s4] sm:$0x3f] %vm3618_vm4, %v3613_v44  ;;  %v4424_v7 = vpop.f32.mrb[151].mxu0 }

</bundles_post_ra>
